<compile_context>
chip_gen: v5e
topology: v5e:2x2
jax: 0.10.0
libtpu: 0.0.40
codegen_flags: <defaults>
</compile_context>

<pallas_src>
import math

import jax
import jax.numpy as jnp
from jax.experimental import pallas as pl
from jax.experimental.pallas import tpu as pltpu


# ----------------------------------------------------------------------------
# Pallas matmul kernels (the compute hot path)
# ----------------------------------------------------------------------------
_VMEM_LIMIT = 32 * 1024 * 1024   # fits v5e/v6e/v7x with headroom


def _round_up(x, m):
    return (x + m - 1) // m * m


def _mm_kernel(x_ref, w_ref, o_ref):
    # single K step: no accumulator scratch, write output tile directly
    o_ref[...] = jnp.dot(x_ref[...], w_ref[...],
                         preferred_element_type=jnp.float32)


def _mm_acc_kernel(x_ref, w_ref, o_ref, acc_ref):
    @pl.when(pl.program_id(2) == 0)
    def _():
        acc_ref[...] = jnp.zeros_like(acc_ref)

    acc_ref[...] += jnp.dot(x_ref[...], w_ref[...],
                            preferred_element_type=jnp.float32)

    @pl.when(pl.program_id(2) == pl.num_programs(2) - 1)
    def _():
        o_ref[...] = acc_ref[...]


def pallas_matmul(x, w):
    """(M, K) @ (K, N) -> (M, N); bf16 operands on the MXU, f32 accumulation."""
    M, K = x.shape
    K2, N = w.shape
    assert K == K2

    # ---- tile selection ----------------------------------------------------
    Mp = _round_up(M, 16)                      # bf16 sublane packing
    if Mp > 256:
        tm = 256
        Mp = _round_up(M, tm)
    else:
        tm = Mp
    Np = _round_up(N, 128)
    tn = 256 if Np % 256 == 0 else 128
    Kp = _round_up(K, 128)
    if Kp > 1024:
        tk = 512 if Kp % 512 == 0 else (256 if Kp % 256 == 0 else 128)
    else:
        tk = Kp                                # single K step

    # ---- pad + bf16 cast (fused into one copy under jit) --------------------
    if (Mp, Kp) != (M, K):
        x = jnp.pad(x, ((0, Mp - M), (0, Kp - K)))
    if (Kp, Np) != (K, N):
        w = jnp.pad(w, ((0, Kp - K), (0, Np - N)))
    xb = x.astype(jnp.bfloat16)
    wb = w.astype(jnp.bfloat16)

    if tk == Kp:
        out = pl.pallas_call(
            _mm_kernel,
            out_shape=jax.ShapeDtypeStruct((Mp, Np), jnp.float32),
            grid_spec=pltpu.PrefetchScalarGridSpec(
                num_scalar_prefetch=0,
                grid=(Mp // tm, Np // tn),
                in_specs=[pl.BlockSpec((tm, Kp), lambda i, j: (i, 0)),
                          pl.BlockSpec((Kp, tn), lambda i, j: (0, j))],
                out_specs=pl.BlockSpec((tm, tn), lambda i, j: (i, j))),
            compiler_params=pltpu.CompilerParams(
                dimension_semantics=("parallel", "parallel"),
                vmem_limit_bytes=_VMEM_LIMIT),
        )(xb, wb)
    else:
        out = pl.pallas_call(
            _mm_acc_kernel,
            out_shape=jax.ShapeDtypeStruct((Mp, Np), jnp.float32),
            grid_spec=pltpu.PrefetchScalarGridSpec(
                num_scalar_prefetch=0,
                grid=(Mp // tm, Np // tn, Kp // tk),
                in_specs=[pl.BlockSpec((tm, tk), lambda i, j, k: (i, k)),
                          pl.BlockSpec((tk, tn), lambda i, j, k: (k, j))],
                out_specs=pl.BlockSpec((tm, tn), lambda i, j, k: (i, j)),
                scratch_shapes=[pltpu.VMEM((tm, tn), jnp.float32)]),
            compiler_params=pltpu.CompilerParams(
                dimension_semantics=("parallel", "parallel", "arbitrary"),
                vmem_limit_bytes=_VMEM_LIMIT),
        )(xb, wb)

    if (Mp, Np) != (M, N):
        out = out[:M, :N]
    return out


def linear(x, w, b=None):
    """PyTorch nn.Linear semantics: y = x @ w.T + b   with w: (out, in)."""
    shp = x.shape
    y = pallas_matmul(x.reshape(-1, shp[-1]), w.T)
    if b is not None:
        y = y + b
    return y.reshape(shp[:-1] + (w.shape[0],))


def conv1d(x, weight, pad_left, pad_right, bias=None):
    """PyTorch nn.Conv1d (NCW) via im2col + Pallas matmul."""
    B, C, T = x.shape
    O, _, K = weight.shape
    xp = jnp.pad(x, ((0, 0), (0, 0), (pad_left, pad_right)))
    T_out = T + pad_left + pad_right - K + 1
    cols = jnp.stack([xp[:, :, i:i + T_out] for i in range(K)], axis=-1)
    patches = jnp.transpose(cols, (0, 2, 1, 3)).reshape(B * T_out, C * K)
    y = pallas_matmul(patches, weight.reshape(O, C * K).T)
    if bias is not None:
        y = y + bias
    return jnp.transpose(y.reshape(B, T_out, O), (0, 2, 1))


def conv_bank_fused(x_bct, fused):
    """All K bank convolutions as ONE im2col matmul against the fused weight."""
    B, C, T = x_bct.shape
    kmax = fused['kmax']
    xp = jnp.pad(x_bct, ((0, 0), (0, 0), (fused['pad_l'], fused['pad_r'])))
    cols = jnp.stack([xp[:, :, i:i + T] for i in range(kmax)], axis=-1)
    patches = jnp.transpose(cols, (0, 2, 1, 3)).reshape(B * T, C * kmax)
    y = pallas_matmul(patches, fused['w_mat'])             # (B*T, Ktot*feat)
    cout = fused['w_mat'].shape[1]
    return jnp.transpose(y.reshape(B, T, cout), (0, 2, 1))  # (B, Cout, T)


# ----------------------------------------------------------------------------
# Building blocks (eval-mode semantics)
# ----------------------------------------------------------------------------
def batchnorm1d(x, p, eps=1e-5):
    # eval-mode nn.BatchNorm1d over the channel dim of an NCW tensor
    return ((x - p['rm'][None, :, None])
            / jnp.sqrt(p['rv'][None, :, None] + eps)
            * p['gamma'][None, :, None] + p['beta'][None, :, None])


def max_pool1d_k2_s1(x):
    # nn.ConstantPad1d([0, 1], 0) + nn.MaxPool1d(kernel_size=2, stride=1)
    xp = jnp.pad(x, ((0, 0), (0, 0), (0, 1)))
    return jnp.maximum(xp[:, :, :-1], xp[:, :, 1:])


def prenet_forward(x, layers):
    # TODO(synk): Prenet dropout (p=0.5) omitted — eval-mode semantics.
    for lp in layers:
        x = jax.nn.relu(linear(x, lp['w'], lp['b']))
    return x


def gru_cell_t(x, h, p):
    # PyTorch nn.GRUCell (gate order r, z, n) on pre-transposed weights
    wt_ih, b_ih, wt_hh, b_hh = p
    gi = jnp.dot(x, wt_ih) + b_ih
    gh = jnp.dot(h, wt_hh) + b_hh
    H = h.shape[-1]
    r = jax.nn.sigmoid(gi[:, :H] + gh[:, :H])
    z = jax.nn.sigmoid(gi[:, H:2 * H] + gh[:, H:2 * H])
    n = jnp.tanh(gi[:, 2 * H:] + r * gh[:, 2 * H:])
    return (1.0 - z) * n + z * h


def _transpose_gru(p):
    return (p['w_ih'].T, p['b_ih'], p['w_hh'].T, p['b_hh'])


def gru_seq(x, p, reverse=False):
    # One direction of nn.GRU(batch_first=True). Input projections for all
    # timesteps are one big Pallas matmul; the small recurrent matmul stays
    # inside the scan body.
    B, T, _ = x.shape
    H = p['w_hh'].shape[1]
    gx = linear(x, p['w_ih'], p['b_ih'])              # (B, T, 3H) via Pallas
    if reverse:
        gx = gx[:, ::-1]
    w_hh_T, b_hh = p['w_hh'].T, p['b_hh']

    def step(h, gxt):
        gh = jnp.dot(h, w_hh_T) + b_hh
        r = jax.nn.sigmoid(gxt[:, :H] + gh[:, :H])
        z = jax.nn.sigmoid(gxt[:, H:2 * H] + gh[:, H:2 * H])
        n = jnp.tanh(gxt[:, 2 * H:] + r * gh[:, 2 * H:])
        hn = (1.0 - z) * n + z * h
        return hn, hn

    _, hs = jax.lax.scan(step, jnp.zeros((B, H), jnp.float32),
                         jnp.swapaxes(gx, 0, 1))
    hs = jnp.swapaxes(hs, 0, 1)
    if reverse:
        hs = hs[:, ::-1]
    return hs


def cbhg_forward(x_bct, p):
    """CBHG. x_bct: (B, in_features, T) channel-first. Returns (B, T, 2*gru)."""
    x = conv_bank_fused(x_bct, p['bank_fused'])               # (B, K*128, T)
    x = jax.nn.relu(batchnorm1d(x, p['bank_fused']['bn']))
    x = max_pool1d_k2_s1(x)
    n_proj = len(p['proj'])
    for i, cp in enumerate(p['proj']):
        x = conv1d(x, cp['w'], 1, 1)
        x = batchnorm1d(x, cp)
        if i < n_proj - 1:
            x = jax.nn.relu(x)
    x = x + x_bct                              # residual connection
    x = jnp.transpose(x, (0, 2, 1))            # (B, T, C)
    if 'pre_highway' in p:
        x = linear(x, p['pre_highway']['w'], None)
    for hw in p['highways']:
        Hh = jax.nn.relu(linear(x, hw['Hw'], hw['Hb']))
        Tg = jax.nn.sigmoid(linear(x, hw['Tw'], hw['Tb']))
        x = Hh * Tg + x * (1.0 - Tg)
    fwd = gru_seq(x, p['gru_fwd'], reverse=False)
    bwd = gru_seq(x, p['gru_bwd'], reverse=True)
    return jnp.concatenate([fwd, bwd], axis=-1)


# ----------------------------------------------------------------------------
# Decoder (teacher-forced, memory queue, location-sensitive "original"
#          attention with sigmoid norm, separate stopnet) — one lax.scan.
# ----------------------------------------------------------------------------
def decoder_forward(p, inputs, memory, mask, r, mdim, msize):
    B, T_in, D_in = inputs.shape
    T_dec = memory.shape[1] // r
    memory_r = memory.reshape(B, T_dec, r * mdim)             # grouped by r

    # "new memory" pushed into the queue at step t is the ground-truth frame
    # t-1 (zeros at t == 0, matching the zero-initialised memory queue).
    prev_frames = jnp.concatenate(
        [jnp.zeros((B, 1, r * mdim), jnp.float32), memory_r[:, :-1]], axis=1)
    prev_frames = jnp.swapaxes(prev_frames, 0, 1)             # (T_dec, B, r*mdim)

    # Encoder-side attention projection: one Pallas matmul for all T_in.
    processed_inputs = linear(inputs, p['attn']['inputs']['w'], None)  # B,T_in,128

    # Pre-transpose every weight used in the scan body (once, outside the loop).
    pre0_w, pre0_b = p['prenet'][0]['w'].T, p['prenet'][0]['b']
    pre1_w, pre1_b = p['prenet'][1]['w'].T, p['prenet'][1]['b']
    arnn = _transpose_gru(p['attention_rnn'])
    drnn = [_transpose_gru(g) for g in p['decoder_rnns']]
    q_wt = p['attn']['query']['w'].T                          # (256, 128)
    loc_w_mat = p['attn']['loc_conv_w'].reshape(32, -1).T     # (2*31, 32)
    loc_dense_wt = p['attn']['loc_dense']['w'].T              # (32, 128)
    v_w, v_b = p['attn']['v']['w'][0], p['attn']['v']['b'][0]
    proj_wt = p['project_to_decoder_in']['w'].T
    proj_b = p['project_to_decoder_in']['b']
    mel_wt, mel_b = p['proj_to_mel']['w'].T, p['proj_to_mel']['b']
    stop_w, stop_b = p['stopnet']['w'][0], p['stopnet']['b'][0]
    neg_inf = jnp.float32(-jnp.inf)

    def step(carry, new_mem):
        mem_in, att_h, dec_h0, dec_h1, ctx, att_w, att_cum = carry
        # memory queue: keep memory_size frames, shift by r frames per step
        if msize > 0:
            mem_in = jnp.concatenate([mem_in[:, r * mdim:], new_mem], axis=-1)
        else:
            mem_in = new_mem
        # prenet  (TODO(synk): Prenet dropout (p=0.5) omitted — eval mode.)
        pm = jax.nn.relu(jnp.dot(mem_in, pre0_w) + pre0_b)
        pm = jax.nn.relu(jnp.dot(pm, pre1_w) + pre1_b)
        # attention RNN
        att_h = gru_cell_t(jnp.concatenate([pm, ctx], -1), att_h, arnn)
        # --- location-sensitive attention, sigmoid normalisation ---
        pq = jnp.dot(att_h, q_wt)[:, None, :]                 # (B, 1, 128)
        att_cat = jnp.stack([att_w, att_cum], axis=1)         # (B, 2, T_in)
        xp = jnp.pad(att_cat, ((0, 0), (0, 0), (15, 15)))
        patches = jnp.stack([xp[:, :, j:j + T_in] for j in range(31)],
                            axis=-1)                          # (B, 2, T_in, 31)
        patches = jnp.transpose(patches, (0, 2, 1, 3)).reshape(B, T_in, -1)
        loc = jnp.dot(jnp.dot(patches, loc_w_mat), loc_dense_wt)  # (B,T_in,128)
        # N=1 projection as a VPU lane reduction (no padded MXU matmul)
        e = jnp.sum(jnp.tanh(pq + loc + processed_inputs) * v_w, -1) + v_b
        e = jnp.where(mask, e, neg_inf)                       # masked_fill
        sig = jax.nn.sigmoid(e)
        align = sig / jnp.sum(sig, axis=1, keepdims=True)     # sigmoid norm
        att_cum = att_cum + align
        ctx = jnp.einsum('bt,btd->bd', align, inputs)         # bmm context
        # --- decoder RNN stack with residual connections ---
        dec_in = jnp.dot(jnp.concatenate([att_h, ctx], -1), proj_wt) + proj_b
        dec_h0 = gru_cell_t(dec_in, dec_h0, drnn[0])
        dec_in = dec_h0 + dec_in
        dec_h1 = gru_cell_t(dec_in, dec_h1, drnn[1])
        dec_in = dec_h1 + dec_in
        out = jnp.dot(dec_in, mel_wt) + mel_b                 # (B, r*mdim)
        # TODO(synk): StopNet dropout (p=0.1) omitted — eval-mode semantics.
        stop = jnp.sum(jnp.concatenate([dec_in, out], -1) * stop_w, -1) + stop_b
        carry = (mem_in, att_h, dec_h0, dec_h1, ctx, align, att_cum)
        return carry, (out[:, :r * mdim], align, stop)

    carry0 = (jnp.zeros((B, max(msize, r) * mdim), jnp.float32),   # memory queue
              jnp.zeros((B, 256), jnp.float32),                    # attention RNN h
              jnp.zeros((B, 256), jnp.float32),                    # decoder RNN 0 h
              jnp.zeros((B, 256), jnp.float32),                    # decoder RNN 1 h
              jnp.zeros((B, D_in), jnp.float32),                   # context
              jnp.zeros((B, T_in), jnp.float32),                   # attn weights
              jnp.zeros((B, T_in), jnp.float32))                   # attn cum
    _, (outs, aligns, stops) = jax.lax.scan(step, carry0, prev_frames)

    outputs = jnp.swapaxes(outs, 0, 1).reshape(B, T_dec * r, mdim)
    outputs = jnp.transpose(outputs, (0, 2, 1))    # (B, mel_dim, T_out)
    alignments = jnp.swapaxes(aligns, 0, 1)        # (B, T_dec, T_in)
    stop_tokens = jnp.swapaxes(stops, 0, 1)        # (B, T_dec)
    return outputs, alignments, stop_tokens


# ----------------------------------------------------------------------------
# Full Tacotron forward
# ----------------------------------------------------------------------------
def tacotron_forward(params, characters, text_lengths, mel_specs):
    B, T_in = characters.shape
    mask = jnp.arange(T_in)[None, :] < text_lengths[:, None]          # sequence_mask
    inputs = jnp.take(params['embedding'], characters, axis=0)        # B,T_in,256
    # Encoder: Prenet(256->[256,128]) + CBHG(128, K=16)
    enc = prenet_forward(inputs, params['encoder']['prenet'])
    enc = cbhg_forward(jnp.transpose(enc, (0, 2, 1)),
                       params['encoder']['cbhg'])                     # B,T_in,256
    dec_out, alignments, stop_tokens = decoder_forward(
        params['decoder'], enc, mel_specs, mask,
        r=params['r'], mdim=params['decoder_output_dim'],
        msize=params['memory_size'])                                  # B,80,T_out
    # PostCBHG on mel-first decoder output, then last linear
    post = cbhg_forward(dec_out, params['postnet'])                   # B,T_out,256
    post = linear(post, params['last_linear']['w'],
                  params['last_linear']['b'])                         # B,T_out,1025
    dec_out = jnp.transpose(dec_out, (0, 2, 1))                       # B,T_out,80
    return dec_out, post, alignments, stop_tokens


# ----------------------------------------------------------------------------
# Deterministic parameter initialization (shapes from the module __init__)
# ----------------------------------------------------------------------------
class KeyGen:
    def __init__(self, seed):
        self._key = jax.random.PRNGKey(seed)

    def __call__(self):
        self._key, sub = jax.random.split(self._key)
        return sub


def _normal(kg, shape, std):
    return jax.random.normal(kg(), shape, jnp.float32) * std


def init_linear_p(kg, in_f, out_f, bias=True):
    std = 1.0 / math.sqrt(in_f)
    return {'w': _normal(kg, (out_f, in_f), std),
            'b': _normal(kg, (out_f,), std) if bias else None}


def init_bn_conv(kg, in_c, out_c, k):
    std = 1.0 / math.sqrt(in_c * k)
    return {'w': _normal(kg, (out_c, in_c, k), std),
            'gamma': jnp.ones((out_c,), jnp.float32),
            'beta': jnp.zeros((out_c,), jnp.float32),
            'rm': jnp.zeros((out_c,), jnp.float32),
            'rv': jnp.ones((out_c,), jnp.float32)}


def init_gru(kg, in_f, hid):
    std = 1.0 / math.sqrt(hid)
    return {'w_ih': _normal(kg, (3 * hid, in_f), std),
            'w_hh': _normal(kg, (3 * hid, hid), std),
            'b_ih': _normal(kg, (3 * hid,), std),
            'b_hh': _normal(kg, (3 * hid,), std)}


def init_highway(kg, size):
    std = 1.0 / math.sqrt(size)
    return {'Hw': _normal(kg, (size, size), std),
            'Hb': jnp.zeros((size,), jnp.float32),           # H.bias.zero_()
            'Tw': _normal(kg, (size, size), std),
            'Tb': jnp.full((size,), -1.0, jnp.float32)}      # T.bias.fill_(-1)


def fuse_conv_bank(bank):
    """Zero-pad every bank conv to the largest kernel width and concatenate
    along out-channels, so the whole bank is one im2col matmul. Done once."""
    kmax = max(cp['w'].shape[2] for cp in bank)
    pad_l, pad_r = (kmax - 1) // 2, kmax // 2
    ws = []
    for cp in bank:
        out_c, in_c, k = cp['w'].shape
        start = pad_l - (k - 1) // 2           # center tap alignment
        wk = jnp.zeros((out_c, in_c, kmax), jnp.float32)
        wk = wk.at[:, :, start:start + k].set(cp['w'])
        ws.append(wk)
    w_full = jnp.concatenate(ws, axis=0)                      # (Ktot*feat, Cin, kmax)
    out_c_total, in_c, _ = w_full.shape
    w_mat = w_full.reshape(out_c_total, in_c * kmax).T        # (Cin*kmax, Ktot*feat)
    bn = {k: jnp.concatenate([cp[k] for cp in bank])
          for k in ('gamma', 'beta', 'rm', 'rv')}
    return {'w_mat': w_mat, 'bn': bn, 'pad_l': pad_l, 'pad_r': pad_r,
            'kmax': kmax}


def init_cbhg(kg, in_features, K, bank_feat, projections, highway_feat,
              gru_feat, num_highways):
    bank = [init_bn_conv(kg, in_features, bank_feat, k) for k in range(1, K + 1)]
    p = {'bank_fused': fuse_conv_bank(bank)}
    proj_in = [K * bank_feat] + projections[:-1]
    p['proj'] = [init_bn_conv(kg, i, o, 3)
                 for i, o in zip(proj_in, projections)]
    if highway_feat != projections[-1]:
        p['pre_highway'] = init_linear_p(kg, projections[-1], highway_feat,
                                         bias=False)
    p['highways'] = [init_highway(kg, highway_feat) for _ in range(num_highways)]
    p['gru_fwd'] = init_gru(kg, gru_feat, gru_feat)
    p['gru_bwd'] = init_gru(kg, gru_feat, gru_feat)
    return p


def init_tacotron(seed, num_chars, r=5, postnet_output_dim=1025,
                  decoder_output_dim=80, memory_size=5):
    # single-speaker config: decoder_dim = encoder_dim = 256, no speaker embed
    kg = KeyGen(seed)
    decoder_dim = 256
    p = {'r': r, 'memory_size': memory_size,
         'decoder_output_dim': decoder_output_dim,
         'embedding': _normal(kg, (num_chars, 256), 0.3)}    # normal_(0, 0.3)
    p['encoder'] = {
        'prenet': [init_linear_p(kg, 256, 256), init_linear_p(kg, 256, 128)],
        'cbhg': init_cbhg(kg, 128, 16, 128, [128, 128], 128, 128, 4)}
    prenet_in = decoder_output_dim * memory_size             # 400
    p['decoder'] = {
        'prenet': [init_linear_p(kg, prenet_in, 256), init_linear_p(kg, 256, 128)],
        'attention_rnn': init_gru(kg, decoder_dim + 128, 256),
        'attn': {
            'query': init_linear_p(kg, 256, 128, bias=False),
            'inputs': init_linear_p(kg, decoder_dim, 128, bias=False),
            'v': init_linear_p(kg, 128, 1),
            'loc_conv_w': _normal(kg, (32, 2, 31), 1.0 / math.sqrt(2 * 31)),
            'loc_dense': init_linear_p(kg, 32, 128, bias=False)},
        'project_to_decoder_in': init_linear_p(kg, 256 + decoder_dim, 256),
        'decoder_rnns': [init_gru(kg, 256, 256) for _ in range(2)],
        'proj_to_mel': init_linear_p(kg, 256, decoder_output_dim * r),
        'stopnet': init_linear_p(kg, 256 + decoder_output_dim * r, 1)}
    p['postnet'] = init_cbhg(kg, decoder_output_dim, 8, 128,
                             [256, decoder_output_dim], 128, 128, 4)
    p['last_linear'] = init_linear_p(kg, 128 * 2, postnet_output_dim)
    return p


# ----------------------------------------------------------------------------
if __name__ == "__main__":
    B, T_in, T_out = 2, 8, 10           # T_out must be a multiple of r
    num_chars, r, mel_dim, postnet_dim = 30, 5, 80, 1025

    params = init_tacotron(42, num_chars, r=r,
                           postnet_output_dim=postnet_dim,
                           decoder_output_dim=mel_dim, memory_size=5)

    key = jax.random.PRNGKey(0)
    k1, k2 = jax.random.split(key)
    characters = jax.random.randint(k1, (B, T_in), 0, num_chars, dtype=jnp.int32)
    text_lengths = jnp.array([T_in, 5], dtype=jnp.int32)
    mel_specs = jax.random.normal(k2, (B, T_out, mel_dim), jnp.float32)

    # jit with params as a closure so the Python-int config (r, memory_size,
    # decoder_output_dim) stays static.
    forward = jax.jit(lambda ch, tl, mel: tacotron_forward(params, ch, tl, mel))
    outs = jax.block_until_ready(forward(characters, text_lengths, mel_specs))
    dec_out, post_out, align, stop = outs

    assert dec_out.shape == (B, T_out, mel_dim)
    assert post_out.shape == (B, T_out, postnet_dim)
    assert align.shape == (B, T_out // r, T_in)
    assert stop.shape == (B, T_out // r)
    assert all(bool(jnp.all(jnp.isfinite(o))) for o in (dec_out, post_out, align, stop))
    print("KERNEL_OK")
</pallas_src>

<mosaic_0001>
module attributes {stable_mosaic.version = 11 : i64} {
  func.func @_mm_kernel(%arg0: i32, %arg1: i32, %arg2: memref<16x256xbf16, #tpu.memory_space<vmem>>, %arg3: memref<256x256xbf16, #tpu.memory_space<vmem>>, %arg4: memref<16x256xf32, #tpu.memory_space<vmem>>) attributes {dimension_semantics = [#tpu.dimension_semantics<parallel>, #tpu.dimension_semantics<parallel>], iteration_bounds = array<i64: 1, 1>, scalar_prefetch = 0 : i64, scratch_operands = 0 : i64, tpu.core_type = #tpu.core_type<tc>, window_params = [{transform_indices = @transform_0, window_bounds = array<i64: 16, 256>}, {transform_indices = @transform_1, window_bounds = array<i64: 256, 256>}, {transform_indices = @transform_2, window_bounds = array<i64: 16, 256>}]} {
    %c0 = arith.constant 0 : index
    %c0_0 = arith.constant 0 : index
    %0 = vector.load %arg2[%c0, %c0_0] : memref<16x256xbf16, #tpu.memory_space<vmem>>, vector<16x256xbf16>
    %c0_1 = arith.constant 0 : index
    %c0_2 = arith.constant 0 : index
    %1 = vector.load %arg3[%c0_1, %c0_2] : memref<256x256xbf16, #tpu.memory_space<vmem>>, vector<256x256xbf16>
    %cst = arith.constant dense<0.000000e+00> : vector<16x256xf32>
    %2 = tpu.matmul %0, %1, %cst {dimension_numbers = #tpu.dot_dimension_numbers<[1], [0], [0], [1], [0, 0, 1, 1], [], []>} : vector<16x256xbf16>, vector<256x256xbf16>, vector<16x256xf32> -> vector<16x256xf32>
    %c0_3 = arith.constant 0 : index
    %c0_4 = arith.constant 0 : index
    %3 = vector.load %arg4[%c0_3, %c0_4] : memref<16x256xf32, #tpu.memory_space<vmem>>, vector<16x256xf32>
    tpu.vector_store %arg4[%c0_3, %c0_4], %2 {strides = array<i32>} : memref<16x256xf32, #tpu.memory_space<vmem>>, vector<16x256xf32>,
    return
  }
  func.func @transform_0(%arg0: i32, %arg1: i32) -> (i32, i32) {
    %c0_i32 = arith.constant 0 : i32
    %c0_i32_0 = arith.constant 0 : i32
    return %arg0, %c0_i32 : i32, i32
  }
  func.func @transform_1(%arg0: i32, %arg1: i32) -> (i32, i32) {
    %c0_i32 = arith.constant 0 : i32
    %c0_i32_0 = arith.constant 0 : i32
    return %c0_i32, %arg1 : i32, i32
  }
  func.func @transform_2(%arg0: i32, %arg1: i32) -> (i32, i32) {
    %c0_i32 = arith.constant 0 : i32
    return %arg0, %arg1 : i32, i32
  }
}

module attributes {stable_mosaic.version = 11 : i64} {
  func.func @_mm_kernel(%arg0: i32, %arg1: i32, %arg2: memref<16x256xbf16, #tpu.memory_space<vmem>>, %arg3: memref<256x128xbf16, #tpu.memory_space<vmem>>, %arg4: memref<16x128xf32, #tpu.memory_space<vmem>>) attributes {dimension_semantics = [#tpu.dimension_semantics<parallel>, #tpu.dimension_semantics<parallel>], iteration_bounds = array<i64: 1, 1>, scalar_prefetch = 0 : i64, scratch_operands = 0 : i64, tpu.core_type = #tpu.core_type<tc>, window_params = [{transform_indices = @transform_0, window_bounds = array<i64: 16, 256>}, {transform_indices = @transform_1, window_bounds = array<i64: 256, 128>}, {transform_indices = @transform_2, window_bounds = array<i64: 16, 128>}]} {
    %c0 = arith.constant 0 : index
    %c0_0 = arith.constant 0 : index
    %0 = vector.load %arg2[%c0, %c0_0] : memref<16x256xbf16, #tpu.memory_space<vmem>>, vector<16x256xbf16>
    %c0_1 = arith.constant 0 : index
    %c0_2 = arith.constant 0 : index
    %1 = vector.load %arg3[%c0_1, %c0_2] : memref<256x128xbf16, #tpu.memory_space<vmem>>, vector<256x128xbf16>
    %cst = arith.constant dense<0.000000e+00> : vector<16x128xf32>
    %2 = tpu.matmul %0, %1, %cst {dimension_numbers = #tpu.dot_dimension_numbers<[1], [0], [0], [1], [0, 0, 1, 1], [], []>} : vector<16x256xbf16>, vector<256x128xbf16>, vector<16x128xf32> -> vector<16x128xf32>
    %c0_3 = arith.constant 0 : index
    %c0_4 = arith.constant 0 : index
    %3 = vector.load %arg4[%c0_3, %c0_4] : memref<16x128xf32, #tpu.memory_space<vmem>>, vector<16x128xf32>
    tpu.vector_store %arg4[%c0_3, %c0_4], %2 {strides = array<i32>} : memref<16x128xf32, #tpu.memory_space<vmem>>, vector<16x128xf32>,
    return
  }
  func.func @transform_0(%arg0: i32, %arg1: i32) -> (i32, i32) {
    %c0_i32 = arith.constant 0 : i32
    %c0_i32_0 = arith.constant 0 : i32
    return %arg0, %c0_i32 : i32, i32
  }
  func.func @transform_1(%arg0: i32, %arg1: i32) -> (i32, i32) {
    %c0_i32 = arith.constant 0 : i32
    %c0_i32_0 = arith.constant 0 : i32
    return %c0_i32, %arg1 : i32, i32
  }
  func.func @transform_2(%arg0: i32, %arg1: i32) -> (i32, i32) {
    %c0_i32 = arith.constant 0 : i32
    return %arg0, %arg1 : i32, i32
  }
}

module attributes {stable_mosaic.version = 11 : i64} {
  func.func @_mm_acc_kernel(%arg0: i32, %arg1: i32, %arg2: i32, %arg3: memref<16x512xbf16, #tpu.memory_space<vmem>>, %arg4: memref<512x256xbf16, #tpu.memory_space<vmem>>, %arg5: memref<16x256xf32, #tpu.memory_space<vmem>>, %arg6: memref<16x256xf32, #tpu.memory_space<vmem>>) attributes {dimension_semantics = [#tpu.dimension_semantics<parallel>, #tpu.dimension_semantics<parallel>, #tpu.dimension_semantics<arbitrary>], iteration_bounds = array<i64: 1, 8, 4>, scalar_prefetch = 0 : i64, scratch_operands = 1 : i64, tpu.core_type = #tpu.core_type<tc>, window_params = [{transform_indices = @transform_0, window_bounds = array<i64: 16, 512>}, {transform_indices = @transform_1, window_bounds = array<i64: 512, 256>}, {transform_indices = @transform_2, window_bounds = array<i64: 16, 256>}]} {
    %c0_i32 = arith.constant 0 : i32
    %0 = arith.cmpi eq, %arg2, %c0_i32 : i32
    %1 = arith.extui %0 : i1 to i32
    %c0_i32_0 = arith.constant 0 : i32
    %2 = arith.cmpi ne, %1, %c0_i32_0 : i32
    scf.if %2 {
      %cst_9 = arith.constant 0.000000e+00 : f32
      %12 = vector.broadcast %cst_9 : f32 to vector<16x256xf32>
      %c0_10 = arith.constant 0 : index
      %c0_11 = arith.constant 0 : index
      %13 = vector.load %arg6[%c0_10, %c0_11] : memref<16x256xf32, #tpu.memory_space<vmem>>, vector<16x256xf32>
      tpu.vector_store %arg6[%c0_10, %c0_11], %12 {strides = array<i32>} : memref<16x256xf32, #tpu.memory_space<vmem>>, vector<16x256xf32>,
    } else {
    }
    %c0 = arith.constant 0 : index
    %c0_1 = arith.constant 0 : index
    %3 = vector.load %arg6[%c0, %c0_1] : memref<16x256xf32, #tpu.memory_space<vmem>>, vector<16x256xf32>
    %c0_2 = arith.constant 0 : index
    %c0_3 = arith.constant 0 : index
    %4 = vector.load %arg3[%c0_2, %c0_3] : memref<16x512xbf16, #tpu.memory_space<vmem>>, vector<16x512xbf16>
    %c0_4 = arith.constant 0 : index
    %c0_5 = arith.constant 0 : index
    %5 = vector.load %arg4[%c0_4, %c0_5] : memref<512x256xbf16, #tpu.memory_space<vmem>>, vector<512x256xbf16>
    %cst = arith.constant dense<0.000000e+00> : vector<16x256xf32>
    %6 = tpu.matmul %4, %5, %cst {dimension_numbers = #tpu.dot_dimension_numbers<[1], [0], [0], [1], [0, 0, 1, 1], [], []>} : vector<16x512xbf16>, vector<512x256xbf16>, vector<16x256xf32> -> vector<16x256xf32>
    %7 = arith.addf %3, %6 : vector<16x256xf32>
    %c0_6 = arith.constant 0 : index
    %c0_7 = arith.constant 0 : index
    %8 = vector.load %arg6[%c0_6, %c0_7] : memref<16x256xf32, #tpu.memory_space<vmem>>, vector<16x256xf32>
    tpu.vector_store %arg6[%c0_6, %c0_7], %7 {strides = array<i32>} : memref<16x256xf32, #tpu.memory_space<vmem>>, vector<16x256xf32>,
    %c3_i32 = arith.constant 3 : i32
    %9 = arith.cmpi eq, %arg2, %c3_i32 : i32
    %10 = arith.extui %9 : i1 to i32
    %c0_i32_8 = arith.constant 0 : i32
    %11 = arith.cmpi ne, %10, %c0_i32_8 : i32
    scf.if %11 {
      %c0_9 = arith.constant 0 : index
      %c0_10 = arith.constant 0 : index
      %12 = vector.load %arg6[%c0_9, %c0_10] : memref<16x256xf32, #tpu.memory_space<vmem>>, vector<16x256xf32>
      %c0_11 = arith.constant 0 : index
      %c0_12 = arith.constant 0 : index
      %13 = vector.load %arg5[%c0_11, %c0_12] : memref<16x256xf32, #tpu.memory_space<vmem>>, vector<16x256xf32>
      tpu.vector_store %arg5[%c0_11, %c0_12], %12 {strides = array<i32>} : memref<16x256xf32, #tpu.memory_space<vmem>>, vector<16x256xf32>,
    } else {
    }
    return
  }
  func.func @transform_0(%arg0: i32, %arg1: i32, %arg2: i32) -> (i32, i32) {
    %c0_i32 = arith.constant 0 : i32
    return %arg0, %arg2 : i32, i32
  }
  func.func @transform_1(%arg0: i32, %arg1: i32, %arg2: i32) -> (i32, i32) {
    %c0_i32 = arith.constant 0 : i32
    return %arg2, %arg1 : i32, i32
  }
  func.func @transform_2(%arg0: i32, %arg1: i32, %arg2: i32) -> (i32, i32) {
    %c0_i32 = arith.constant 0 : i32
    return %arg0, %arg1 : i32, i32
  }
}

module attributes {stable_mosaic.version = 11 : i64} {
  func.func @_mm_acc_kernel(%arg0: i32, %arg1: i32, %arg2: i32, %arg3: memref<16x512xbf16, #tpu.memory_space<vmem>>, %arg4: memref<512x128xbf16, #tpu.memory_space<vmem>>, %arg5: memref<16x128xf32, #tpu.memory_space<vmem>>, %arg6: memref<16x128xf32, #tpu.memory_space<vmem>>) attributes {dimension_semantics = [#tpu.dimension_semantics<parallel>, #tpu.dimension_semantics<parallel>, #tpu.dimension_semantics<arbitrary>], iteration_bounds = array<i64: 1, 1, 12>, scalar_prefetch = 0 : i64, scratch_operands = 1 : i64, tpu.core_type = #tpu.core_type<tc>, window_params = [{transform_indices = @transform_0, window_bounds = array<i64: 16, 512>}, {transform_indices = @transform_1, window_bounds = array<i64: 512, 128>}, {transform_indices = @transform_2, window_bounds = array<i64: 16, 128>}]} {
    %c0_i32 = arith.constant 0 : i32
    %0 = arith.cmpi eq, %arg2, %c0_i32 : i32
    %1 = arith.extui %0 : i1 to i32
    %c0_i32_0 = arith.constant 0 : i32
    %2 = arith.cmpi ne, %1, %c0_i32_0 : i32
    scf.if %2 {
      %cst_9 = arith.constant 0.000000e+00 : f32
      %12 = vector.broadcast %cst_9 : f32 to vector<16x128xf32>
      %c0_10 = arith.constant 0 : index
      %c0_11 = arith.constant 0 : index
      %13 = vector.load %arg6[%c0_10, %c0_11] : memref<16x128xf32, #tpu.memory_space<vmem>>, vector<16x128xf32>
      tpu.vector_store %arg6[%c0_10, %c0_11], %12 {strides = array<i32>} : memref<16x128xf32, #tpu.memory_space<vmem>>, vector<16x128xf32>,
    } else {
    }
    %c0 = arith.constant 0 : index
    %c0_1 = arith.constant 0 : index
    %3 = vector.load %arg6[%c0, %c0_1] : memref<16x128xf32, #tpu.memory_space<vmem>>, vector<16x128xf32>
    %c0_2 = arith.constant 0 : index
    %c0_3 = arith.constant 0 : index
    %4 = vector.load %arg3[%c0_2, %c0_3] : memref<16x512xbf16, #tpu.memory_space<vmem>>, vector<16x512xbf16>
    %c0_4 = arith.constant 0 : index
    %c0_5 = arith.constant 0 : index
    %5 = vector.load %arg4[%c0_4, %c0_5] : memref<512x128xbf16, #tpu.memory_space<vmem>>, vector<512x128xbf16>
    %cst = arith.constant dense<0.000000e+00> : vector<16x128xf32>
    %6 = tpu.matmul %4, %5, %cst {dimension_numbers = #tpu.dot_dimension_numbers<[1], [0], [0], [1], [0, 0, 1, 1], [], []>} : vector<16x512xbf16>, vector<512x128xbf16>, vector<16x128xf32> -> vector<16x128xf32>
    %7 = arith.addf %3, %6 : vector<16x128xf32>
    %c0_6 = arith.constant 0 : index
    %c0_7 = arith.constant 0 : index
    %8 = vector.load %arg6[%c0_6, %c0_7] : memref<16x128xf32, #tpu.memory_space<vmem>>, vector<16x128xf32>
    tpu.vector_store %arg6[%c0_6, %c0_7], %7 {strides = array<i32>} : memref<16x128xf32, #tpu.memory_space<vmem>>, vector<16x128xf32>,
    %c11_i32 = arith.constant 11 : i32
    %9 = arith.cmpi eq, %arg2, %c11_i32 : i32
    %10 = arith.extui %9 : i1 to i32
    %c0_i32_8 = arith.constant 0 : i32
    %11 = arith.cmpi ne, %10, %c0_i32_8 : i32
    scf.if %11 {
      %c0_9 = arith.constant 0 : index
      %c0_10 = arith.constant 0 : index
      %12 = vector.load %arg6[%c0_9, %c0_10] : memref<16x128xf32, #tpu.memory_space<vmem>>, vector<16x128xf32>
      %c0_11 = arith.constant 0 : index
      %c0_12 = arith.constant 0 : index
      %13 = vector.load %arg5[%c0_11, %c0_12] : memref<16x128xf32, #tpu.memory_space<vmem>>, vector<16x128xf32>
      tpu.vector_store %arg5[%c0_11, %c0_12], %12 {strides = array<i32>} : memref<16x128xf32, #tpu.memory_space<vmem>>, vector<16x128xf32>,
    } else {
    }
    return
  }
  func.func @transform_0(%arg0: i32, %arg1: i32, %arg2: i32) -> (i32, i32) {
    %c0_i32 = arith.constant 0 : i32
    return %arg0, %arg2 : i32, i32
  }
  func.func @transform_1(%arg0: i32, %arg1: i32, %arg2: i32) -> (i32, i32) {
    %c0_i32 = arith.constant 0 : i32
    return %arg2, %arg1 : i32, i32
  }
  func.func @transform_2(%arg0: i32, %arg1: i32, %arg2: i32) -> (i32, i32) {
    %c0_i32 = arith.constant 0 : i32
    return %arg0, %arg1 : i32, i32
  }
}

module attributes {stable_mosaic.version = 11 : i64} {
  func.func @_mm_kernel(%arg0: i32, %arg1: i32, %arg2: memref<16x384xbf16, #tpu.memory_space<vmem>>, %arg3: memref<384x128xbf16, #tpu.memory_space<vmem>>, %arg4: memref<16x128xf32, #tpu.memory_space<vmem>>) attributes {dimension_semantics = [#tpu.dimension_semantics<parallel>, #tpu.dimension_semantics<parallel>], iteration_bounds = array<i64: 1, 1>, scalar_prefetch = 0 : i64, scratch_operands = 0 : i64, tpu.core_type = #tpu.core_type<tc>, window_params = [{transform_indices = @transform_0, window_bounds = array<i64: 16, 384>}, {transform_indices = @transform_1, window_bounds = array<i64: 384, 128>}, {transform_indices = @transform_2, window_bounds = array<i64: 16, 128>}]} {
    %c0 = arith.constant 0 : index
    %c0_0 = arith.constant 0 : index
    %0 = vector.load %arg2[%c0, %c0_0] : memref<16x384xbf16, #tpu.memory_space<vmem>>, vector<16x384xbf16>
    %c0_1 = arith.constant 0 : index
    %c0_2 = arith.constant 0 : index
    %1 = vector.load %arg3[%c0_1, %c0_2] : memref<384x128xbf16, #tpu.memory_space<vmem>>, vector<384x128xbf16>
    %cst = arith.constant dense<0.000000e+00> : vector<16x128xf32>
    %2 = tpu.matmul %0, %1, %cst {dimension_numbers = #tpu.dot_dimension_numbers<[1], [0], [0], [1], [0, 0, 1, 1], [], []>} : vector<16x384xbf16>, vector<384x128xbf16>, vector<16x128xf32> -> vector<16x128xf32>
    %c0_3 = arith.constant 0 : index
    %c0_4 = arith.constant 0 : index
    %3 = vector.load %arg4[%c0_3, %c0_4] : memref<16x128xf32, #tpu.memory_space<vmem>>, vector<16x128xf32>
    tpu.vector_store %arg4[%c0_3, %c0_4], %2 {strides = array<i32>} : memref<16x128xf32, #tpu.memory_space<vmem>>, vector<16x128xf32>,
    return
  }
  func.func @transform_0(%arg0: i32, %arg1: i32) -> (i32, i32) {
    %c0_i32 = arith.constant 0 : i32
    %c0_i32_0 = arith.constant 0 : i32
    return %arg0, %c0_i32 : i32, i32
  }
  func.func @transform_1(%arg0: i32, %arg1: i32) -> (i32, i32) {
    %c0_i32 = arith.constant 0 : i32
    %c0_i32_0 = arith.constant 0 : i32
    return %c0_i32, %arg1 : i32, i32
  }
  func.func @transform_2(%arg0: i32, %arg1: i32) -> (i32, i32) {
    %c0_i32 = arith.constant 0 : i32
    return %arg0, %arg1 : i32, i32
  }
}

module attributes {stable_mosaic.version = 11 : i64} {
  func.func @_mm_kernel(%arg0: i32, %arg1: i32, %arg2: memref<16x128xbf16, #tpu.memory_space<vmem>>, %arg3: memref<128x128xbf16, #tpu.memory_space<vmem>>, %arg4: memref<16x128xf32, #tpu.memory_space<vmem>>) attributes {dimension_semantics = [#tpu.dimension_semantics<parallel>, #tpu.dimension_semantics<parallel>], iteration_bounds = array<i64: 1, 1>, scalar_prefetch = 0 : i64, scratch_operands = 0 : i64, tpu.core_type = #tpu.core_type<tc>, window_params = [{transform_indices = @transform_0, window_bounds = array<i64: 16, 128>}, {transform_indices = @transform_1, window_bounds = array<i64: 128, 128>}, {transform_indices = @transform_2, window_bounds = array<i64: 16, 128>}]} {
    %c0 = arith.constant 0 : index
    %c0_0 = arith.constant 0 : index
    %0 = vector.load %arg2[%c0, %c0_0] : memref<16x128xbf16, #tpu.memory_space<vmem>>, vector<16x128xbf16>
    %c0_1 = arith.constant 0 : index
    %c0_2 = arith.constant 0 : index
    %1 = vector.load %arg3[%c0_1, %c0_2] : memref<128x128xbf16, #tpu.memory_space<vmem>>, vector<128x128xbf16>
    %cst = arith.constant dense<0.000000e+00> : vector<16x128xf32>
    %2 = tpu.matmul %0, %1, %cst {dimension_numbers = #tpu.dot_dimension_numbers<[1], [0], [0], [1], [0, 0, 1, 1], [], []>} : vector<16x128xbf16>, vector<128x128xbf16>, vector<16x128xf32> -> vector<16x128xf32>
    %c0_3 = arith.constant 0 : index
    %c0_4 = arith.constant 0 : index
    %3 = vector.load %arg4[%c0_3, %c0_4] : memref<16x128xf32, #tpu.memory_space<vmem>>, vector<16x128xf32>
    tpu.vector_store %arg4[%c0_3, %c0_4], %2 {strides = array<i32>} : memref<16x128xf32, #tpu.memory_space<vmem>>, vector<16x128xf32>,
    return
  }
  func.func @transform_0(%arg0: i32, %arg1: i32) -> (i32, i32) {
    %c0_i32 = arith.constant 0 : i32
    %c0_i32_0 = arith.constant 0 : i32
    return %arg0, %c0_i32 : i32, i32
  }
  func.func @transform_1(%arg0: i32, %arg1: i32) -> (i32, i32) {
    %c0_i32 = arith.constant 0 : i32
    %c0_i32_0 = arith.constant 0 : i32
    return %c0_i32, %arg1 : i32, i32
  }
  func.func @transform_2(%arg0: i32, %arg1: i32) -> (i32, i32) {
    %c0_i32 = arith.constant 0 : i32
    return %arg0, %arg1 : i32, i32
  }
}

module attributes {stable_mosaic.version = 11 : i64} {
  func.func @_mm_kernel(%arg0: i32, %arg1: i32, %arg2: memref<16x128xbf16, #tpu.memory_space<vmem>>, %arg3: memref<128x128xbf16, #tpu.memory_space<vmem>>, %arg4: memref<16x128xf32, #tpu.memory_space<vmem>>) attributes {dimension_semantics = [#tpu.dimension_semantics<parallel>, #tpu.dimension_semantics<parallel>], iteration_bounds = array<i64: 1, 3>, scalar_prefetch = 0 : i64, scratch_operands = 0 : i64, tpu.core_type = #tpu.core_type<tc>, window_params = [{transform_indices = @transform_0, window_bounds = array<i64: 16, 128>}, {transform_indices = @transform_1, window_bounds = array<i64: 128, 128>}, {transform_indices = @transform_2, window_bounds = array<i64: 16, 128>}]} {
    %c0 = arith.constant 0 : index
    %c0_0 = arith.constant 0 : index
    %0 = vector.load %arg2[%c0, %c0_0] : memref<16x128xbf16, #tpu.memory_space<vmem>>, vector<16x128xbf16>
    %c0_1 = arith.constant 0 : index
    %c0_2 = arith.constant 0 : index
    %1 = vector.load %arg3[%c0_1, %c0_2] : memref<128x128xbf16, #tpu.memory_space<vmem>>, vector<128x128xbf16>
    %cst = arith.constant dense<0.000000e+00> : vector<16x128xf32>
    %2 = tpu.matmul %0, %1, %cst {dimension_numbers = #tpu.dot_dimension_numbers<[1], [0], [0], [1], [0, 0, 1, 1], [], []>} : vector<16x128xbf16>, vector<128x128xbf16>, vector<16x128xf32> -> vector<16x128xf32>
    %c0_3 = arith.constant 0 : index
    %c0_4 = arith.constant 0 : index
    %3 = vector.load %arg4[%c0_3, %c0_4] : memref<16x128xf32, #tpu.memory_space<vmem>>, vector<16x128xf32>
    tpu.vector_store %arg4[%c0_3, %c0_4], %2 {strides = array<i32>} : memref<16x128xf32, #tpu.memory_space<vmem>>, vector<16x128xf32>,
    return
  }
  func.func @transform_0(%arg0: i32, %arg1: i32) -> (i32, i32) {
    %c0_i32 = arith.constant 0 : i32
    %c0_i32_0 = arith.constant 0 : i32
    return %arg0, %c0_i32 : i32, i32
  }
  func.func @transform_1(%arg0: i32, %arg1: i32) -> (i32, i32) {
    %c0_i32 = arith.constant 0 : i32
    %c0_i32_0 = arith.constant 0 : i32
    return %c0_i32, %arg1 : i32, i32
  }
  func.func @transform_2(%arg0: i32, %arg1: i32) -> (i32, i32) {
    %c0_i32 = arith.constant 0 : i32
    return %arg0, %arg1 : i32, i32
  }
}

module attributes {stable_mosaic.version = 11 : i64} {
  func.func @_mm_kernel(%arg0: i32, %arg1: i32, %arg2: memref<32x640xbf16, #tpu.memory_space<vmem>>, %arg3: memref<640x256xbf16, #tpu.memory_space<vmem>>, %arg4: memref<32x256xf32, #tpu.memory_space<vmem>>) attributes {dimension_semantics = [#tpu.dimension_semantics<parallel>, #tpu.dimension_semantics<parallel>], iteration_bounds = array<i64: 1, 4>, scalar_prefetch = 0 : i64, scratch_operands = 0 : i64, tpu.core_type = #tpu.core_type<tc>, window_params = [{transform_indices = @transform_0, window_bounds = array<i64: 32, 640>}, {transform_indices = @transform_1, window_bounds = array<i64: 640, 256>}, {transform_indices = @transform_2, window_bounds = array<i64: 32, 256>}]} {
    %c0 = arith.constant 0 : index
    %c0_0 = arith.constant 0 : index
    %0 = vector.load %arg2[%c0, %c0_0] : memref<32x640xbf16, #tpu.memory_space<vmem>>, vector<32x640xbf16>
    %c0_1 = arith.constant 0 : index
    %c0_2 = arith.constant 0 : index
    %1 = vector.load %arg3[%c0_1, %c0_2] : memref<640x256xbf16, #tpu.memory_space<vmem>>, vector<640x256xbf16>
    %cst = arith.constant dense<0.000000e+00> : vector<32x256xf32>
    %2 = tpu.matmul %0, %1, %cst {dimension_numbers = #tpu.dot_dimension_numbers<[1], [0], [0], [1], [0, 0, 1, 1], [], []>} : vector<32x640xbf16>, vector<640x256xbf16>, vector<32x256xf32> -> vector<32x256xf32>
    %c0_3 = arith.constant 0 : index
    %c0_4 = arith.constant 0 : index
    %3 = vector.load %arg4[%c0_3, %c0_4] : memref<32x256xf32, #tpu.memory_space<vmem>>, vector<32x256xf32>
    tpu.vector_store %arg4[%c0_3, %c0_4], %2 {strides = array<i32>} : memref<32x256xf32, #tpu.memory_space<vmem>>, vector<32x256xf32>,
    return
  }
  func.func @transform_0(%arg0: i32, %arg1: i32) -> (i32, i32) {
    %c0_i32 = arith.constant 0 : i32
    %c0_i32_0 = arith.constant 0 : i32
    return %arg0, %c0_i32 : i32, i32
  }
  func.func @transform_1(%arg0: i32, %arg1: i32) -> (i32, i32) {
    %c0_i32 = arith.constant 0 : i32
    %c0_i32_0 = arith.constant 0 : i32
    return %c0_i32, %arg1 : i32, i32
  }
  func.func @transform_2(%arg0: i32, %arg1: i32) -> (i32, i32) {
    %c0_i32 = arith.constant 0 : i32
    return %arg0, %arg1 : i32, i32
  }
}

module attributes {stable_mosaic.version = 11 : i64} {
  func.func @_mm_acc_kernel(%arg0: i32, %arg1: i32, %arg2: i32, %arg3: memref<32x512xbf16, #tpu.memory_space<vmem>>, %arg4: memref<512x256xbf16, #tpu.memory_space<vmem>>, %arg5: memref<32x256xf32, #tpu.memory_space<vmem>>, %arg6: memref<32x256xf32, #tpu.memory_space<vmem>>) attributes {dimension_semantics = [#tpu.dimension_semantics<parallel>, #tpu.dimension_semantics<parallel>, #tpu.dimension_semantics<arbitrary>], iteration_bounds = array<i64: 1, 1, 6>, scalar_prefetch = 0 : i64, scratch_operands = 1 : i64, tpu.core_type = #tpu.core_type<tc>, window_params = [{transform_indices = @transform_0, window_bounds = array<i64: 32, 512>}, {transform_indices = @transform_1, window_bounds = array<i64: 512, 256>}, {transform_indices = @transform_2, window_bounds = array<i64: 32, 256>}]} {
    %c0_i32 = arith.constant 0 : i32
    %0 = arith.cmpi eq, %arg2, %c0_i32 : i32
    %1 = arith.extui %0 : i1 to i32
    %c0_i32_0 = arith.constant 0 : i32
    %2 = arith.cmpi ne, %1, %c0_i32_0 : i32
    scf.if %2 {
      %cst_9 = arith.constant 0.000000e+00 : f32
      %12 = vector.broadcast %cst_9 : f32 to vector<32x256xf32>
      %c0_10 = arith.constant 0 : index
      %c0_11 = arith.constant 0 : index
      %13 = vector.load %arg6[%c0_10, %c0_11] : memref<32x256xf32, #tpu.memory_space<vmem>>, vector<32x256xf32>
      tpu.vector_store %arg6[%c0_10, %c0_11], %12 {strides = array<i32>} : memref<32x256xf32, #tpu.memory_space<vmem>>, vector<32x256xf32>,
    } else {
    }
    %c0 = arith.constant 0 : index
    %c0_1 = arith.constant 0 : index
    %3 = vector.load %arg6[%c0, %c0_1] : memref<32x256xf32, #tpu.memory_space<vmem>>, vector<32x256xf32>
    %c0_2 = arith.constant 0 : index
    %c0_3 = arith.constant 0 : index
    %4 = vector.load %arg3[%c0_2, %c0_3] : memref<32x512xbf16, #tpu.memory_space<vmem>>, vector<32x512xbf16>
    %c0_4 = arith.constant 0 : index
    %c0_5 = arith.constant 0 : index
    %5 = vector.load %arg4[%c0_4, %c0_5] : memref<512x256xbf16, #tpu.memory_space<vmem>>, vector<512x256xbf16>
    %cst = arith.constant dense<0.000000e+00> : vector<32x256xf32>
    %6 = tpu.matmul %4, %5, %cst {dimension_numbers = #tpu.dot_dimension_numbers<[1], [0], [0], [1], [0, 0, 1, 1], [], []>} : vector<32x512xbf16>, vector<512x256xbf16>, vector<32x256xf32> -> vector<32x256xf32>
    %7 = arith.addf %3, %6 : vector<32x256xf32>
    %c0_6 = arith.constant 0 : index
    %c0_7 = arith.constant 0 : index
    %8 = vector.load %arg6[%c0_6, %c0_7] : memref<32x256xf32, #tpu.memory_space<vmem>>, vector<32x256xf32>
    tpu.vector_store %arg6[%c0_6, %c0_7], %7 {strides = array<i32>} : memref<32x256xf32, #tpu.memory_space<vmem>>, vector<32x256xf32>,
    %c5_i32 = arith.constant 5 : i32
    %9 = arith.cmpi eq, %arg2, %c5_i32 : i32
    %10 = arith.extui %9 : i1 to i32
    %c0_i32_8 = arith.constant 0 : i32
    %11 = arith.cmpi ne, %10, %c0_i32_8 : i32
    scf.if %11 {
      %c0_9 = arith.constant 0 : index
      %c0_10 = arith.constant 0 : index
      %12 = vector.load %arg6[%c0_9, %c0_10] : memref<32x256xf32, #tpu.memory_space<vmem>>, vector<32x256xf32>
      %c0_11 = arith.constant 0 : index
      %c0_12 = arith.constant 0 : index
      %13 = vector.load %arg5[%c0_11, %c0_12] : memref<32x256xf32, #tpu.memory_space<vmem>>, vector<32x256xf32>
      tpu.vector_store %arg5[%c0_11, %c0_12], %12 {strides = array<i32>} : memref<32x256xf32, #tpu.memory_space<vmem>>, vector<32x256xf32>,
    } else {
    }
    return
  }
  func.func @transform_0(%arg0: i32, %arg1: i32, %arg2: i32) -> (i32, i32) {
    %c0_i32 = arith.constant 0 : i32
    return %arg0, %arg2 : i32, i32
  }
  func.func @transform_1(%arg0: i32, %arg1: i32, %arg2: i32) -> (i32, i32) {
    %c0_i32 = arith.constant 0 : i32
    return %arg2, %arg1 : i32, i32
  }
  func.func @transform_2(%arg0: i32, %arg1: i32, %arg2: i32) -> (i32, i32) {
    %c0_i32 = arith.constant 0 : i32
    return %arg0, %arg1 : i32, i32
  }
}

module attributes {stable_mosaic.version = 11 : i64} {
  func.func @_mm_kernel(%arg0: i32, %arg1: i32, %arg2: memref<32x768xbf16, #tpu.memory_space<vmem>>, %arg3: memref<768x128xbf16, #tpu.memory_space<vmem>>, %arg4: memref<32x128xf32, #tpu.memory_space<vmem>>) attributes {dimension_semantics = [#tpu.dimension_semantics<parallel>, #tpu.dimension_semantics<parallel>], iteration_bounds = array<i64: 1, 1>, scalar_prefetch = 0 : i64, scratch_operands = 0 : i64, tpu.core_type = #tpu.core_type<tc>, window_params = [{transform_indices = @transform_0, window_bounds = array<i64: 32, 768>}, {transform_indices = @transform_1, window_bounds = array<i64: 768, 128>}, {transform_indices = @transform_2, window_bounds = array<i64: 32, 128>}]} {
    %c0 = arith.constant 0 : index
    %c0_0 = arith.constant 0 : index
    %0 = vector.load %arg2[%c0, %c0_0] : memref<32x768xbf16, #tpu.memory_space<vmem>>, vector<32x768xbf16>
    %c0_1 = arith.constant 0 : index
    %c0_2 = arith.constant 0 : index
    %1 = vector.load %arg3[%c0_1, %c0_2] : memref<768x128xbf16, #tpu.memory_space<vmem>>, vector<768x128xbf16>
    %cst = arith.constant dense<0.000000e+00> : vector<32x128xf32>
    %2 = tpu.matmul %0, %1, %cst {dimension_numbers = #tpu.dot_dimension_numbers<[1], [0], [0], [1], [0, 0, 1, 1], [], []>} : vector<32x768xbf16>, vector<768x128xbf16>, vector<32x128xf32> -> vector<32x128xf32>
    %c0_3 = arith.constant 0 : index
    %c0_4 = arith.constant 0 : index
    %3 = vector.load %arg4[%c0_3, %c0_4] : memref<32x128xf32, #tpu.memory_space<vmem>>, vector<32x128xf32>
    tpu.vector_store %arg4[%c0_3, %c0_4], %2 {strides = array<i32>} : memref<32x128xf32, #tpu.memory_space<vmem>>, vector<32x128xf32>,
    return
  }
  func.func @transform_0(%arg0: i32, %arg1: i32) -> (i32, i32) {
    %c0_i32 = arith.constant 0 : i32
    %c0_i32_0 = arith.constant 0 : i32
    return %arg0, %c0_i32 : i32, i32
  }
  func.func @transform_1(%arg0: i32, %arg1: i32) -> (i32, i32) {
    %c0_i32 = arith.constant 0 : i32
    %c0_i32_0 = arith.constant 0 : i32
    return %c0_i32, %arg1 : i32, i32
  }
  func.func @transform_2(%arg0: i32, %arg1: i32) -> (i32, i32) {
    %c0_i32 = arith.constant 0 : i32
    return %arg0, %arg1 : i32, i32
  }
}

module attributes {stable_mosaic.version = 11 : i64} {
  func.func @_mm_kernel(%arg0: i32, %arg1: i32, %arg2: memref<32x128xbf16, #tpu.memory_space<vmem>>, %arg3: memref<128x128xbf16, #tpu.memory_space<vmem>>, %arg4: memref<32x128xf32, #tpu.memory_space<vmem>>) attributes {dimension_semantics = [#tpu.dimension_semantics<parallel>, #tpu.dimension_semantics<parallel>], iteration_bounds = array<i64: 1, 1>, scalar_prefetch = 0 : i64, scratch_operands = 0 : i64, tpu.core_type = #tpu.core_type<tc>, window_params = [{transform_indices = @transform_0, window_bounds = array<i64: 32, 128>}, {transform_indices = @transform_1, window_bounds = array<i64: 128, 128>}, {transform_indices = @transform_2, window_bounds = array<i64: 32, 128>}]} {
    %c0 = arith.constant 0 : index
    %c0_0 = arith.constant 0 : index
    %0 = vector.load %arg2[%c0, %c0_0] : memref<32x128xbf16, #tpu.memory_space<vmem>>, vector<32x128xbf16>
    %c0_1 = arith.constant 0 : index
    %c0_2 = arith.constant 0 : index
    %1 = vector.load %arg3[%c0_1, %c0_2] : memref<128x128xbf16, #tpu.memory_space<vmem>>, vector<128x128xbf16>
    %cst = arith.constant dense<0.000000e+00> : vector<32x128xf32>
    %2 = tpu.matmul %0, %1, %cst {dimension_numbers = #tpu.dot_dimension_numbers<[1], [0], [0], [1], [0, 0, 1, 1], [], []>} : vector<32x128xbf16>, vector<128x128xbf16>, vector<32x128xf32> -> vector<32x128xf32>
    %c0_3 = arith.constant 0 : index
    %c0_4 = arith.constant 0 : index
    %3 = vector.load %arg4[%c0_3, %c0_4] : memref<32x128xf32, #tpu.memory_space<vmem>>, vector<32x128xf32>
    tpu.vector_store %arg4[%c0_3, %c0_4], %2 {strides = array<i32>} : memref<32x128xf32, #tpu.memory_space<vmem>>, vector<32x128xf32>,
    return
  }
  func.func @transform_0(%arg0: i32, %arg1: i32) -> (i32, i32) {
    %c0_i32 = arith.constant 0 : i32
    %c0_i32_0 = arith.constant 0 : i32
    return %arg0, %c0_i32 : i32, i32
  }
  func.func @transform_1(%arg0: i32, %arg1: i32) -> (i32, i32) {
    %c0_i32 = arith.constant 0 : i32
    %c0_i32_0 = arith.constant 0 : i32
    return %c0_i32, %arg1 : i32, i32
  }
  func.func @transform_2(%arg0: i32, %arg1: i32) -> (i32, i32) {
    %c0_i32 = arith.constant 0 : i32
    return %arg0, %arg1 : i32, i32
  }
}

module attributes {stable_mosaic.version = 11 : i64} {
  func.func @_mm_kernel(%arg0: i32, %arg1: i32, %arg2: memref<32x128xbf16, #tpu.memory_space<vmem>>, %arg3: memref<128x128xbf16, #tpu.memory_space<vmem>>, %arg4: memref<32x128xf32, #tpu.memory_space<vmem>>) attributes {dimension_semantics = [#tpu.dimension_semantics<parallel>, #tpu.dimension_semantics<parallel>], iteration_bounds = array<i64: 1, 3>, scalar_prefetch = 0 : i64, scratch_operands = 0 : i64, tpu.core_type = #tpu.core_type<tc>, window_params = [{transform_indices = @transform_0, window_bounds = array<i64: 32, 128>}, {transform_indices = @transform_1, window_bounds = array<i64: 128, 128>}, {transform_indices = @transform_2, window_bounds = array<i64: 32, 128>}]} {
    %c0 = arith.constant 0 : index
    %c0_0 = arith.constant 0 : index
    %0 = vector.load %arg2[%c0, %c0_0] : memref<32x128xbf16, #tpu.memory_space<vmem>>, vector<32x128xbf16>
    %c0_1 = arith.constant 0 : index
    %c0_2 = arith.constant 0 : index
    %1 = vector.load %arg3[%c0_1, %c0_2] : memref<128x128xbf16, #tpu.memory_space<vmem>>, vector<128x128xbf16>
    %cst = arith.constant dense<0.000000e+00> : vector<32x128xf32>
    %2 = tpu.matmul %0, %1, %cst {dimension_numbers = #tpu.dot_dimension_numbers<[1], [0], [0], [1], [0, 0, 1, 1], [], []>} : vector<32x128xbf16>, vector<128x128xbf16>, vector<32x128xf32> -> vector<32x128xf32>
    %c0_3 = arith.constant 0 : index
    %c0_4 = arith.constant 0 : index
    %3 = vector.load %arg4[%c0_3, %c0_4] : memref<32x128xf32, #tpu.memory_space<vmem>>, vector<32x128xf32>
    tpu.vector_store %arg4[%c0_3, %c0_4], %2 {strides = array<i32>} : memref<32x128xf32, #tpu.memory_space<vmem>>, vector<32x128xf32>,
    return
  }
  func.func @transform_0(%arg0: i32, %arg1: i32) -> (i32, i32) {
    %c0_i32 = arith.constant 0 : i32
    %c0_i32_0 = arith.constant 0 : i32
    return %arg0, %c0_i32 : i32, i32
  }
  func.func @transform_1(%arg0: i32, %arg1: i32) -> (i32, i32) {
    %c0_i32 = arith.constant 0 : i32
    %c0_i32_0 = arith.constant 0 : i32
    return %c0_i32, %arg1 : i32, i32
  }
  func.func @transform_2(%arg0: i32, %arg1: i32) -> (i32, i32) {
    %c0_i32 = arith.constant 0 : i32
    return %arg0, %arg1 : i32, i32
  }
}

module attributes {stable_mosaic.version = 11 : i64} {
  func.func @_mm_kernel(%arg0: i32, %arg1: i32, %arg2: memref<32x256xbf16, #tpu.memory_space<vmem>>, %arg3: memref<256x128xbf16, #tpu.memory_space<vmem>>, %arg4: memref<32x128xf32, #tpu.memory_space<vmem>>) attributes {dimension_semantics = [#tpu.dimension_semantics<parallel>, #tpu.dimension_semantics<parallel>], iteration_bounds = array<i64: 1, 9>, scalar_prefetch = 0 : i64, scratch_operands = 0 : i64, tpu.core_type = #tpu.core_type<tc>, window_params = [{transform_indices = @transform_0, window_bounds = array<i64: 32, 256>}, {transform_indices = @transform_1, window_bounds = array<i64: 256, 128>}, {transform_indices = @transform_2, window_bounds = array<i64: 32, 128>}]} {
    %c0 = arith.constant 0 : index
    %c0_0 = arith.constant 0 : index
    %0 = vector.load %arg2[%c0, %c0_0] : memref<32x256xbf16, #tpu.memory_space<vmem>>, vector<32x256xbf16>
    %c0_1 = arith.constant 0 : index
    %c0_2 = arith.constant 0 : index
    %1 = vector.load %arg3[%c0_1, %c0_2] : memref<256x128xbf16, #tpu.memory_space<vmem>>, vector<256x128xbf16>
    %cst = arith.constant dense<0.000000e+00> : vector<32x128xf32>
    %2 = tpu.matmul %0, %1, %cst {dimension_numbers = #tpu.dot_dimension_numbers<[1], [0], [0], [1], [0, 0, 1, 1], [], []>} : vector<32x256xbf16>, vector<256x128xbf16>, vector<32x128xf32> -> vector<32x128xf32>
    %c0_3 = arith.constant 0 : index
    %c0_4 = arith.constant 0 : index
    %3 = vector.load %arg4[%c0_3, %c0_4] : memref<32x128xf32, #tpu.memory_space<vmem>>, vector<32x128xf32>
    tpu.vector_store %arg4[%c0_3, %c0_4], %2 {strides = array<i32>} : memref<32x128xf32, #tpu.memory_space<vmem>>, vector<32x128xf32>,
    return
  }
  func.func @transform_0(%arg0: i32, %arg1: i32) -> (i32, i32) {
    %c0_i32 = arith.constant 0 : i32
    %c0_i32_0 = arith.constant 0 : i32
    return %arg0, %c0_i32 : i32, i32
  }
  func.func @transform_1(%arg0: i32, %arg1: i32) -> (i32, i32) {
    %c0_i32 = arith.constant 0 : i32
    %c0_i32_0 = arith.constant 0 : i32
    return %c0_i32, %arg1 : i32, i32
  }
  func.func @transform_2(%arg0: i32, %arg1: i32) -> (i32, i32) {
    %c0_i32 = arith.constant 0 : i32
    return %arg0, %arg1 : i32, i32
  }
}

</mosaic_0001>

<bundles_post_ra>
// kernel: _lambda_.31
= control target key start
LH: loop header
LB: loop body
LE: loop exit
PB: predicated region body
PF: predicated region fallthrough
CT: control target
= control target key end

     0   :  { %7 = vsyncpa [#allocation3], 0  ;;  %s495_s12 = smov [#allocation2]   ;;  %s496_s14 = smov 128   ;;  %s540_s0 = inlined_call_operand.vmem [shape: bf16[16,256], index: 0, kind: input, shape index: {}]   ;;  %s541_s1 = inlined_call_operand.hbm [shape: bf16[256,256], index: 1, kind: input, shape index: {}]   ;;  %s542_s2 = inlined_call_operand.vmem [shape: f32[16,256], index: 2, kind: output, shape index: {}]  }
   0x1   :  { %s14_s11 = sshll.u32 %s541_s1, 4  ;;  %s16_s13 = sshll.u32 %s495_s12, 4  ;;  %s15_s11 = int_to_ptr.hbm [resolvable:$true] %s14_s11  ;;  %s17_s13 = int_to_ptr.vmem [resolvable:$true] %s16_s13 }
   0x2   :  { %s497_s15 = smov 8  }
   0x3   :  { %22 = dma.hbm_to_vmem [thread:$0]  %s15_s11, 4096, %s17_s13, [#allocation3], %s496_s14, %s496_s14, %s497_s15  }
   0x4   :  { %493 = dma.done.wait [#allocation3], 4096  }
   0x5   :  { %494 = vsyncadd [#allocation3], 4294963200  ;;  %v362_v0 = vld [vmem:[#allocation2 + $0x70] sm:$0xf]  ;;  %v449_v1 = vld [vmem:[#allocation2 + $0x74] sm:$0xf0] }
   0x6   :  { %v426_v2 = vld [vmem:[#allocation2 + $0xf0] sm:$0xf]  ;;  %v363_v3 = vor.u32 %v449_v1, %v362_v0  ;;  %v465_v4 = vld [vmem:[#allocation2 + $0xf4] sm:$0xf0]  ;;  %v448_v5 = vld [vmem:[#allocation2 + $0x74] sm:$0xf] }
   0x7   :  { %v364_v6 = vld [vmem:[#allocation2 + $0x78] sm:$0xf0]  ;;  %v427_v7 = vor.u32 %v465_v4, %v426_v2  ;;  %v464_v9 = vld [vmem:[#allocation2 + $0xf4] sm:$0xf]  ;;  %v354_v11 = vld [vmem:[#allocation2 + $0x60] sm:$0xf] }
   0x8   :  { %v367_v8 = vor.u32 %v448_v5, %v364_v6  ;;  %v428_v10 = vld [vmem:[#allocation2 + $0xf8] sm:$0xf0]  ;;  %231 = vmatpush.bf16.msra.mxu0 %v363_v3  ;;  %v447_v13 = vld [vmem:[#allocation2 + $0x64] sm:$0xf0]  ;;  %v418_v14 = vld [vmem:[#allocation2 + $0xe0] sm:$0xf] }
   0x9   :  { %v431_v12 = vor.u32 %v464_v9, %v428_v10  ;;  %v463_v15 = vld [vmem:[#allocation2 + $0xe4] sm:$0xf0]  ;;  %245 = vmatpush.bf16.msra.mxu1 %v427_v7  ;;  %v355_v16 = vor.u32 %v447_v13, %v354_v11  ;;  %v446_v18 = vld [vmem:[#allocation2 + $0x64] sm:$0xf]  ;;  %v356_v19 = vld [vmem:[#allocation2 + $0x68] sm:$0xf0] }
   0xa   :  { %259 = vmatpush.bf16.msra.mxu2 %v367_v8  ;;  %v419_v17 = vor.u32 %v463_v15, %v418_v14  ;;  %v462_v20 = vld [vmem:[#allocation2 + $0xe4] sm:$0xf]  ;;  %v359_v21 = vor.u32 %v446_v18, %v356_v19  ;;  %v420_v22 = vld [vmem:[#allocation2 + $0xe8] sm:$0xf0]  ;;  %v346_v23 = vld [vmem:[#allocation2 + $0x50] sm:$0xf] }
   0xb   :  { %273 = vmatpush.bf16.msra.mxu3 %v431_v12  ;;  %v445_v24 = vld [vmem:[#allocation2 + $0x54] sm:$0xf0]  ;;  %v423_v25 = vor.u32 %v462_v20, %v420_v22  ;;  %v410_v26 = vld [vmem:[#allocation2 + $0xd0] sm:$0xf]  ;;  %v444_v28 = vld [vmem:[#allocation2 + $0x54] sm:$0xf] }
   0xc   :  { %v461_v27 = vld [vmem:[#allocation2 + $0xd4] sm:$0xf0]  ;;  %232 = vmatpush.bf16.msra.mxu0 %v355_v16  ;;  %v347_v29 = vor.u32 %v445_v24, %v346_v23  ;;  %v348_v30 = vld [vmem:[#allocation2 + $0x58] sm:$0xf0]  ;;  %v460_v31 = vld [vmem:[#allocation2 + $0xd4] sm:$0xf] }
   0xd   :  { %v412_v32 = vld [vmem:[#allocation2 + $0xd8] sm:$0xf0]  ;;  %246 = vmatpush.bf16.msra.mxu1 %v419_v17  ;;  %v411_v33 = vor.u32 %v461_v27, %v410_v26  ;;  %v351_v34 = vor.u32 %v444_v28, %v348_v30  ;;  %v338_v35 = vld [vmem:[#allocation2 + $0x40] sm:$0xf]  ;;  %v443_v36 = vld [vmem:[#allocation2 + $0x44] sm:$0xf0] }
   0xe   :  { %260 = vmatpush.bf16.msra.mxu2 %v359_v21  ;;  %v402_v37 = vld [vmem:[#allocation2 + $0xc0] sm:$0xf]  ;;  %v415_v38 = vor.u32 %v460_v31, %v412_v32  ;;  %v459_v39 = vld [vmem:[#allocation2 + $0xc4] sm:$0xf0]  ;;  %v442_v40 = vld [vmem:[#allocation2 + $0x44] sm:$0xf]  ;;  %v339_v44 = vor.u32 %v443_v36, %v338_v35 }
   0xf   :  { %274 = vmatpush.bf16.msra.mxu3 %v423_v25  ;;  %v340_v41 = vld [vmem:[#allocation2 + $0x48] sm:$0xf0]  ;;  %v458_v42 = vld [vmem:[#allocation2 + $0xc4] sm:$0xf]  ;;  %v403_v45 = vor.u32 %v459_v39, %v402_v37  ;;  %v330_v47 = vld [vmem:[#allocation2 + $0x30] sm:$0xf] }
  0x10   :  { %v404_v43 = vld [vmem:[#allocation2 + $0xc8] sm:$0xf0]  ;;  %233 = vmatpush.bf16.msra.mxu0 %v347_v29  ;;  %v343_v46 = vor.u32 %v442_v40, %v340_v41  ;;  %v441_v48 = vld [vmem:[#allocation2 + $0x34] sm:$0xf0]  ;;  %v394_v49 = vld [vmem:[#allocation2 + $0xb0] sm:$0xf] }
  0x11   :  { %247 = vmatpush.bf16.msra.mxu1 %v411_v33  ;;  %v407_v50 = vor.u32 %v458_v42, %v404_v43  ;;  %v457_v51 = vld [vmem:[#allocation2 + $0xb4] sm:$0xf0]  ;;  %v440_v52 = vld [vmem:[#allocation2 + $0x34] sm:$0xf]  ;;  %v332_v53 = vld [vmem:[#allocation2 + $0x38] sm:$0xf0]  ;;  %v331_v56 = vor.u32 %v441_v48, %v330_v47 }
  0x12   :  { %261 = vmatpush.bf16.msra.mxu2 %v351_v34  ;;  %v456_v54 = vld [vmem:[#allocation2 + $0xb4] sm:$0xf]  ;;  %v396_v55 = vld [vmem:[#allocation2 + $0xb8] sm:$0xf0]  ;;  %v395_v57 = vor.u32 %v457_v51, %v394_v49  ;;  %v335_v58 = vor.u32 %v440_v52, %v332_v53  ;;  %v322_v59 = vld [vmem:[#allocation2 + $0x20] sm:$0xf] }
  0x13   :  { %275 = vmatpush.bf16.msra.mxu3 %v415_v38  ;;  %v439_v60 = vld [vmem:[#allocation2 + $0x24] sm:$0xf0]  ;;  %v386_v61 = vld [vmem:[#allocation2 + $0xa0] sm:$0xf]  ;;  %v399_v62 = vor.u32 %v456_v54, %v396_v55  ;;  %v438_v0 = vld [vmem:[#allocation2 + $0x24] sm:$0xf] }
  0x14   :  { %234 = vmatpush.bf16.msra.mxu0 %v339_v44  ;;  %v455_v63 = vld [vmem:[#allocation2 + $0xa4] sm:$0xf0]  ;;  %v324_v1 = vld [vmem:[#allocation2 + $0x28] sm:$0xf0]  ;;  %v454_v2 = vld [vmem:[#allocation2 + $0xa4] sm:$0xf]  ;;  %v323_v4 = vor.u32 %v439_v60, %v322_v59 }
  0x15   :  { %248 = vmatpush.bf16.msra.mxu1 %v403_v45  ;;  %v388_v3 = vld [vmem:[#allocation2 + $0xa8] sm:$0xf0]  ;;  %v387_v5 = vor.u32 %v455_v63, %v386_v61  ;;  %v327_v6 = vor.u32 %v438_v0, %v324_v1  ;;  %v314_v7 = vld [vmem:[#allocation2 + $0x10] sm:$0xf]  ;;  %v437_v8 = vld [vmem:[#allocation2 + $0x14] sm:$0xf0] }
  0x16   :  { %262 = vmatpush.bf16.msra.mxu2 %v343_v46  ;;  %v378_v9 = vld [vmem:[#allocation2 + $0x90] sm:$0xf]  ;;  %v391_v10 = vor.u32 %v454_v2, %v388_v3  ;;  %v453_v11 = vld [vmem:[#allocation2 + $0x94] sm:$0xf0]  ;;  %v436_v12 = vld [vmem:[#allocation2 + $0x14] sm:$0xf]  ;;  %v315_v16 = vor.u32 %v437_v8, %v314_v7 }
  0x17   :  { %276 = vmatpush.bf16.msra.mxu3 %v407_v50  ;;  %v316_v13 = vld [vmem:[#allocation2 + $0x18] sm:$0xf0]  ;;  %v452_v14 = vld [vmem:[#allocation2 + $0x94] sm:$0xf]  ;;  %v379_v17 = vor.u32 %v453_v11, %v378_v9  ;;  %v306_v19 = vld [vmem:[#allocation2] sm:$0xf] }
  0x18   :  { %235 = vmatpush.bf16.msra.mxu0 %v331_v56  ;;  %v380_v15 = vld [vmem:[#allocation2 + $0x98] sm:$0xf0]  ;;  %v319_v18 = vor.u32 %v436_v12, %v316_v13  ;;  %v435_v20 = vld [vmem:[#allocation2 + $0x4] sm:$0xf0]  ;;  %v370_v21 = vld [vmem:[#allocation2 + $0x80] sm:$0xf] }
  0x19   :  { %249 = vmatpush.bf16.msra.mxu1 %v395_v57  ;;  %v383_v22 = vor.u32 %v452_v14, %v380_v15  ;;  %v451_v23 = vld [vmem:[#allocation2 + $0x84] sm:$0xf0]  ;;  %v434_v24 = vld [vmem:[#allocation2 + $0x4] sm:$0xf]  ;;  %v308_v25 = vld [vmem:[#allocation2 + $0x8] sm:$0xf0]  ;;  %v307_v28 = vor.u32 %v435_v20, %v306_v19 }
  0x1a   :  { %263 = vmatpush.bf16.msra.mxu2 %v335_v58  ;;  %v450_v26 = vld [vmem:[#allocation2 + $0x84] sm:$0xf]  ;;  %v372_v27 = vld [vmem:[#allocation2 + $0x88] sm:$0xf0]  ;;  %v298_v29 = vld [vmem:[%s540_s0] sm:$0xf]  ;;  %v371_v31 = vor.u32 %v451_v23, %v370_v21  ;;  %v311_v32 = vor.u32 %v434_v24, %v308_v25 }
  0x1b   :  { %277 = vmatpush.bf16.msra.mxu3 %v399_v62  ;;  %v433_v30 = vld [vmem:[%s540_s0 + $0x4] sm:$0xf0]  ;;  %v432_v33 = vld [vmem:[%s540_s0 + $0x4] sm:$0xf]  ;;  %v300_v34 = vld [vmem:[%s540_s0 + $0x8] sm:$0xf0]  ;;  %v375_v35 = vor.u32 %v450_v26, %v372_v27 }
  0x1c   :  { %236 = vmatpush.bf16.msra.mxu0 %v323_v4  ;;  %v299_v36 = vor.u32 %v433_v30, %v298_v29  ;;  %v303_v37 = vor.u32 %v432_v33, %v300_v34 }
  0x1d   :  { %250 = vmatpush.bf16.msra.mxu1 %v387_v5 }
  0x1e   :  { %264 = vmatpush.bf16.msra.mxu2 %v327_v6 }
  0x1f   :  { %278 = vmatpush.bf16.msra.mxu3 %v391_v10 }
  0x20   :  { %237 = vmatpush.bf16.msra.mxu0 %v315_v16 }
  0x21   :  { %251 = vmatpush.bf16.msra.mxu1 %v379_v17 }
  0x22   :  { %265 = vmatpush.bf16.msra.mxu2 %v319_v18 }
  0x23   :  { %279 = vmatpush.bf16.msra.mxu3 %v383_v22 }
  0x24   :  { %238 = vmatpush.bf16.msra.mxu0 %v307_v28 }
  0x25   :  { %252 = vmatpush.bf16.msra.mxu1 %v371_v31 }
  0x26   :  { %266 = vmatpush.bf16.msra.mxu2 %v311_v32 }
  0x27   :  { %280 = vmatpush.bf16.msra.mxu3 %v375_v35  ;;  %239 = vmatmul.bf16.vlgmr.msra.gmra.mxu0 %v299_v36 }
  0x28   :  { %253 = vmatmul.bf16.vlgmr.msra.gmra.mxu1 %v303_v37 }
  0x29   :  { %267 = vmatmul.bf16.vlgmr.msra.gmra.mxu2 %v299_v36 }
  0x2a   :  { %281 = vmatmul.bf16.vlgmr.msra.gmra.mxu3 %v303_v37 }
  0xa4   :  { %v240_v38 = vpop.f32.mrf.mxu0 }
  0xa5   :  { %v254_v39 = vpop.f32.mrf.mxu1 }
  0xa6   :  { %v255_v40 = vadd.f32 %v254_v39, %v240_v38 }
  0xa8   :  { %287 = vst [vmem:[%s542_s2] sm:$0xff] %v255_v40 }
  0xac   :  { %v268_v41 = vpop.f32.mrf.mxu2  ;;  %v242_v43 = vpop.f32.mrf.mxu0 }
  0xad   :  { %v282_v42 = vpop.f32.mrf.mxu3  ;;  %v256_v45 = vpop.f32.mrf.mxu1 }
  0xae   :  { %v283_v44 = vadd.f32 %v282_v42, %v268_v41  ;;  %v257_v46 = vadd.f32 %v256_v45, %v242_v43 }
  0xb0   :  { %288 = vst [vmem:[%s542_s2 + $0x8] sm:$0xff] %v283_v44 }
  0xb1   :  { %289 = vst [vmem:[%s542_s2 + $0x10] sm:$0xff] %v257_v46 }
  0xb4   :  { %v270_v47 = vpop.f32.mrf.mxu2 }
  0xb5   :  { %v284_v48 = vpop.f32.mrf.mxu3 }
  0xb6   :  { %v285_v49 = vadd.f32 %v284_v48, %v270_v47 }
  0xb8   :  { %290 = vst [vmem:[%s542_s2 + $0x18] sm:$0xff] %v285_v49 }
  0xb9   :  { %295 = vsyncpa [#allocation3], 1 }

// kernel: _lambda_.32
= control target key start
LH: loop header
LB: loop body
LE: loop exit
PB: predicated region body
PF: predicated region fallthrough
CT: control target
= control target key end

     0   :  { %7 = vsyncpa [#allocation3], 0  ;;  %s321_s12 = smov [#allocation2]   ;;  %s322_s14 = smov 64   ;;  %s360_s0 = inlined_call_operand.vmem [shape: bf16[16,256], index: 0, kind: input, shape index: {}]   ;;  %s361_s1 = inlined_call_operand.hbm [shape: bf16[256,128], index: 1, kind: input, shape index: {}]   ;;  %s362_s2 = inlined_call_operand.vmem [shape: f32[16,128], index: 2, kind: output, shape index: {}]  }
   0x1   :  { %s14_s11 = sshll.u32 %s361_s1, 4  ;;  %s16_s13 = sshll.u32 %s321_s12, 4  ;;  %s15_s11 = int_to_ptr.hbm [resolvable:$true] %s14_s11  ;;  %s17_s13 = int_to_ptr.vmem [resolvable:$true] %s16_s13 }
   0x2   :  { %s323_s15 = smov 4  }
   0x3   :  { %22 = dma.hbm_to_vmem [thread:$0]  %s15_s11, 2048, %s17_s13, [#allocation3], %s322_s14, %s322_s14, %s323_s15  }
   0x4   :  { %319 = dma.done.wait [#allocation3], 2048  }
   0x5   :  { %320 = vsyncadd [#allocation3], 4294965248  ;;  %v283_v0 = vld [vmem:[#allocation2 + $0x38] sm:$0xff]  ;;  %v282_v2 = vld [vmem:[#allocation2 + $0x30] sm:$0xff] }
   0x6   :  { %v291_v1 = vld [vmem:[#allocation2 + $0x78] sm:$0xff]  ;;  %167 = vmatpush.bf16.msra.mxu0 %v283_v0  ;;  %v290_v3 = vld [vmem:[#allocation2 + $0x70] sm:$0xff]  ;;  %v281_v4 = vld [vmem:[#allocation2 + $0x28] sm:$0xff] }
   0x7   :  { %181 = vmatpush.bf16.msra.mxu1 %v291_v1  ;;  %v289_v5 = vld [vmem:[#allocation2 + $0x68] sm:$0xff]  ;;  %v280_v6 = vld [vmem:[#allocation2 + $0x20] sm:$0xff]  ;;  %v279_v8 = vld [vmem:[#allocation2 + $0x18] sm:$0xff] }
   0x8   :  { %v288_v7 = vld [vmem:[#allocation2 + $0x60] sm:$0xff]  ;;  %v287_v9 = vld [vmem:[#allocation2 + $0x58] sm:$0xff]  ;;  %v278_v10 = vld [vmem:[#allocation2 + $0x10] sm:$0xff] }
   0x9   :  { %v286_v11 = vld [vmem:[#allocation2 + $0x50] sm:$0xff]  ;;  %v277_v12 = vld [vmem:[#allocation2 + $0x8] sm:$0xff]  ;;  %v276_v14 = vld [vmem:[#allocation2] sm:$0xff] }
   0xa   :  { %168 = vmatpush.bf16.msra.mxu0 %v282_v2  ;;  %v285_v13 = vld [vmem:[#allocation2 + $0x48] sm:$0xff]  ;;  %v284_v15 = vld [vmem:[#allocation2 + $0x40] sm:$0xff] }
   0xb   :  { %182 = vmatpush.bf16.msra.mxu1 %v290_v3  ;;  %v204_v16 = vld [vmem:[%s360_s0] sm:$0xf]  ;;  %v275_v17 = vld [vmem:[%s360_s0 + $0x4] sm:$0xf0]  ;;  %v274_v18 = vld [vmem:[%s360_s0 + $0x4] sm:$0xf] }
   0xc   :  { %v206_v19 = vld [vmem:[%s360_s0 + $0x8] sm:$0xf0]  ;;  %v205_v20 = vor.u32 %v275_v17, %v204_v16 }
   0xd   :  { %v209_v21 = vor.u32 %v274_v18, %v206_v19 }
   0xe   :  { %169 = vmatpush.bf16.msra.mxu0 %v281_v4 }
   0xf   :  { %183 = vmatpush.bf16.msra.mxu1 %v289_v5 }
  0x12   :  { %170 = vmatpush.bf16.msra.mxu0 %v280_v6 }
  0x13   :  { %184 = vmatpush.bf16.msra.mxu1 %v288_v7 }
  0x16   :  { %171 = vmatpush.bf16.msra.mxu0 %v279_v8 }
  0x17   :  { %185 = vmatpush.bf16.msra.mxu1 %v287_v9 }
  0x1a   :  { %172 = vmatpush.bf16.msra.mxu0 %v278_v10 }
  0x1b   :  { %186 = vmatpush.bf16.msra.mxu1 %v286_v11 }
  0x1e   :  { %173 = vmatpush.bf16.msra.mxu0 %v277_v12 }
  0x1f   :  { %187 = vmatpush.bf16.msra.mxu1 %v285_v13 }
  0x22   :  { %174 = vmatpush.bf16.msra.mxu0 %v276_v14 }
  0x23   :  { %188 = vmatpush.bf16.msra.mxu1 %v284_v15 }
  0x25   :  { %175 = vmatmul.bf16.vlgmr.msra.gmra.mxu0 %v205_v20 }
  0x26   :  { %189 = vmatmul.bf16.vlgmr.msra.gmra.mxu1 %v209_v21 }
  0xa2   :  { %v176_v22 = vpop.f32.mrf.mxu0 }
  0xa3   :  { %v190_v23 = vpop.f32.mrf.mxu1 }
  0xa4   :  { %v191_v24 = vadd.f32 %v190_v23, %v176_v22 }
  0xa6   :  { %195 = vst [vmem:[%s362_s2] sm:$0xff] %v191_v24 }
  0xaa   :  { %v178_v25 = vpop.f32.mrf.mxu0 }
  0xab   :  { %v192_v26 = vpop.f32.mrf.mxu1 }
  0xac   :  { %v193_v27 = vadd.f32 %v192_v26, %v178_v25 }
  0xae   :  { %196 = vst [vmem:[%s362_s2 + $0x8] sm:$0xff] %v193_v27 }
  0xaf   :  { %201 = vsyncpa [#allocation3], 1 }

// kernel: _lambda_.33
= control target key start
LH: loop header
LB: loop body
LE: loop exit
PB: predicated region body
PF: predicated region fallthrough
CT: control target
= control target key end

     0   :  { %s1897_s0 = inlined_call_operand.vmem [shape: bf16[16,2048], index: 0, kind: input, shape index: {}]   ;;  %s1898_s1 = inlined_call_operand.hbm [shape: bf16[2048,2048], index: 1, kind: input, shape index: {}]   ;;  %s1899_s2 = inlined_call_operand.vmem [shape: f32[16,2048], index: 2, kind: output, shape index: {}]  }
   0x1   :  { %1903 = sst [smem:[#allocation14_spill]] %s1897_s0 }
   0x2   :  { %7 = vsyncpa [#allocation5], 0 }
   0x3   :  { %9 = vsyncpa [#allocation5 + $0x1], 0  ;;  %s1549_s9 = smov 0   ;;  %s1551_s10 = smov 0  }
   0x4   :  { %s1553_s11 = smov 0   ;;  %s1555_s12 = smov 0  }
   0x5   :  { %s1557_s13 = smov 0   ;;  %s1559_s14 = smov 0  }
   0x6   :  { %s1561_s15 = smov 0   ;;  %s1563_s16 = smov 0  }
   0x7   :  { %s1565_s17 = smov 0   ;;  %s1567_s18 = smov 0  }
   0x8   :  { %s1569_s19 = smov 0   ;;  %s1571_s20 = smov 0  }
   0x9 LB: > { %1904 = sst [smem:[#allocation8_spill]] %s1508_s15  ;;  %s934_s21 = sadd.s32 4294967295, %s1528_s20   ;;  %s1528_s20 = sphi %s1571_s20, %s15_s20   ;;  %s1524_s19 = sphi %s1569_s19, %s1929_s19   ;;  %s1520_s18 = sphi %s1567_s18, %s1928_s18   ;;  %s1516_s17 = sphi %s1565_s17, %s1927_s17   ;;  %s1512_s16 = sphi %s1563_s16, %s1926_s16   ;;  %s1508_s15 = sphi %s1561_s15, %s1918_s15   ;;  %s1504_s14 = sphi %s1559_s14, %s1917_s14   ;;  %s1500_s13 = sphi %s1557_s13, %s1925_s13   ;;  %s1496_s12 = sphi %s1555_s12, %s1924_s12   ;;  %s1492_s11 = sphi %s1553_s11, %s1923_s11   ;;  %s1488_s10 = sphi %s1551_s10, %s1922_s10   ;;  %s1484_s9 = sphi %s1549_s9, %s1921_s9  }
   0xa   : > { %s27_s22 = sadd.s32 1, %s1520_s18  ;;  %s30_s23 = sadd.s32 1, %s1524_s19 }
   0xb   : > { %p28_p0 = scmp.ge.s32.totalorder %s27_s22, 4  ;;  %s43_s24 = sadd.s32 1, %s1508_s15 }
   0xc   : > { %p50_p1 = scmp.ne.s32.totalorder %s1508_s15, %s1504_s14  ;;  %p51_p2 = scmp.eq.s32.totalorder %s1528_s20, 0 }
   0xd   : > { %s1931_s22 = smov (%p28_p0, %s27_s22), 0  ;;  %s1933_s23 = smov (!%p28_p0, %s30_s23), %s1524_s19 }
   0xe   : > { %1905 = sst [smem:[#allocation9_spill]] %s1931_s22  ;;  %s39_s25 = ssub.s32 %s1520_s18, %s1931_s22 }
   0xf   : > { %p32_p3 = scmp.ge.s32.totalorder %s1933_s23, 8  ;;  %p41_p4 = scmp.eq.s32.totalorder %s39_s25, 0 }
  0x10   : > { %p1621_p5 = por %p51_p2, %p50_p1  ;;  %s71_s27 = sadd.s32 1, %s1500_s13 }
  0x11   : > { %s1935_s23 = smov (%p32_p3, %s1933_s23), 0  ;;  %p78_p6 = scmp.ne.s32.totalorder %s1500_s13, %s1496_s12 }
  0x12   : > { %1907 = sst [smem:[#allocation10_spill]] %s1935_s23  ;;  %s67_s29 = ssub.s32 %s1524_s19, %s1935_s23 }
  0x13   : > { %s1629_s28 = scalar_select %p41_p4, %s1508_s15, %s43_s24  }
  0x14   : > { %s68_s30 = sor.u32 %s67_s29, %s39_s25  ;;  %p84_p7 = scmp.ne.s32.totalorder %s1496_s12, %s1492_s11 }
  0x15   : > { %1908 = sst [smem:[#allocation11_spill]] %s1629_s28  ;;  %p69_p8 = scmp.eq.s32.totalorder %s68_s30, 0 }
  0x16   : > { %p1637_p9 = por %p78_p6, %p51_p2  ;;  %p85_p10 = scmp.eq.s32.totalorder %s934_s21, 0 }
  0x17   : > { %p97_p11 = scmp.eq.s32.totalorder %s67_s29, 0  ;;  %s99_s6 = sadd.s32 1, %s1488_s10 }
  0x18   : > { %s1644_s4 = scalar_select %p69_p8, %s1500_s13, %s71_s27  }
  0x19   : > { %p1646_p12 = por %p85_p10, %p84_p7  ;;  %p109_p13 = scmp.ne.s32.totalorder %s1488_s10, %s1484_s9 }
  0x1a   : > { %1910 = sst [smem:[#allocation12_spill]] %s1644_s4  ;;  %p110_p0 = scmp.eq.s32.totalorder %s934_s21, 31 }
  0x1b   : > { %s1652_s7 = scalar_select %p97_p11, %s1488_s10, %s99_s6  }
  0x1c   : > { %p1658_p1 = por %p110_p0, %p109_p13  ;;  %p937_p2 = scmp.ge.s32.totalorder %s1528_s20, 32 }
  0x1d   : > { %1912 = sst [smem:[#allocation13_spill]] %s1652_s7 }
  0x1e   : > { %132 = sbr.rel (%p937_p2) target bundleno = 57 (0x39), region = 16 }
  0x23   : > { %135 = sbr.rel (!%p1621_p5) target bundleno = 49 (0x31), region = 20  ;;  %s137_s11 = sand.u32 (%p1621_p5), 1, %s1508_s15  }
  0x24   : > { %s1229_s24 = sshll.u32 (%p1621_p5), %s1520_s18, 4  ;;  %s938_s25 = sshll.u32 (%p1621_p5), %s137_s11, 5 }
  0x25   : > { %s1914_s0 = sld [smem:[#allocation14_spill]] (%p1621_p5)  ;;  %s139_s21 = scalar_lea.vmem (%p1621_p5), [#allocation3], %s938_s25 }
  0x2b   : > { %s145_s30 = scalar_lea.vmem %s1914_s0, %s1229_s24 }
  0x2c   : > { %v158_v0 = vld [vmem:[%s145_s30] sm:$0xff]  ;;  %v160_v1 = vld [vmem:[%s145_s30 + $0x8] sm:$0xff] }
  0x2d   : > { %v162_v2 = vld [vmem:[%s145_s30 + $0x40] sm:$0xff]  ;;  %159 = vst [vmem:[%s139_s21] sm:$0xff] %v158_v0  ;;  %v164_v3 = vld [vmem:[%s145_s30 + $0x48] sm:$0xff] }
  0x2e   : > { %161 = vst [vmem:[%s139_s21 + $0x8] sm:$0xff] %v160_v1 }
  0x2f   : > { %163 = vst [vmem:[%s139_s21 + $0x10] sm:$0xff] %v162_v2 }
  0x30   : > { %165 = vst [vmem:[%s139_s21 + $0x18] sm:$0xff] %v164_v3 }
  0x31 PF: > { %s172_s26 = sand.u32 1, %s1500_s13   ;;  %s943_s6 = sshll.u32 %s1524_s19, 1 }
  0x32   : > { %s941_s11 = sshll.u32 %s172_s26, 9  ;;  %s1230_s23 = sshll.u32 %s1520_s18, 10 }
  0x33   : > { %s182_s27 = sadd.s32 %s1230_s23, %s943_s6  ;;  %s176_s24 = scalar_lea.vmem [#allocation4], %s941_s11 }
  0x34   : > { %s187_s29 = sshll.u32 %s176_s24, 4  ;;  %s945_s0 = sshll.u32 %s182_s27, 2  ;;  %s188_s29 = int_to_ptr.vmem [resolvable:$true] %s187_s29 }
  0x35   : > { %s184_s30 = scalar_lea.hbm %s1898_s1, %s945_s0  ;;  %s173_s21 = scalar_lea.sflag [#allocation5], %s172_s26 }
  0x36   : > { %s185_s28 = sshll.u32 %s184_s30, 4  ;;  %s1530_s15 = smov 1024   ;;  %s186_s28 = int_to_ptr.hbm [resolvable:$true] %s185_s28 }
  0x37   : > { %s1531_s4 = smov 128   ;;  %s1532_s7 = smov 8  }
  0x38   : > { %1300 = dma.hbm_to_vmem [thread:$0]  (%p1637_p9), %s186_s28, 8192, %s188_s29, %s173_s21, %s1530_s15, %s1531_s4, %s1532_s7  }
  0x39 PF: > { %p946_p3 = scmp.ge.s32.totalorder %s1528_s20, 1  ;;  %p195_p4 = scmp.lt.s32.totalorder %s1528_s20, 33 }
  0x3b   : > { %p196_p5 = pnand %p946_p3, %p195_p4 }
  0x3c   : > { %s202_s22 = sand.u32 (!%p196_p5), 1, %s1504_s14   ;;  %s208_s0 = sand.u32 (!%p196_p5), 1, %s1496_s12  }
  0x3d   : > { %199 = sbr.rel (%p196_p5) target bundleno = 310 (0x136), region = 47  ;;  %s947_s23 = sshll.u32 (!%p196_p5), %s202_s22, 5 }
  0x3e   : > { %s948_s6 = sshll.u32 (!%p196_p5), %s208_s0, 9  ;;  %s1682_s26 = scalar_lea.vmem (!%p196_p5), [#allocation3], %s947_s23 }
  0x3f   : > { %s209_s11 = scalar_lea.sflag (!%p196_p5), [#allocation5], %s208_s0  ;;  %s1684_s27 = scalar_lea.vmem (!%p196_p5), [#allocation4], %s948_s6 }
  0x42   : > { %1479 = dma.done.wait (%p1646_p12), %s209_s11, 8192  }
  0x43   : > { %1481 = vsyncadd (%p1646_p12), %s209_s11, 4294959104  ;;  %s234_s15 = sand.u32 1, %s1484_s9   ;;  %p950_p6 = scmp.ne.s32.totalorder %s1512_s16, 0 }
  0x44   : > { %s949_s28 = sshll.u32 %s234_s15, 5 }
  0x45   : > { %s1691_s3 = scalar_lea.vmem [#allocation6], %s949_s28  ;;  %246 = sbr.rel (%p950_p6) target bundleno = 79 (0x4f), region = 59 }
  0x4a   : > { %v1533_v4 = vmov 0.0  }
  0x4b   : > { %247 = vst [vmem:[#allocation2 + $0x10] sm:$0xff] %v1533_v4 }
  0x4c   : > { %248 = vst [vmem:[#allocation2] sm:$0xff] %v1533_v4 }
  0x4d   : > { %249 = vst [vmem:[#allocation2 + $0x18] sm:$0xff] %v1533_v4 }
  0x4e   : > { %250 = vst [vmem:[#allocation2 + $0x8] sm:$0xff] %v1533_v4 }
  0x4f PF: > { %v1025_v5 = vld [vmem:[%s1684_s27 + $0x70] sm:$0xf]  ;;  %v1250_v6 = vld [vmem:[%s1684_s27 + $0x74] sm:$0xf0]  ;;  %v1017_v16 = vld [vmem:[%s1684_s27 + $0x60] sm:$0xf] }
  0x50   : > { %v1089_v7 = vld [vmem:[%s1684_s27 + $0xf0] sm:$0xf]  ;;  %v1026_v8 = vor.u32 %v1250_v6, %v1025_v5  ;;  %v1266_v9 = vld [vmem:[%s1684_s27 + $0xf4] sm:$0xf0]  ;;  %v1248_v18 = vld [vmem:[%s1684_s27 + $0x64] sm:$0xf0] }
  0x51   : > { %v1153_v10 = vld [vmem:[%s1684_s27 + $0x170] sm:$0xf]  ;;  %v1282_v11 = vld [vmem:[%s1684_s27 + $0x174] sm:$0xf0]  ;;  %v1090_v12 = vor.u32 %v1266_v9, %v1089_v7  ;;  %v1081_v19 = vld [vmem:[%s1684_s27 + $0xe0] sm:$0xf]  ;;  %v1018_v21 = vor.u32 %v1248_v18, %v1017_v16 }
  0x52   : > { %v1154_v13 = vor.u32 %v1282_v11, %v1153_v10  ;;  %v1217_v14 = vld [vmem:[%s1684_s27 + $0x1f0] sm:$0xf]  ;;  %v1298_v15 = vld [vmem:[%s1684_s27 + $0x1f4] sm:$0xf0]  ;;  %663 = vmatpush.bf16.msra.mxu0 %v1026_v8  ;;  %v1264_v20 = vld [vmem:[%s1684_s27 + $0xe4] sm:$0xf0] }
  0x53   : > { %v1218_v17 = vor.u32 %v1298_v15, %v1217_v14  ;;  %677 = vmatpush.bf16.msra.mxu1 %v1090_v12  ;;  %v1082_v22 = vor.u32 %v1264_v20, %v1081_v19  ;;  %v1145_v23 = vld [vmem:[%s1684_s27 + $0x160] sm:$0xf]  ;;  %v1280_v24 = vld [vmem:[%s1684_s27 + $0x164] sm:$0xf0]  ;;  %v1009_v28 = vld [vmem:[%s1684_s27 + $0x50] sm:$0xf] }
  0x54   : > { %691 = vmatpush.bf16.msra.mxu2 %v1154_v13  ;;  %v1209_v25 = vld [vmem:[%s1684_s27 + $0x1e0] sm:$0xf]  ;;  %v1146_v26 = vor.u32 %v1280_v24, %v1145_v23  ;;  %v1296_v27 = vld [vmem:[%s1684_s27 + $0x1e4] sm:$0xf0]  ;;  %v1246_v29 = vld [vmem:[%s1684_s27 + $0x54] sm:$0xf0] }
  0x55   : > { %705 = vmatpush.bf16.msra.mxu3 %v1218_v17  ;;  %v1210_v30 = vor.u32 %v1296_v27, %v1209_v25  ;;  %v1073_v31 = vld [vmem:[%s1684_s27 + $0xd0] sm:$0xf]  ;;  %v1262_v32 = vld [vmem:[%s1684_s27 + $0xd4] sm:$0xf0]  ;;  %v1010_v34 = vor.u32 %v1246_v29, %v1009_v28  ;;  %v1001_v40 = vld [vmem:[%s1684_s27 + $0x40] sm:$0xf] }
  0x56   : > { %v1137_v33 = vld [vmem:[%s1684_s27 + $0x150] sm:$0xf]  ;;  %664 = vmatpush.bf16.msra.mxu0 %v1018_v21  ;;  %v1278_v35 = vld [vmem:[%s1684_s27 + $0x154] sm:$0xf0]  ;;  %v1074_v38 = vor.u32 %v1262_v32, %v1073_v31  ;;  %v1244_v41 = vld [vmem:[%s1684_s27 + $0x44] sm:$0xf0] }
  0x57   : > { %v1201_v36 = vld [vmem:[%s1684_s27 + $0x1d0] sm:$0xf]  ;;  %v1294_v37 = vld [vmem:[%s1684_s27 + $0x1d4] sm:$0xf0]  ;;  %678 = vmatpush.bf16.msra.mxu1 %v1082_v22  ;;  %v1138_v39 = vor.u32 %v1278_v35, %v1137_v33  ;;  %v1065_v42 = vld [vmem:[%s1684_s27 + $0xc0] sm:$0xf]  ;;  %v1002_v49 = vor.u32 %v1244_v41, %v1001_v40 }
  0x58   : > { %692 = vmatpush.bf16.msra.mxu2 %v1146_v26  ;;  %v1202_v43 = vor.u32 %v1294_v37, %v1201_v36  ;;  %v1260_v44 = vld [vmem:[%s1684_s27 + $0xc4] sm:$0xf0]  ;;  %v1129_v45 = vld [vmem:[%s1684_s27 + $0x140] sm:$0xf]  ;;  %v993_v52 = vld [vmem:[%s1684_s27 + $0x30] sm:$0xf] }
  0x59   : > { %706 = vmatpush.bf16.msra.mxu3 %v1210_v30  ;;  %v1276_v46 = vld [vmem:[%s1684_s27 + $0x144] sm:$0xf0]  ;;  %v1193_v47 = vld [vmem:[%s1684_s27 + $0x1c0] sm:$0xf]  ;;  %v1066_v50 = vor.u32 %v1260_v44, %v1065_v42  ;;  %v1242_v53 = vld [vmem:[%s1684_s27 + $0x34] sm:$0xf0] }
  0x5a   : > { %v1292_v48 = vld [vmem:[%s1684_s27 + $0x1c4] sm:$0xf0]  ;;  %665 = vmatpush.bf16.msra.mxu0 %v1010_v34  ;;  %v1130_v51 = vor.u32 %v1276_v46, %v1129_v45  ;;  %v1057_v54 = vld [vmem:[%s1684_s27 + $0xb0] sm:$0xf]  ;;  %v1258_v56 = vld [vmem:[%s1684_s27 + $0xb4] sm:$0xf0]  ;;  %v994_v61 = vor.u32 %v1242_v53, %v993_v52 }
  0x5b   : > { %679 = vmatpush.bf16.msra.mxu1 %v1074_v38  ;;  %v1194_v55 = vor.u32 %v1292_v48, %v1193_v47  ;;  %v1121_v57 = vld [vmem:[%s1684_s27 + $0x130] sm:$0xf]  ;;  %v1274_v58 = vld [vmem:[%s1684_s27 + $0x134] sm:$0xf0]  ;;  %v1058_v62 = vor.u32 %v1258_v56, %v1057_v54  ;;  %v985_v0 = vld [vmem:[%s1684_s27 + $0x20] sm:$0xf] }
  0x5c   : > { %693 = vmatpush.bf16.msra.mxu2 %v1138_v39  ;;  %v1185_v59 = vld [vmem:[%s1684_s27 + $0x1b0] sm:$0xf]  ;;  %v1290_v60 = vld [vmem:[%s1684_s27 + $0x1b4] sm:$0xf0]  ;;  %v1122_v63 = vor.u32 %v1274_v58, %v1121_v57  ;;  %v1240_v1 = vld [vmem:[%s1684_s27 + $0x24] sm:$0xf0] }
  0x5d   : > { %707 = vmatpush.bf16.msra.mxu3 %v1202_v43  ;;  %v1049_v2 = vld [vmem:[%s1684_s27 + $0xa0] sm:$0xf]  ;;  %v1186_v3 = vor.u32 %v1290_v60, %v1185_v59  ;;  %v1256_v4 = vld [vmem:[%s1684_s27 + $0xa4] sm:$0xf0]  ;;  %v986_v9 = vor.u32 %v1240_v1, %v985_v0  ;;  %v977_v12 = vld [vmem:[%s1684_s27 + $0x10] sm:$0xf] }
  0x5e   : > { %666 = vmatpush.bf16.msra.mxu0 %v1002_v49  ;;  %v1113_v5 = vld [vmem:[%s1684_s27 + $0x120] sm:$0xf]  ;;  %v1272_v6 = vld [vmem:[%s1684_s27 + $0x124] sm:$0xf0]  ;;  %v1050_v10 = vor.u32 %v1256_v4, %v1049_v2  ;;  %v1238_v13 = vld [vmem:[%s1684_s27 + $0x14] sm:$0xf0] }
  0x5f   : > { %680 = vmatpush.bf16.msra.mxu1 %v1066_v50  ;;  %v1177_v7 = vld [vmem:[%s1684_s27 + $0x1a0] sm:$0xf]  ;;  %v1288_v8 = vld [vmem:[%s1684_s27 + $0x1a4] sm:$0xf0]  ;;  %v1114_v11 = vor.u32 %v1272_v6, %v1113_v5  ;;  %v1041_v14 = vld [vmem:[%s1684_s27 + $0x90] sm:$0xf]  ;;  %v978_v22 = vor.u32 %v1238_v13, %v977_v12 }
  0x60   : > { %694 = vmatpush.bf16.msra.mxu2 %v1130_v51  ;;  %v1178_v15 = vor.u32 %v1288_v8, %v1177_v7  ;;  %v1254_v16 = vld [vmem:[%s1684_s27 + $0x94] sm:$0xf0]  ;;  %v1105_v17 = vld [vmem:[%s1684_s27 + $0x110] sm:$0xf]  ;;  %v969_v21 = vld [vmem:[%s1684_s27] sm:$0xf] }
  0x61   : > { %708 = vmatpush.bf16.msra.mxu3 %v1194_v55  ;;  %v1270_v18 = vld [vmem:[%s1684_s27 + $0x114] sm:$0xf0]  ;;  %v1169_v19 = vld [vmem:[%s1684_s27 + $0x190] sm:$0xf]  ;;  %v1236_v23 = vld [vmem:[%s1684_s27 + $0x4] sm:$0xf0]  ;;  %v1042_v26 = vor.u32 %v1254_v16, %v1041_v14 }
  0x62   : > { %667 = vmatpush.bf16.msra.mxu0 %v994_v61  ;;  %v1286_v20 = vld [vmem:[%s1684_s27 + $0x194] sm:$0xf0]  ;;  %v1033_v24 = vld [vmem:[%s1684_s27 + $0x80] sm:$0xf]  ;;  %v1252_v25 = vld [vmem:[%s1684_s27 + $0x84] sm:$0xf0]  ;;  %v1106_v27 = vor.u32 %v1270_v18, %v1105_v17  ;;  %v970_v38 = vor.u32 %v1236_v23, %v969_v21 }
  0x63   : > { %681 = vmatpush.bf16.msra.mxu1 %v1058_v62  ;;  %v1097_v28 = vld [vmem:[%s1684_s27 + $0x100] sm:$0xf]  ;;  %v1268_v29 = vld [vmem:[%s1684_s27 + $0x104] sm:$0xf0]  ;;  %v1170_v31 = vor.u32 %v1286_v20, %v1169_v19  ;;  %v1249_v33 = vld [vmem:[%s1684_s27 + $0x74] sm:$0xf]  ;;  %v1034_v42 = vor.u32 %v1252_v25, %v1033_v24 }
  0x64   : > { %695 = vmatpush.bf16.msra.mxu2 %v1122_v63  ;;  %v1161_v30 = vld [vmem:[%s1684_s27 + $0x180] sm:$0xf]  ;;  %v1284_v32 = vld [vmem:[%s1684_s27 + $0x184] sm:$0xf0]  ;;  %v1027_v34 = vld [vmem:[%s1684_s27 + $0x78] sm:$0xf0]  ;;  %v1098_v43 = vor.u32 %v1268_v29, %v1097_v28 }
  0x65   : > { %709 = vmatpush.bf16.msra.mxu3 %v1186_v3  ;;  %v1265_v35 = vld [vmem:[%s1684_s27 + $0xf4] sm:$0xf]  ;;  %v1091_v36 = vld [vmem:[%s1684_s27 + $0xf8] sm:$0xf0]  ;;  %v1247_v44 = vld [vmem:[%s1684_s27 + $0x64] sm:$0xf]  ;;  %v1162_v48 = vor.u32 %v1284_v32, %v1161_v30  ;;  %v1030_v49 = vor.u32 %v1249_v33, %v1027_v34 }
  0x66   : > { %668 = vmatpush.bf16.msra.mxu0 %v986_v9  ;;  %v1281_v37 = vld [vmem:[%s1684_s27 + $0x174] sm:$0xf]  ;;  %v1155_v39 = vld [vmem:[%s1684_s27 + $0x178] sm:$0xf0]  ;;  %v1019_v45 = vld [vmem:[%s1684_s27 + $0x68] sm:$0xf0]  ;;  %v1094_v54 = vor.u32 %v1265_v35, %v1091_v36 }
  0x67   : > { %682 = vmatpush.bf16.msra.mxu1 %v1050_v10  ;;  %v1297_v40 = vld [vmem:[%s1684_s27 + $0x1f4] sm:$0xf]  ;;  %v1219_v41 = vld [vmem:[%s1684_s27 + $0x1f8] sm:$0xf0]  ;;  %v961_v46 = vld [vmem:[%s1682_s26 + $0x8] sm:$0xf]  ;;  %v1158_v55 = vor.u32 %v1281_v37, %v1155_v39  ;;  %v1022_v4 = vor.u32 %v1247_v44, %v1019_v45 }
  0x68   : > { %696 = vmatpush.bf16.msra.mxu2 %v1114_v11  ;;  %v1234_v47 = vld [vmem:[%s1682_s26 + $0x14] sm:$0xf0]  ;;  %v1263_v50 = vld [vmem:[%s1684_s27 + $0xe4] sm:$0xf]  ;;  %v1083_v51 = vld [vmem:[%s1684_s27 + $0xe8] sm:$0xf0]  ;;  %v1222_v59 = vor.u32 %v1297_v40, %v1219_v41 }
  0x69   : > { %710 = vmatpush.bf16.msra.mxu3 %v1178_v15  ;;  %v1279_v52 = vld [vmem:[%s1684_s27 + $0x164] sm:$0xf]  ;;  %v1147_v53 = vld [vmem:[%s1684_s27 + $0x168] sm:$0xf0]  ;;  %v963_v57 = vld [vmem:[%s1682_s26 + $0x18] sm:$0xf0]  ;;  %v1777_v60 = vor.u32 %v1234_v47, %v961_v46  ;;  %v1086_v6 = vor.u32 %v1263_v50, %v1083_v51 }
  0x6a   : > { %669 = vmatpush.bf16.msra.mxu0 %v978_v22  ;;  %v1232_v56 = vld [vmem:[%s1682_s26 + $0xc] sm:$0xf]  ;;  %v953_v58 = vld [vmem:[%s1682_s26] sm:$0xf]  ;;  %v1233_v61 = vld [vmem:[%s1682_s26 + $0xc] sm:$0xf0]  ;;  %v1150_v7 = vor.u32 %v1279_v52, %v1147_v53 }
  0x6b   : > { %683 = vmatpush.bf16.msra.mxu1 %v1042_v26  ;;  %v1231_v62 = vld [vmem:[%s1682_s26 + $0x4] sm:$0xf]  ;;  %v955_v63 = vld [vmem:[%s1682_s26 + $0x10] sm:$0xf0]  ;;  %v1211_v1 = vld [vmem:[%s1684_s27 + $0x1e8] sm:$0xf0]  ;;  %v1784_v2 = vor.u32 %v1232_v56, %v963_v57  ;;  %v1786_v3 = vor.u32 %v1233_v61, %v953_v58 }
  0x6c   : > { %697 = vmatpush.bf16.msra.mxu2 %v1106_v27  ;;  %v1295_v0 = vld [vmem:[%s1684_s27 + $0x1e4] sm:$0xf]  ;;  %v1788_v5 = vor.u32 %v1231_v62, %v955_v63  ;;  %v1245_v8 = vld [vmem:[%s1684_s27 + $0x54] sm:$0xf]  ;;  %v1011_v9 = vld [vmem:[%s1684_s27 + $0x58] sm:$0xf0] }
  0x6d   : > { %711 = vmatpush.bf16.msra.mxu3 %v1170_v31  ;;  %v1261_v10 = vld [vmem:[%s1684_s27 + $0xd4] sm:$0xf]  ;;  %v1214_v11 = vor.u32 %v1295_v0, %v1211_v1  ;;  %v1075_v12 = vld [vmem:[%s1684_s27 + $0xd8] sm:$0xf0]  ;;  %v1014_v17 = vor.u32 %v1245_v8, %v1011_v9  ;;  %v1243_v20 = vld [vmem:[%s1684_s27 + $0x44] sm:$0xf] }
  0x6e   : > { %670 = vmatpush.bf16.msra.mxu0 %v970_v38  ;;  %v1277_v13 = vld [vmem:[%s1684_s27 + $0x154] sm:$0xf]  ;;  %v1139_v14 = vld [vmem:[%s1684_s27 + $0x158] sm:$0xf0]  ;;  %v1078_v18 = vor.u32 %v1261_v10, %v1075_v12  ;;  %v1003_v21 = vld [vmem:[%s1684_s27 + $0x48] sm:$0xf0] }
  0x6f   : > { %684 = vmatpush.bf16.msra.mxu1 %v1034_v42  ;;  %v1293_v15 = vld [vmem:[%s1684_s27 + $0x1d4] sm:$0xf]  ;;  %v1203_v16 = vld [vmem:[%s1684_s27 + $0x1d8] sm:$0xf0]  ;;  %v1142_v19 = vor.u32 %v1277_v13, %v1139_v14  ;;  %v1259_v22 = vld [vmem:[%s1684_s27 + $0xc4] sm:$0xf]  ;;  %v1006_v29 = vor.u32 %v1243_v20, %v1003_v21 }
  0x70   : > { %698 = vmatpush.bf16.msra.mxu2 %v1098_v43  ;;  %v1206_v23 = vor.u32 %v1293_v15, %v1203_v16  ;;  %v1067_v24 = vld [vmem:[%s1684_s27 + $0xc8] sm:$0xf0]  ;;  %v1275_v25 = vld [vmem:[%s1684_s27 + $0x144] sm:$0xf]  ;;  %v1241_v32 = vld [vmem:[%s1684_s27 + $0x34] sm:$0xf] }
  0x71   : > { %712 = vmatpush.bf16.msra.mxu3 %v1162_v48  ;;  %671 = vmatmul.bf16.vlgmr.msra.gmra.mxu0 %v1786_v3  ;;  %v1131_v26 = vld [vmem:[%s1684_s27 + $0x148] sm:$0xf0]  ;;  %v1291_v27 = vld [vmem:[%s1684_s27 + $0x1c4] sm:$0xf]  ;;  %v1070_v30 = vor.u32 %v1259_v22, %v1067_v24  ;;  %v995_v33 = vld [vmem:[%s1684_s27 + $0x38] sm:$0xf0] }
  0x72   : > { %719 = vmatpush.bf16.msrb.mxu0 %v1030_v49  ;;  %685 = vmatmul.bf16.vlgmr.msra.gmra.mxu1 %v1788_v5  ;;  %v1195_v28 = vld [vmem:[%s1684_s27 + $0x1c8] sm:$0xf0]  ;;  %v1134_v31 = vor.u32 %v1275_v25, %v1131_v26  ;;  %v1257_v34 = vld [vmem:[%s1684_s27 + $0xb4] sm:$0xf]  ;;  %v1059_v36 = vld [vmem:[%s1684_s27 + $0xb8] sm:$0xf0]  ;;  %v998_v41 = vor.u32 %v1241_v32, %v995_v33 }
  0x73   : > { %733 = vmatpush.bf16.msrb.mxu1 %v1094_v54  ;;  %699 = vmatmul.bf16.vlgmr.msra.gmra.mxu2 %v1777_v60  ;;  %v1198_v35 = vor.u32 %v1291_v27, %v1195_v28  ;;  %v1273_v37 = vld [vmem:[%s1684_s27 + $0x134] sm:$0xf]  ;;  %v1123_v38 = vld [vmem:[%s1684_s27 + $0x138] sm:$0xf0]  ;;  %v1062_v42 = vor.u32 %v1257_v34, %v1059_v36  ;;  %v1239_v44 = vld [vmem:[%s1684_s27 + $0x24] sm:$0xf] }
  0x74   : > { %747 = vmatpush.bf16.msrb.mxu2 %v1158_v55  ;;  %713 = vmatmul.bf16.vlgmr.msra.gmra.mxu3 %v1784_v2  ;;  %v1289_v39 = vld [vmem:[%s1684_s27 + $0x1b4] sm:$0xf]  ;;  %v1187_v40 = vld [vmem:[%s1684_s27 + $0x1b8] sm:$0xf0]  ;;  %v1126_v43 = vor.u32 %v1273_v37, %v1123_v38  ;;  %v987_v45 = vld [vmem:[%s1684_s27 + $0x28] sm:$0xf0] }
  0x75   : > { %761 = vmatpush.bf16.msrb.mxu3 %v1222_v59  ;;  %v1255_v46 = vld [vmem:[%s1684_s27 + $0xa4] sm:$0xf]  ;;  %v1190_v47 = vor.u32 %v1289_v39, %v1187_v40  ;;  %v1051_v48 = vld [vmem:[%s1684_s27 + $0xa8] sm:$0xf0]  ;;  %v990_v53 = vor.u32 %v1239_v44, %v987_v45  ;;  %v1237_v56 = vld [vmem:[%s1684_s27 + $0x14] sm:$0xf] }
  0x76   : > { %720 = vmatpush.bf16.msrb.mxu0 %v1022_v4  ;;  %v1271_v49 = vld [vmem:[%s1684_s27 + $0x124] sm:$0xf]  ;;  %v1115_v50 = vld [vmem:[%s1684_s27 + $0x128] sm:$0xf0]  ;;  %v1054_v54 = vor.u32 %v1255_v46, %v1051_v48  ;;  %v979_v57 = vld [vmem:[%s1684_s27 + $0x18] sm:$0xf0] }
  0x77   : > { %734 = vmatpush.bf16.msrb.mxu1 %v1086_v6  ;;  %v1287_v51 = vld [vmem:[%s1684_s27 + $0x1a4] sm:$0xf]  ;;  %v1179_v52 = vld [vmem:[%s1684_s27 + $0x1a8] sm:$0xf0]  ;;  %v1118_v55 = vor.u32 %v1271_v49, %v1115_v50  ;;  %v1253_v58 = vld [vmem:[%s1684_s27 + $0x94] sm:$0xf]  ;;  %v982_v4 = vor.u32 %v1237_v56, %v979_v57 }
  0x78   : > { %748 = vmatpush.bf16.msrb.mxu2 %v1150_v7  ;;  %v1182_v59 = vor.u32 %v1287_v51, %v1179_v52  ;;  %v1043_v61 = vld [vmem:[%s1684_s27 + $0x98] sm:$0xf0]  ;;  %v1269_v62 = vld [vmem:[%s1684_s27 + $0x114] sm:$0xf]  ;;  %v1235_v8 = vld [vmem:[%s1684_s27 + $0x4] sm:$0xf] }
  0x79   : > { %762 = vmatpush.bf16.msrb.mxu3 %v1214_v11  ;;  %v1107_v63 = vld [vmem:[%s1684_s27 + $0x118] sm:$0xf0]  ;;  %v1285_v0 = vld [vmem:[%s1684_s27 + $0x194] sm:$0xf]  ;;  %v1046_v6 = vor.u32 %v1253_v58, %v1043_v61  ;;  %v971_v9 = vld [vmem:[%s1684_s27 + $0x8] sm:$0xf0] }
  0x7a   : > { %721 = vmatpush.bf16.msrb.mxu0 %v1014_v17  ;;  %v1171_v1 = vld [vmem:[%s1684_s27 + $0x198] sm:$0xf0]  ;;  %v1110_v7 = vor.u32 %v1269_v62, %v1107_v63  ;;  %v1251_v10 = vld [vmem:[%s1684_s27 + $0x84] sm:$0xf]  ;;  %v1035_v12 = vld [vmem:[%s1684_s27 + $0x88] sm:$0xf0]  ;;  %v974_v17 = vor.u32 %v1235_v8, %v971_v9 }
  0x7b   : > { %735 = vmatpush.bf16.msrb.mxu1 %v1078_v18  ;;  %v1174_v11 = vor.u32 %v1285_v0, %v1171_v1  ;;  %v1267_v13 = vld [vmem:[%s1684_s27 + $0x104] sm:$0xf]  ;;  %v1099_v14 = vld [vmem:[%s1684_s27 + $0x108] sm:$0xf0]  ;;  %v1038_v18 = vor.u32 %v1251_v10, %v1035_v12  ;;  %v251_v27 = vld [vmem:[#allocation2 + $0x10] sm:$0xff]  ;;  %p1223_p7 = scmp.ne.s32.totalorder %s1512_s16, 3 }
  0x7c   : > { %749 = vmatpush.bf16.msrb.mxu2 %v1142_v19  ;;  %v1283_v15 = vld [vmem:[%s1684_s27 + $0x184] sm:$0xf]  ;;  %v1163_v16 = vld [vmem:[%s1684_s27 + $0x188] sm:$0xf0]  ;;  %v1102_v19 = vor.u32 %v1267_v13, %v1099_v14  ;;  %v253_v34 = vld [vmem:[#allocation2 + $0x18] sm:$0xff] }
  0x7d   : > { %763 = vmatpush.bf16.msrb.mxu3 %v1206_v23  ;;  %v1166_v20 = vor.u32 %v1283_v15, %v1163_v16  ;;  %v254_v49 = vld [vmem:[#allocation2 + $0x8] sm:$0xff] }
  0x7e   : > { %722 = vmatpush.bf16.msrb.mxu0 %v1006_v29 }
  0x7f   : > { %736 = vmatpush.bf16.msrb.mxu1 %v1070_v30 }
  0x80   : > { %750 = vmatpush.bf16.msrb.mxu2 %v1134_v31 }
  0x81   : > { %764 = vmatpush.bf16.msrb.mxu3 %v1198_v35 }
  0x82   : > { %723 = vmatpush.bf16.msrb.mxu0 %v998_v41  ;;  %v252_v41 = vld [vmem:[#allocation2] sm:$0xff] }
  0x83   : > { %737 = vmatpush.bf16.msrb.mxu1 %v1062_v42 }
  0x84   : > { %751 = vmatpush.bf16.msrb.mxu2 %v1126_v43 }
  0x85   : > { %765 = vmatpush.bf16.msrb.mxu3 %v1190_v47 }
  0x86   : > { %724 = vmatpush.bf16.msrb.mxu0 %v990_v53 }
  0x87   : > { %738 = vmatpush.bf16.msrb.mxu1 %v1054_v54 }
  0x88   : > { %752 = vmatpush.bf16.msrb.mxu2 %v1118_v55 }
  0x89   : > { %766 = vmatpush.bf16.msrb.mxu3 %v1182_v59 }
  0x8a   : > { %725 = vmatpush.bf16.msrb.mxu0 %v982_v4 }
  0x8b   : > { %739 = vmatpush.bf16.msrb.mxu1 %v1046_v6 }
  0x8c   : > { %753 = vmatpush.bf16.msrb.mxu2 %v1110_v7 }
  0x8d   : > { %767 = vmatpush.bf16.msrb.mxu3 %v1174_v11 }
  0x8e   : > { %726 = vmatpush.bf16.msrb.mxu0 %v974_v17 }
  0x8f   : > { %740 = vmatpush.bf16.msrb.mxu1 %v1038_v18 }
  0x90   : > { %754 = vmatpush.bf16.msrb.mxu2 %v1102_v19 }
  0x91   : > { %768 = vmatpush.bf16.msrb.mxu3 %v1166_v20  ;;  %727 = vmatmul.bf16.vlgmr.msrb.gmra.mxu0 %v1786_v3 }
  0x92   : > { %741 = vmatmul.bf16.vlgmr.msrb.gmra.mxu1 %v1788_v5 }
  0x93   : > { %755 = vmatmul.bf16.vlgmr.msrb.gmra.mxu2 %v1777_v60 }
  0x94   : > { %769 = vmatmul.bf16.vlgmr.msrb.gmra.mxu3 %v1784_v2 }
  0xee   : > { %v672_v21 = vpop.f32.mrf.mxu0 }
  0xef   : > { %v686_v22 = vpop.f32.mrf.mxu1 }
  0xf0   : > { %v687_v23 = vadd.f32 %v686_v22, %v672_v21 }
  0xf6   : > { %v700_v24 = vpop.f32.mrf.mxu2  ;;  %v674_v29 = vpop.f32.mrf.mxu0 }
  0xf7   : > { %v701_v25 = vadd.f32 %v700_v24, %v687_v23  ;;  %v714_v26 = vpop.f32.mrf.mxu3  ;;  %v688_v30 = vpop.f32.mrf.mxu1 }
  0xf8   : > { %v689_v32 = vadd.f32 %v688_v30, %v674_v29 }
  0xf9   : > { %v715_v28 = vadd.f32 %v714_v26, %v701_v25 }
  0xfb   : > { %v775_v31 = vadd.f32 %v715_v28, %v251_v27 }
  0xfd   : > { %779 = vst [vmem:[#allocation2 + $0x10] sm:$0xff] %v775_v31 }
  0xfe   : > { %v702_v3 = vpop.f32.mrf.mxu2 }
  0xff   : > { %v703_v33 = vadd.f32 %v702_v3, %v689_v32  ;;  %v716_v5 = vpop.f32.mrf.mxu3 }
 0x101   : > { %v717_v60 = vadd.f32 %v716_v5, %v703_v33 }
 0x103   : > { %v777_v35 = vadd.f32 %v717_v60, %v253_v34 }
 0x105   : > { %781 = vst [vmem:[#allocation2 + $0x18] sm:$0xff] %v777_v35 }
 0x10e   : > { %v728_v2 = vpop.f32.mrf.mxu0 }
 0x10f   : > { %v742_v36 = vpop.f32.mrf.mxu1 }
 0x110   : > { %v743_v37 = vadd.f32 %v742_v36, %v728_v2 }
 0x116   : > { %v756_v38 = vpop.f32.mrf.mxu2  ;;  %v730_v43 = vpop.f32.mrf.mxu0 }
 0x117   : > { %v757_v39 = vadd.f32 %v756_v38, %v743_v37  ;;  %v770_v40 = vpop.f32.mrf.mxu3  ;;  %v744_v44 = vpop.f32.mrf.mxu1 }
 0x118   : > { %v745_v46 = vadd.f32 %v744_v44, %v730_v43 }
 0x119   : > { %v771_v42 = vadd.f32 %v770_v40, %v757_v39 }
 0x11b   : > { %v776_v45 = vadd.f32 %v771_v42, %v252_v41 }
 0x11d   : > { %780 = vst [vmem:[#allocation2] sm:$0xff] %v776_v45 }
 0x11e   : > { %v758_v47 = vpop.f32.mrf.mxu2 }
 0x11f   : > { %v759_v48 = vadd.f32 %v758_v47, %v745_v46  ;;  %v772_v50 = vpop.f32.mrf.mxu3 }
 0x121   : > { %v773_v51 = vadd.f32 %v772_v50, %v759_v48  ;;  %786 = sbr.rel (%p1223_p7) target bundleno = 302 (0x12e), region = 63 }
 0x123   : > { %v778_v52 = vadd.f32 %v773_v51, %v254_v49 }
 0x125   : > { %782 = vst [vmem:[#allocation2 + $0x8] sm:$0xff] %v778_v52 }
 0x126   : > { %v787_v53 = vld [vmem:[#allocation2 + $0x10] sm:$0xff]  ;;  %v788_v54 = vld [vmem:[#allocation2] sm:$0xff]  ;;  %v789_v55 = vld [vmem:[#allocation2 + $0x18] sm:$0xff] }
 0x127   : > { %791 = vst [vmem:[%s1691_s3] sm:$0xff] %v787_v53 }
 0x128   : > { %792 = vst [vmem:[%s1691_s3 + $0x8] sm:$0xff] %v788_v54 }
 0x129   : > { %793 = vst [vmem:[%s1691_s3 + $0x10] sm:$0xff] %v789_v55 }
 0x12c   : > { %v790_v56 = vld [vmem:[#allocation2 + $0x8] sm:$0xff] }
 0x12d   : > { %794 = vst [vmem:[%s1691_s3 + $0x18] sm:$0xff] %v790_v56 }
 0x12e PF: > { %801 = sbr.rel (!%p1658_p1) target bundleno = 310 (0x136), region = 67  ;;  %s1299_s9 = sshll.u32 (%p1658_p1), %s1516_s17, 4  ;;  %v820_v57 = vld [vmem:[%s1691_s3] sm:$0xff] (%p1658_p1) }
 0x12f   : > { %v822_v58 = vld [vmem:[%s1691_s3 + $0x8] sm:$0xff] (%p1658_p1)  ;;  %s807_s4 = scalar_lea.vmem (%p1658_p1), %s1899_s2, %s1299_s9 }
 0x130   : > { %v824_v59 = vld [vmem:[%s1691_s3 + $0x10] sm:$0xff] (%p1658_p1)  ;;  %821 = vst [vmem:[%s807_s4] sm:$0xff] (%p1658_p1), %v820_v57 }
 0x131   : > { %823 = vst [vmem:[%s807_s4 + $0x8] sm:$0xff] (%p1658_p1), %v822_v58 }
 0x132   : > { %825 = vst [vmem:[%s807_s4 + $0x80] sm:$0xff] (%p1658_p1), %v824_v59 }
 0x134   : > { %v826_v61 = vld [vmem:[%s1691_s3 + $0x18] sm:$0xff] }
 0x135   : > { %827 = vst [vmem:[%s807_s4 + $0x88] sm:$0xff] %v826_v61 }
 0x136 PF: > { %s15_s20 = sadd.s32 1, %s1528_s20   ;;  %s1915_s5 = sld [smem:[#allocation13_spill]] }
 0x137   : > { %p12_p8 = scmp.ge.s32.totalorder %s15_s20, 34   ;;  %s1916_s17 = sld [smem:[#allocation12_spill]] }
 0x138   : > { %s1917_s14 = sld [smem:[#allocation8_spill]]  ;;  %s1921_s9 = smov %s1488_s10 }
 0x139   : > { %s1918_s15 = sld [smem:[#allocation11_spill]]  ;;  %s1923_s11 = smov %s1496_s12 }
 0x13a   : > { %s1919_s7 = sld [smem:[#allocation9_spill]]  ;;  %s1924_s12 = smov %s1500_s13 }
 0x13b   : > { %s1920_s8 = sld [smem:[#allocation10_spill]]  ;;  %s1926_s16 = smov %s1520_s18 }
 0x13c   : > { %s1922_s10 = smov %s1915_s5 }
 0x13d   : > { %s1925_s13 = smov %s1916_s17  ;;  %s1927_s17 = smov %s1524_s19 }
 0x13e   :  { %14 = sbr.rel (!%p12_p8) target bundleno = 9 (0x9), region = 130 }
 0x140   : > { %s1928_s18 = smov %s1919_s7 }
 0x141   : > { %s1929_s19 = smov %s1920_s8 }
 0x143   :  { %843 = vsyncpa [#allocation5], 1 }
 0x144   :  { %845 = vsyncpa [#allocation5 + $0x1], 1 }

// kernel: _lambda_.34
= control target key start
LH: loop header
LB: loop body
LE: loop exit
PB: predicated region body
PF: predicated region fallthrough
CT: control target
= control target key end

     0   :  { %s987_s9 = smov 0   ;;  %s989_s10 = smov 0   ;;  %s1104_s0 = inlined_call_operand.vmem [shape: bf16[16,6144], index: 0, kind: input, shape index: {}]   ;;  %s1105_s1 = inlined_call_operand.vmem [shape: bf16[6144,128], index: 1, kind: input, shape index: {}]   ;;  %s1106_s2 = inlined_call_operand.vmem [shape: f32[16,128], index: 2, kind: output, shape index: {}]  }
   0x1   :  { %s991_s11 = smov 0   ;;  %s993_s12 = smov 0  }
   0x2   :  { %s995_s13 = smov 0  }
   0x3 LB: > { %s24_s14 = sadd.s32 1, %s965_s12  ;;  %p47_p1 = scmp.ne.s32.totalorder %s957_s10, %s953_s9  ;;  %s969_s13 = sphi %s995_s13, %s12_s13   ;;  %s965_s12 = sphi %s993_s12, %s1110_s12   ;;  %s961_s11 = sphi %s991_s11, %s1109_s11   ;;  %s957_s10 = sphi %s989_s10, %s1108_s10   ;;  %s953_s9 = sphi %s987_s9, %s1107_s9  }
   0x4   : > { %p25_p0 = scmp.ge.s32.totalorder %s24_s14, 12  ;;  %p48_p2 = scmp.eq.s32.totalorder %s969_s13, 0 }
   0x5   : > { %s40_s16 = sadd.s32 1, %s957_s10  ;;  %p695_p5 = scmp.ge.s32.totalorder %s969_s13, 12 }
   0x6   : > { %s1112_s14 = smov (%p25_p0, %s24_s14), 0  ;;  %p49_p3 = por %p48_p2, %p47_p1 }
   0x7   : > { %s36_s15 = ssub.s32 %s965_s12, %s1112_s14  ;;  %129 = sbr.rel (%p695_p5) target bundleno = 20 (0x14), region = 16 }
   0x8   : > { %p38_p4 = scmp.eq.s32.totalorder %s36_s15, 0 }
   0xa   : > { %s1022_s17 = scalar_select %p38_p4, %s957_s10, %s40_s16  }
   0xc   : > { %132 = sbr.rel (!%p49_p3) target bundleno = 20 (0x14), region = 20  ;;  %s134_s18 = sand.u32 (%p49_p3), 1, %s957_s10  }
   0xd   : > { %s853_s19 = sshll.u32 (%p49_p3), %s965_s12, 4  ;;  %s696_s20 = sshll.u32 (%p49_p3), %s134_s18, 5 }
   0xe   : > { %s142_s23 = scalar_lea.vmem (%p49_p3), %s1104_s0, %s853_s19  ;;  %s136_s24 = scalar_lea.vmem (%p49_p3), [#allocation3], %s696_s20 }
   0xf   : > { %v155_v0 = vld [vmem:[%s142_s23] sm:$0xff] (%p49_p3)  ;;  %v157_v1 = vld [vmem:[%s142_s23 + $0x8] sm:$0xff] (%p49_p3) }
  0x10   : > { %v159_v2 = vld [vmem:[%s142_s23 + $0xc0] sm:$0xff] (%p49_p3)  ;;  %156 = vst [vmem:[%s136_s24] sm:$0xff] (%p49_p3), %v155_v0  ;;  %v161_v3 = vld [vmem:[%s142_s23 + $0xc8] sm:$0xff] (%p49_p3) }
  0x11   : > { %158 = vst [vmem:[%s136_s24 + $0x8] sm:$0xff] %v157_v1 }
  0x12   : > { %160 = vst [vmem:[%s136_s24 + $0x10] sm:$0xff] %v159_v2 }
  0x13   : > { %162 = vst [vmem:[%s136_s24 + $0x18] sm:$0xff] %v161_v3 }
  0x14 PF: > { %p699_p6 = scmp.ge.s32.totalorder %s969_s13, 1  ;;  %p179_p7 = scmp.lt.s32.totalorder %s969_s13, 13 }
  0x16   : > { %p180_p8 = pnand %p699_p6, %p179_p7 }
  0x17   : > { %s186_s25 = sand.u32 (!%p180_p8), 1, %s953_s9   ;;  %s701_s26 = sshll.u32 (!%p180_p8), %s961_s11, 6 }
  0x18   : > { %183 = sbr.rel (%p180_p8) target bundleno = 226 (0xe2), region = 47  ;;  %s700_s27 = sshll.u32 (!%p180_p8), %s186_s25, 5 }
  0x19   : > { %p221_p9 = scmp.lt.s32.totalorder (!%p180_p8), %s701_s26, 767  ;;  %s1039_s4 = scalar_lea.vmem (!%p180_p8), [#allocation3], %s700_s27 }
  0x1a   : > { %p703_p10 = scmp.ne.s32.totalorder (!%p180_p8), %s961_s11, 0 }
  0x1d   : > { %s1114_s26 = smov (!%p221_p9, %s701_s26), 767  ;;  %241 = sbr.rel (%p703_p10) target bundleno = 37 (0x25), region = 55 }
  0x1e   : > { %s702_s28 = sshll.u32 %s1114_s26, 2 }
  0x1f   : > { %s1037_s3 = scalar_lea.vmem %s1105_s1, %s702_s28 }
  0x22   : > { %v971_v4 = vmov 0.0  }
  0x23   : > { %242 = vst [vmem:[#allocation2] sm:$0xff] %v971_v4 }
  0x24   : > { %243 = vst [vmem:[#allocation2 + $0x8] sm:$0xff] %v971_v4 }
  0x25 PF: > { %v865_v5 = vld [vmem:[%s1037_s3 + $0x38] sm:$0xff]  ;;  %v864_v9 = vld [vmem:[%s1037_s3 + $0x30] sm:$0xff]  ;;  %v863_v13 = vld [vmem:[%s1037_s3 + $0x28] sm:$0xff]  ;;  %p848_p11 = scmp.ne.s32.totalorder %s961_s11, 11 }
  0x26   : > { %v873_v6 = vld [vmem:[%s1037_s3 + $0x78] sm:$0xff]  ;;  %526 = vmatpush.bf16.msra.mxu0 %v865_v5  ;;  %v872_v10 = vld [vmem:[%s1037_s3 + $0x70] sm:$0xff]  ;;  %v871_v14 = vld [vmem:[%s1037_s3 + $0x68] sm:$0xff] }
  0x27   : > { %v881_v7 = vld [vmem:[%s1037_s3 + $0xb8] sm:$0xff]  ;;  %540 = vmatpush.bf16.msra.mxu1 %v873_v6  ;;  %v880_v11 = vld [vmem:[%s1037_s3 + $0xb0] sm:$0xff]  ;;  %v879_v15 = vld [vmem:[%s1037_s3 + $0xa8] sm:$0xff] }
  0x28   : > { %v889_v8 = vld [vmem:[%s1037_s3 + $0xf8] sm:$0xff]  ;;  %554 = vmatpush.bf16.msra.mxu2 %v881_v7  ;;  %v888_v12 = vld [vmem:[%s1037_s3 + $0xf0] sm:$0xff]  ;;  %v887_v16 = vld [vmem:[%s1037_s3 + $0xe8] sm:$0xff] }
  0x29   : > { %568 = vmatpush.bf16.msra.mxu3 %v889_v8  ;;  %v862_v17 = vld [vmem:[%s1037_s3 + $0x20] sm:$0xff]  ;;  %v861_v21 = vld [vmem:[%s1037_s3 + $0x18] sm:$0xff]  ;;  %v860_v25 = vld [vmem:[%s1037_s3 + $0x10] sm:$0xff] }
  0x2a   : > { %527 = vmatpush.bf16.msra.mxu0 %v864_v9  ;;  %v870_v18 = vld [vmem:[%s1037_s3 + $0x60] sm:$0xff]  ;;  %v869_v22 = vld [vmem:[%s1037_s3 + $0x58] sm:$0xff]  ;;  %v868_v26 = vld [vmem:[%s1037_s3 + $0x50] sm:$0xff] }
  0x2b   : > { %541 = vmatpush.bf16.msra.mxu1 %v872_v10  ;;  %v878_v19 = vld [vmem:[%s1037_s3 + $0xa0] sm:$0xff]  ;;  %v877_v23 = vld [vmem:[%s1037_s3 + $0x98] sm:$0xff]  ;;  %v876_v27 = vld [vmem:[%s1037_s3 + $0x90] sm:$0xff] }
  0x2c   : > { %555 = vmatpush.bf16.msra.mxu2 %v880_v11  ;;  %v886_v20 = vld [vmem:[%s1037_s3 + $0xe0] sm:$0xff]  ;;  %v885_v24 = vld [vmem:[%s1037_s3 + $0xd8] sm:$0xff]  ;;  %v884_v28 = vld [vmem:[%s1037_s3 + $0xd0] sm:$0xff] }
  0x2d   : > { %569 = vmatpush.bf16.msra.mxu3 %v888_v12  ;;  %v859_v29 = vld [vmem:[%s1037_s3 + $0x8] sm:$0xff]  ;;  %v858_v33 = vld [vmem:[%s1037_s3] sm:$0xff]  ;;  %v706_v37 = vld [vmem:[%s1039_s4] sm:$0xf] }
  0x2e   : > { %528 = vmatpush.bf16.msra.mxu0 %v863_v13  ;;  %v867_v30 = vld [vmem:[%s1037_s3 + $0x48] sm:$0xff]  ;;  %v866_v34 = vld [vmem:[%s1037_s3 + $0x40] sm:$0xff]  ;;  %v854_v39 = vld [vmem:[%s1039_s4 + $0x4] sm:$0xf] }
  0x2f   : > { %542 = vmatpush.bf16.msra.mxu1 %v871_v14  ;;  %v875_v31 = vld [vmem:[%s1037_s3 + $0x88] sm:$0xff]  ;;  %v874_v35 = vld [vmem:[%s1037_s3 + $0x80] sm:$0xff]  ;;  %v714_v41 = vld [vmem:[%s1039_s4 + $0x8] sm:$0xf] }
  0x30   : > { %556 = vmatpush.bf16.msra.mxu2 %v879_v15  ;;  %v883_v32 = vld [vmem:[%s1037_s3 + $0xc8] sm:$0xff]  ;;  %v882_v36 = vld [vmem:[%s1037_s3 + $0xc0] sm:$0xff]  ;;  %v855_v43 = vld [vmem:[%s1039_s4 + $0xc] sm:$0xf] }
  0x31   : > { %570 = vmatpush.bf16.msra.mxu3 %v887_v16  ;;  %v856_v38 = vld [vmem:[%s1039_s4 + $0xc] sm:$0xf0]  ;;  %v708_v40 = vld [vmem:[%s1039_s4 + $0x10] sm:$0xf0]  ;;  %v857_v42 = vld [vmem:[%s1039_s4 + $0x14] sm:$0xf0] }
  0x32   : > { %529 = vmatpush.bf16.msra.mxu0 %v862_v17  ;;  %v716_v44 = vld [vmem:[%s1039_s4 + $0x18] sm:$0xf0]  ;;  %v707_v45 = vor.u32 %v856_v38, %v706_v37  ;;  %v711_v46 = vor.u32 %v854_v39, %v708_v40  ;;  %v715_v47 = vor.u32 %v857_v42, %v714_v41  ;;  %v244_v55 = vld [vmem:[#allocation2] sm:$0xff] }
  0x33   : > { %543 = vmatpush.bf16.msra.mxu1 %v870_v18  ;;  %v719_v48 = vor.u32 %v855_v43, %v716_v44  ;;  %v245_v63 = vld [vmem:[#allocation2 + $0x8] sm:$0xff] }
  0x34   : > { %557 = vmatpush.bf16.msra.mxu2 %v878_v19 }
  0x35   : > { %571 = vmatpush.bf16.msra.mxu3 %v886_v20 }
  0x36   : > { %530 = vmatpush.bf16.msra.mxu0 %v861_v21 }
  0x37   : > { %544 = vmatpush.bf16.msra.mxu1 %v869_v22 }
  0x38   : > { %558 = vmatpush.bf16.msra.mxu2 %v877_v23 }
  0x39   : > { %572 = vmatpush.bf16.msra.mxu3 %v885_v24 }
  0x3a   : > { %531 = vmatpush.bf16.msra.mxu0 %v860_v25 }
  0x3b   : > { %545 = vmatpush.bf16.msra.mxu1 %v868_v26 }
  0x3c   : > { %559 = vmatpush.bf16.msra.mxu2 %v876_v27 }
  0x3d   : > { %573 = vmatpush.bf16.msra.mxu3 %v884_v28 }
  0x3e   : > { %532 = vmatpush.bf16.msra.mxu0 %v859_v29 }
  0x3f   : > { %546 = vmatpush.bf16.msra.mxu1 %v867_v30 }
  0x40   : > { %560 = vmatpush.bf16.msra.mxu2 %v875_v31 }
  0x41   : > { %574 = vmatpush.bf16.msra.mxu3 %v883_v32 }
  0x42   : > { %533 = vmatpush.bf16.msra.mxu0 %v858_v33 }
  0x43   : > { %547 = vmatpush.bf16.msra.mxu1 %v866_v34 }
  0x44   : > { %561 = vmatpush.bf16.msra.mxu2 %v874_v35 }
  0x45   : > { %575 = vmatpush.bf16.msra.mxu3 %v882_v36  ;;  %534 = vmatmul.bf16.vlgmr.msra.gmra.mxu0 %v707_v45 }
  0x46   : > { %548 = vmatmul.bf16.vlgmr.msra.gmra.mxu1 %v711_v46 }
  0x47   : > { %562 = vmatmul.bf16.vlgmr.msra.gmra.mxu2 %v715_v47 }
  0x48   : > { %576 = vmatmul.bf16.vlgmr.msra.gmra.mxu3 %v719_v48 }
  0xc2   : > { %v535_v49 = vpop.f32.mrf.mxu0 }
  0xc3   : > { %v549_v50 = vpop.f32.mrf.mxu1 }
  0xc4   : > { %v550_v51 = vadd.f32 %v549_v50, %v535_v49 }
  0xca   : > { %v563_v52 = vpop.f32.mrf.mxu2  ;;  %v537_v57 = vpop.f32.mrf.mxu0 }
  0xcb   : > { %v577_v53 = vpop.f32.mrf.mxu3  ;;  %v564_v54 = vadd.f32 %v563_v52, %v550_v51  ;;  %v551_v58 = vpop.f32.mrf.mxu1 }
  0xcc   : > { %v552_v60 = vadd.f32 %v551_v58, %v537_v57 }
  0xcd   : > { %v578_v56 = vadd.f32 %v577_v53, %v564_v54 }
  0xcf   : > { %v582_v59 = vadd.f32 %v578_v56, %v244_v55 }
  0xd1   : > { %584 = vst [vmem:[#allocation2] sm:$0xff] %v582_v59 }
  0xd2   : > { %v565_v61 = vpop.f32.mrf.mxu2 }
  0xd3   : > { %v566_v62 = vadd.f32 %v565_v61, %v552_v60  ;;  %v579_v0 = vpop.f32.mrf.mxu3 }
  0xd5   : > { %v580_v1 = vadd.f32 %v579_v0, %v566_v62  ;;  %589 = sbr.rel (%p848_p11) target bundleno = 226 (0xe2), region = 59 }
  0xd7   : > { %v583_v2 = vadd.f32 %v580_v1, %v245_v63 }
  0xd9   : > { %585 = vst [vmem:[#allocation2 + $0x8] sm:$0xff] %v583_v2 }
  0xda   : > { %v590_v3 = vld [vmem:[#allocation2] sm:$0xff] }
  0xdb   : > { %592 = vst [vmem:[%s1106_s2] sm:$0xff] %v590_v3 }
  0xe0   : > { %v591_v4 = vld [vmem:[#allocation2 + $0x8] sm:$0xff] }
  0xe1   : > { %593 = vst [vmem:[%s1106_s2 + $0x8] sm:$0xff] %v591_v4 }
  0xe2 PF: > { %s12_s13 = sadd.s32 1, %s969_s13   ;;  %s1107_s9 = smov %s957_s10 }
  0xe3   : > { %p9_p12 = scmp.ge.s32.totalorder %s12_s13, 14   ;;  %s1108_s10 = smov %s1022_s17 }
  0xe4   : > { %s1109_s11 = smov %s965_s12  ;;  %s1110_s12 = smov %s1112_s14 }
  0xe5   :  { %11 = sbr.rel (!%p9_p12) target bundleno = 3 (0x3), region = 97 }

// kernel: _lambda_.35
= control target key start
LH: loop header
LB: loop body
LE: loop exit
PB: predicated region body
PF: predicated region fallthrough
CT: control target
= control target key end

     0   :  { %7 = vsyncpa [#allocation3], 0  ;;  %s452_s12 = smov [#allocation2]   ;;  %s453_s14 = smov 64   ;;  %s497_s0 = inlined_call_operand.vmem [shape: bf16[16,384], index: 0, kind: input, shape index: {}]   ;;  %s498_s1 = inlined_call_operand.hbm [shape: bf16[384,128], index: 1, kind: input, shape index: {}]   ;;  %s499_s2 = inlined_call_operand.vmem [shape: f32[16,128], index: 2, kind: output, shape index: {}]  }
   0x1   :  { %s14_s11 = sshll.u32 %s498_s1, 4  ;;  %s16_s13 = sshll.u32 %s452_s12, 4  ;;  %s15_s11 = int_to_ptr.hbm [resolvable:$true] %s14_s11  ;;  %s17_s13 = int_to_ptr.vmem [resolvable:$true] %s16_s13 }
   0x2   :  { %s454_s15 = smov 4  }
   0x3   :  { %22 = dma.hbm_to_vmem [thread:$0]  %s15_s11, 3072, %s17_s13, [#allocation3], %s453_s14, %s453_s14, %s454_s15  }
   0x4   :  { %450 = dma.done.wait [#allocation3], 3072  }
   0x5   :  { %451 = vsyncadd [#allocation3], 4294964224  ;;  %v406_v0 = vld [vmem:[#allocation2 + $0x38] sm:$0xff]  ;;  %v405_v3 = vld [vmem:[#allocation2 + $0x30] sm:$0xff] }
   0x6   :  { %v414_v1 = vld [vmem:[#allocation2 + $0x78] sm:$0xff]  ;;  %239 = vmatpush.bf16.msra.mxu0 %v406_v0  ;;  %v413_v4 = vld [vmem:[#allocation2 + $0x70] sm:$0xff]  ;;  %v404_v6 = vld [vmem:[#allocation2 + $0x28] sm:$0xff] }
   0x7   :  { %v422_v2 = vld [vmem:[#allocation2 + $0xb8] sm:$0xff]  ;;  %253 = vmatpush.bf16.msra.mxu1 %v414_v1  ;;  %v421_v5 = vld [vmem:[#allocation2 + $0xb0] sm:$0xff]  ;;  %v412_v7 = vld [vmem:[#allocation2 + $0x68] sm:$0xff] }
   0x8   :  { %267 = vmatpush.bf16.msra.mxu2 %v422_v2  ;;  %v420_v8 = vld [vmem:[#allocation2 + $0xa8] sm:$0xff]  ;;  %v403_v9 = vld [vmem:[#allocation2 + $0x20] sm:$0xff]  ;;  %v402_v12 = vld [vmem:[#allocation2 + $0x18] sm:$0xff] }
   0x9   :  { %v411_v10 = vld [vmem:[#allocation2 + $0x60] sm:$0xff]  ;;  %v410_v13 = vld [vmem:[#allocation2 + $0x58] sm:$0xff]  ;;  %v401_v15 = vld [vmem:[#allocation2 + $0x10] sm:$0xff] }
   0xa   :  { %240 = vmatpush.bf16.msra.mxu0 %v405_v3  ;;  %v419_v11 = vld [vmem:[#allocation2 + $0xa0] sm:$0xff]  ;;  %v418_v14 = vld [vmem:[#allocation2 + $0x98] sm:$0xff]  ;;  %v409_v16 = vld [vmem:[#allocation2 + $0x50] sm:$0xff] }
   0xb   :  { %254 = vmatpush.bf16.msra.mxu1 %v413_v4  ;;  %v417_v17 = vld [vmem:[#allocation2 + $0x90] sm:$0xff]  ;;  %v400_v18 = vld [vmem:[#allocation2 + $0x8] sm:$0xff]  ;;  %v399_v21 = vld [vmem:[#allocation2] sm:$0xff] }
   0xc   :  { %268 = vmatpush.bf16.msra.mxu2 %v421_v5  ;;  %v408_v19 = vld [vmem:[#allocation2 + $0x48] sm:$0xff]  ;;  %v407_v22 = vld [vmem:[#allocation2 + $0x40] sm:$0xff]  ;;  %v292_v26 = vld [vmem:[%s497_s0 + $0xc] sm:$0xf0] }
   0xd   :  { %v416_v20 = vld [vmem:[#allocation2 + $0x88] sm:$0xff]  ;;  %v290_v23 = vld [vmem:[%s497_s0] sm:$0xf]  ;;  %v396_v25 = vld [vmem:[%s497_s0 + $0x4] sm:$0xf] }
   0xe   :  { %241 = vmatpush.bf16.msra.mxu0 %v404_v6  ;;  %v397_v24 = vld [vmem:[%s497_s0 + $0x8] sm:$0xf0]  ;;  %v415_v27 = vld [vmem:[#allocation2 + $0x80] sm:$0xff]  ;;  %v298_v28 = vld [vmem:[%s497_s0 + $0x8] sm:$0xf]  ;;  %v295_v31 = vor.u32 %v396_v25, %v292_v26 }
   0xf   :  { %255 = vmatpush.bf16.msra.mxu1 %v412_v7  ;;  %v398_v29 = vld [vmem:[%s497_s0 + $0x10] sm:$0xf0]  ;;  %v291_v30 = vor.u32 %v397_v24, %v290_v23 }
  0x10   :  { %269 = vmatpush.bf16.msra.mxu2 %v420_v8  ;;  %v299_v32 = vor.u32 %v398_v29, %v298_v28 }
  0x12   :  { %242 = vmatpush.bf16.msra.mxu0 %v403_v9 }
  0x13   :  { %256 = vmatpush.bf16.msra.mxu1 %v411_v10 }
  0x14   :  { %270 = vmatpush.bf16.msra.mxu2 %v419_v11 }
  0x16   :  { %243 = vmatpush.bf16.msra.mxu0 %v402_v12 }
  0x17   :  { %257 = vmatpush.bf16.msra.mxu1 %v410_v13 }
  0x18   :  { %271 = vmatpush.bf16.msra.mxu2 %v418_v14 }
  0x1a   :  { %244 = vmatpush.bf16.msra.mxu0 %v401_v15 }
  0x1b   :  { %258 = vmatpush.bf16.msra.mxu1 %v409_v16 }
  0x1c   :  { %272 = vmatpush.bf16.msra.mxu2 %v417_v17 }
  0x1e   :  { %245 = vmatpush.bf16.msra.mxu0 %v400_v18 }
  0x1f   :  { %259 = vmatpush.bf16.msra.mxu1 %v408_v19 }
  0x20   :  { %273 = vmatpush.bf16.msra.mxu2 %v416_v20 }
  0x22   :  { %246 = vmatpush.bf16.msra.mxu0 %v399_v21 }
  0x23   :  { %260 = vmatpush.bf16.msra.mxu1 %v407_v22 }
  0x24   :  { %274 = vmatpush.bf16.msra.mxu2 %v415_v27 }
  0x25   :  { %247 = vmatmul.bf16.vlgmr.msra.gmra.mxu0 %v291_v30 }
  0x26   :  { %261 = vmatmul.bf16.vlgmr.msra.gmra.mxu1 %v295_v31 }
  0x27   :  { %275 = vmatmul.bf16.vlgmr.msra.gmra.mxu2 %v299_v32 }
  0xa2   :  { %v248_v33 = vpop.f32.mrf.mxu0 }
  0xa3   :  { %v262_v34 = vpop.f32.mrf.mxu1 }
  0xa4   :  { %v263_v35 = vadd.f32 %v262_v34, %v248_v33 }
  0xaa   :  { %v276_v36 = vpop.f32.mrf.mxu2  ;;  %v250_v38 = vpop.f32.mrf.mxu0 }
  0xab   :  { %v277_v37 = vadd.f32 %v276_v36, %v263_v35  ;;  %v264_v39 = vpop.f32.mrf.mxu1 }
  0xac   :  { %v265_v40 = vadd.f32 %v264_v39, %v250_v38 }
  0xad   :  { %281 = vst [vmem:[%s499_s2] sm:$0xff] %v277_v37 }
  0xb2   :  { %v278_v41 = vpop.f32.mrf.mxu2 }
  0xb3   :  { %v279_v42 = vadd.f32 %v278_v41, %v265_v40 }
  0xb5   :  { %282 = vst [vmem:[%s499_s2 + $0x8] sm:$0xff] %v279_v42 }
  0xb6   :  { %287 = vsyncpa [#allocation3], 1 }

// kernel: _lambda_.36
= control target key start
LH: loop header
LB: loop body
LE: loop exit
PB: predicated region body
PF: predicated region fallthrough
CT: control target
= control target key end

     0   :  { %7 = vsyncpa [#allocation3], 0  ;;  %s194_s12 = smov [#allocation2]   ;;  %s195_s14 = smov 64   ;;  %s224_s0 = inlined_call_operand.vmem [shape: bf16[16,128], index: 0, kind: input, shape index: {}]   ;;  %s225_s1 = inlined_call_operand.hbm [shape: bf16[128,128], index: 1, kind: input, shape index: {}]   ;;  %s226_s2 = inlined_call_operand.vmem [shape: f32[16,128], index: 2, kind: output, shape index: {}]  }
   0x1   :  { %s14_s11 = sshll.u32 %s225_s1, 4  ;;  %s16_s13 = sshll.u32 %s194_s12, 4  ;;  %s15_s11 = int_to_ptr.hbm [resolvable:$true] %s14_s11  ;;  %s17_s13 = int_to_ptr.vmem [resolvable:$true] %s16_s13 }
   0x2   :  { %s196_s15 = smov 4  }
   0x3   :  { %22 = dma.hbm_to_vmem [thread:$0]  %s15_s11, 1024, %s17_s13, [#allocation3], %s195_s14, %s195_s14, %s196_s15  }
   0x4   :  { %192 = dma.done.wait [#allocation3], 1024  }
   0x5   :  { %193 = vsyncadd [#allocation3], 4294966272  ;;  %v164_v0 = vld [vmem:[#allocation2 + $0x38] sm:$0xff]  ;;  %v163_v1 = vld [vmem:[#allocation2 + $0x30] sm:$0xff] }
   0x6   :  { %99 = vmatpush.bf16.msra.mxu0 %v164_v0  ;;  %v162_v2 = vld [vmem:[#allocation2 + $0x28] sm:$0xff]  ;;  %v161_v3 = vld [vmem:[#allocation2 + $0x20] sm:$0xff]  ;;  %v160_v4 = vld [vmem:[#allocation2 + $0x18] sm:$0xff] }
   0x7   :  { %v159_v5 = vld [vmem:[#allocation2 + $0x10] sm:$0xff]  ;;  %v158_v6 = vld [vmem:[#allocation2 + $0x8] sm:$0xff]  ;;  %v157_v7 = vld [vmem:[#allocation2] sm:$0xff] }
   0x8   :  { %v156_v8 = vld [vmem:[%s224_s0] sm:$0xff] }
   0xa   :  { %100 = vmatpush.bf16.msra.mxu0 %v163_v1 }
   0xe   :  { %101 = vmatpush.bf16.msra.mxu0 %v162_v2 }
  0x12   :  { %102 = vmatpush.bf16.msra.mxu0 %v161_v3 }
  0x16   :  { %103 = vmatpush.bf16.msra.mxu0 %v160_v4 }
  0x1a   :  { %104 = vmatpush.bf16.msra.mxu0 %v159_v5 }
  0x1e   :  { %105 = vmatpush.bf16.msra.mxu0 %v158_v6 }
  0x22   :  { %106 = vmatpush.bf16.msra.mxu0 %v157_v7 }
  0x25   :  { %107 = vmatmul.bf16.vlgmr.msra.gmra.mxu0 %v156_v8 }
  0xa2   :  { %v108_v9 = vpop.f32.mrf.mxu0 }
  0xa3   :  { %113 = vst [vmem:[%s226_s2] sm:$0xff] %v108_v9 }
  0xaa   :  { %v110_v10 = vpop.f32.mrf.mxu0 }
  0xab   :  { %114 = vst [vmem:[%s226_s2 + $0x8] sm:$0xff] %v110_v10 }
  0xac   :  { %119 = vsyncpa [#allocation3], 1 }

// kernel: _lambda_.45
= control target key start
LH: loop header
LB: loop body
LE: loop exit
PB: predicated region body
PF: predicated region fallthrough
CT: control target
= control target key end

     0   :  { %7 = vsyncpa [#allocation3], 0  ;;  %s733_s0 = inlined_call_operand.vmem [shape: bf16[16,128], index: 0, kind: input, shape index: {}]   ;;  %s734_s1 = inlined_call_operand.hbm [shape: bf16[128,384], index: 1, kind: input, shape index: {}]   ;;  %s735_s2 = inlined_call_operand.vmem [shape: f32[16,384], index: 2, kind: output, shape index: {}]  }
   0x1   :  { %9 = vsyncpa [#allocation3 + $0x1], 0  ;;  %s637_s9 = smov 0   ;;  %s639_s10 = smov 0  }
   0x2   :  { %s641_s11 = smov 0   ;;  %s643_s12 = smov 0  }
   0x3   :  { %s645_s13 = smov 0   ;;  %s647_s14 = smov 0  }
   0x4 LB: > { %s420_s15 = sadd.s32 4294967295, %s617_s14   ;;  %s24_s16 = sadd.s32 1, %s613_s13  ;;  %s617_s14 = sphi %s647_s14, %s15_s14   ;;  %s613_s13 = sphi %s645_s13, %s743_s13   ;;  %s609_s12 = sphi %s643_s12, %s742_s12   ;;  %s605_s11 = sphi %s641_s11, %s741_s11   ;;  %s601_s10 = sphi %s639_s10, %s740_s10   ;;  %s597_s9 = sphi %s637_s9, %s739_s9  }
   0x5   : > { %p25_p0 = scmp.ge.s32.totalorder %s24_s16, 3  ;;  %s60_s17 = sadd.s32 1, %s605_s11 }
   0x6   : > { %p67_p1 = scmp.ne.s32.totalorder %s605_s11, %s601_s10  ;;  %p68_p2 = scmp.eq.s32.totalorder %s617_s14, 0 }
   0x7   : > { %s745_s16 = smov (%p25_p0, %s24_s16), 0  ;;  %p73_p4 = scmp.ne.s32.totalorder %s601_s10, %s597_s9 }
   0x8   : > { %p673_p3 = por %p68_p2, %p67_p1  ;;  %s57_s19 = ssub.s32 %s613_s13, %s745_s16 }
   0x9   : > { %p74_p5 = scmp.eq.s32.totalorder %s420_s15, 0  ;;  %p58_p6 = scmp.eq.s32.totalorder %s57_s19, 0 }
   0xa   : > { %p99_p7 = scmp.eq.s32.totalorder %s420_s15, 2  ;;  %p485_p10 = scmp.lt.s32.totalorder %s617_s14, 3 }
   0xb   : > { %p680_p8 = por %p74_p5, %p73_p4  ;;  %s134_s23 = sand.u32 1, %s605_s11  }
   0xc   : > { %s685_s21 = scalar_select %p58_p6, %s605_s11, %s60_s17  }
   0xd   : > { %p687_p9 = por %p99_p7, %p67_p1  ;;  %s426_s24 = sshll.u32 %s613_s13, 2 }
   0xe   : > { %s425_s25 = sshll.u32 %s134_s23, 6  ;;  %s142_s28 = scalar_lea.hbm %s734_s1, %s426_s24 }
   0xf   : > { %s143_s29 = sshll.u32 %s142_s28, 4  ;;  %s138_s30 = scalar_lea.vmem [#allocation2], %s425_s25  ;;  %s144_s29 = int_to_ptr.hbm [resolvable:$true] %s143_s29 }
  0x10   : > { %s145_s3 = sshll.u32 %s138_s30, 4  ;;  %p482_p11 = pnand %p485_p10, %p673_p3  ;;  %s146_s3 = int_to_ptr.vmem [resolvable:$true] %s145_s3 }
  0x11   : > { %p427_p12 = scmp.ge.s32.totalorder %s617_s14, 1  ;;  %s135_s4 = scalar_lea.sflag [#allocation3], %s134_s23 }
  0x12   : > { %s619_s5 = smov 192   ;;  %s620_s6 = smov 64  }
  0x13   : > { %s621_s7 = smov 4   ;;  %p153_p13 = scmp.lt.s32.totalorder %s617_s14, 4 }
  0x14   : > { %484 = dma.hbm_to_vmem [thread:$0]  (!%p482_p11), %s144_s29, 1024, %s146_s3, %s135_s4, %s619_s5, %s620_s6, %s621_s7  }
  0x15   : > { %p154_p0 = pnand %p427_p12, %p153_p13 }
  0x16   : > { %s159_s8 = sand.u32 (!%p154_p0), 1, %s601_s10  }
  0x17   : > { %157 = sbr.rel (%p154_p0) target bundleno = 204 (0xcc), region = 28  ;;  %s428_s9 = sshll.u32 (!%p154_p0), %s159_s8, 6 }
  0x18   : > { %s160_s15 = scalar_lea.sflag (!%p154_p0), [#allocation3], %s159_s8  ;;  %s163_s17 = scalar_lea.vmem (!%p154_p0), [#allocation2], %s428_s9 }
  0x1c   : > { %592 = dma.done.wait (%p680_p8), %s160_s15, 1024  }
  0x1d   : > { %594 = vsyncadd (%p680_p8), %s160_s15, 4294966272  ;;  %v478_v0 = vld [vmem:[%s163_s17 + $0x38] sm:$0xff]  ;;  %v477_v1 = vld [vmem:[%s163_s17 + $0x30] sm:$0xff]  ;;  %s429_s20 = sshll.u32 %s159_s8, 4  ;;  %s467_s24 = sshll.u32 (%p687_p9), %s609_s12, 3 }
  0x1e   : > { %268 = vmatpush.bf16.msra.mxu0 %v478_v0  ;;  %v476_v2 = vld [vmem:[%s163_s17 + $0x28] sm:$0xff]  ;;  %v475_v3 = vld [vmem:[%s163_s17 + $0x20] sm:$0xff]  ;;  %v474_v4 = vld [vmem:[%s163_s17 + $0x18] sm:$0xff]  ;;  %s188_s23 = scalar_lea.vmem [#allocation4], %s429_s20  ;;  %s295_s27 = scalar_lea.vmem (%p687_p9), %s735_s2, %s467_s24 }
  0x1f   : > { %v473_v5 = vld [vmem:[%s163_s17 + $0x10] sm:$0xff]  ;;  %v472_v6 = vld [vmem:[%s163_s17 + $0x8] sm:$0xff]  ;;  %v471_v7 = vld [vmem:[%s163_s17] sm:$0xff] }
  0x20   : > { %v470_v8 = vld [vmem:[%s733_s0] sm:$0xff] }
  0x22   : > { %269 = vmatpush.bf16.msra.mxu0 %v477_v1 }
  0x26   : > { %270 = vmatpush.bf16.msra.mxu0 %v476_v2 }
  0x2a   : > { %271 = vmatpush.bf16.msra.mxu0 %v475_v3 }
  0x2e   : > { %272 = vmatpush.bf16.msra.mxu0 %v474_v4 }
  0x32   : > { %273 = vmatpush.bf16.msra.mxu0 %v473_v5 }
  0x36   : > { %274 = vmatpush.bf16.msra.mxu0 %v472_v6 }
  0x3a   : > { %275 = vmatpush.bf16.msra.mxu0 %v471_v7 }
  0x3d   : > { %276 = vmatmul.bf16.vlgmr.msra.gmra.mxu0 %v470_v8 }
  0xba   : > { %v277_v9 = vpop.f32.mrf.mxu0 }
  0xbb   : > { %282 = vst [vmem:[%s188_s23] sm:$0xff] %v277_v9 }
  0xbf   : > { %290 = sbr.rel (!%p687_p9) target bundleno = 204 (0xcc), region = 36 }
  0xc2   : > { %v279_v10 = vpop.f32.mrf.mxu0  ;;  %v326_v11 = vld [vmem:[%s188_s23] sm:$0xff] (%p687_p9) }
  0xc3   : > { %283 = vst [vmem:[%s188_s23 + $0x8] sm:$0xff] %v279_v10 }
  0xc4   : > { %327 = vst [vmem:[%s295_s27] sm:$0xff] %v326_v11 }
  0xca   : > { %v328_v12 = vld [vmem:[%s188_s23 + $0x8] sm:$0xff] }
  0xcb   : > { %329 = vst [vmem:[%s295_s27 + $0x18] sm:$0xff] %v328_v12 }
  0xcc PF: > { %s15_s14 = sadd.s32 1, %s617_s14   ;;  %s739_s9 = smov %s601_s10 }
  0xcd   : > { %p12_p1 = scmp.ge.s32.totalorder %s15_s14, 5   ;;  %s740_s10 = smov %s605_s11 }
  0xce   : > { %s741_s11 = smov %s685_s21  ;;  %s742_s12 = smov %s613_s13 }
  0xcf   : > { %s743_s13 = smov %s745_s16  ;;  %14 = sbr.rel (!%p12_p1) target bundleno = 4 (0x4), region = 109 }
  0xd4   :  { %345 = vsyncpa [#allocation3], 1 }
  0xd5   :  { %347 = vsyncpa [#allocation3 + $0x1], 1 }

// kernel: custom-call.1
= control target key start
LH: loop header
LB: loop body
LE: loop exit
PB: predicated region body
PF: predicated region fallthrough
CT: control target
= control target key end

     0   :  { %s6_s0 = inlined_call_operand.vmem [shape: f32[2,128], index: 0, kind: output, shape index: {}]  }

// kernel: custom-call.13
= control target key start
LH: loop header
LB: loop body
LE: loop exit
PB: predicated region body
PF: predicated region fallthrough
CT: control target
= control target key end

     0   :  { %s6_s0 = inlined_call_operand.vmem [shape: f32[2,2,400], index: 0, kind: output, shape index: {}]  }

// kernel: custom-call.14
= control target key start
LH: loop header
LB: loop body
LE: loop exit
PB: predicated region body
PF: predicated region fallthrough
CT: control target
= control target key end

     0   :  { %s6_s0 = inlined_call_operand.vmem [shape: f32[2,2,8], index: 0, kind: output, shape index: {}]  }

// kernel: custom-call.4
= control target key start
LH: loop header
LB: loop body
LE: loop exit
PB: predicated region body
PF: predicated region fallthrough
CT: control target
= control target key end

     0   :  { %s6_s0 = inlined_call_operand.vmem [shape: f32[2,256], index: 0, kind: output, shape index: {}]  }

// kernel: custom-call.15
= control target key start
LH: loop header
LB: loop body
LE: loop exit
PB: predicated region body
PF: predicated region fallthrough
CT: control target
= control target key end

     0   :  { %s6_s0 = inlined_call_operand.vmem [shape: f32[2,2], index: 0, kind: output, shape index: {}]  }

// kernel: custom-call.7
= control target key start
LH: loop header
LB: loop body
LE: loop exit
PB: predicated region body
PF: predicated region fallthrough
CT: control target
= control target key end

     0   :  { %s6_s0 = inlined_call_operand.vmem [shape: f32[2,8], index: 0, kind: output, shape index: {}]  }

// kernel: _lambda_.47
= control target key start
LH: loop header
LB: loop body
LE: loop exit
PB: predicated region body
PF: predicated region fallthrough
CT: control target
= control target key end

     0   :  { %s1980_s9 = smov 0   ;;  %s1982_s10 = smov 0   ;;  %s2496_s0 = inlined_call_operand.vmem [shape: bf16[32,640], index: 0, kind: input, shape index: {}]   ;;  %s2497_s1 = inlined_call_operand.vmem [shape: bf16[640,1024], index: 1, kind: input, shape index: {}]   ;;  %s2498_s2 = inlined_call_operand.vmem [shape: f32[32,1024], index: 2, kind: output, shape index: {}]  }
   0x1   :  { %s1984_s11 = smov 0   ;;  %s1986_s12 = smov 0  }
   0x2   :  { %s1988_s13 = smov 0  }
   0x3 LB: > { %s21_s14 = sadd.s32 1, %s1959_s12  ;;  %s1401_s15 = sadd.s32 4294967295, %s1963_s13   ;;  %s1963_s13 = sphi %s1988_s13, %s12_s13   ;;  %s1959_s12 = sphi %s1986_s12, %s2503_s12   ;;  %s1955_s11 = sphi %s1984_s11, %s2502_s11   ;;  %s1951_s10 = sphi %s1982_s10, %s2501_s10   ;;  %s1947_s9 = sphi %s1980_s9, %s2500_s9  }
   0x4   : > { %p22_p0 = scmp.ge.s32.totalorder %s21_s14, 4  ;;  %p64_p1 = scmp.ne.s32.totalorder %s1951_s10, %s1947_s9 }
   0x5   : > { %p65_p2 = scmp.eq.s32.totalorder %s1963_s13, 0  ;;  %p96_p4 = scmp.eq.s32.totalorder %s1401_s15, 3 }
   0x6   : > { %s2505_s14 = smov (%p22_p0, %s21_s14), 0  ;;  %s57_s17 = sadd.s32 1, %s1951_s10 }
   0x7   : > { %p66_p3 = por %p65_p2, %p64_p1  ;;  %s54_s16 = ssub.s32 %s1959_s12, %s2505_s14 }
   0x8   : > { %p55_p5 = scmp.eq.s32.totalorder %s54_s16, 0  ;;  %p2015_p6 = por %p96_p4, %p64_p1 }
   0x9   : > { %p1405_p7 = scmp.ge.s32.totalorder %s1963_s13, 4 }
   0xa   : > { %s2020_s19 = scalar_select %p55_p5, %s1951_s10, %s57_s17  }
   0xb   : > { %128 = sbr.rel (%p1405_p7) target bundleno = 100 (0x64), region = 20 }
  0x10   : > { %131 = sbr.rel (!%p66_p3) target bundleno = 100 (0x64), region = 24  ;;  %s133_s20 = sand.u32 (%p66_p3), 1, %s1951_s10  }
  0x11   : > { %s1775_s21 = sshll.u32 (%p66_p3), %s1959_s12, 3  ;;  %s1883_s22 = smul.u32 (%p66_p3), 640, %s133_s20 }
  0x12   : > { %s2028_s25 = scalar_lea.vmem (%p66_p3), %s2497_s1, %s1775_s21 }
  0x13   : > { %v325_v0 = vld [vmem:[%s2028_s25] sm:$0xff] (%p66_p3)  ;;  %s2033_s26 = scalar_lea.vmem (%p66_p3), [#allocation2], %s1883_s22 }
  0x14   : > { %v327_v1 = vld [vmem:[%s2028_s25 + $0x20] sm:$0xff] (%p66_p3)  ;;  %326 = vst [vmem:[%s2033_s26] sm:$0xff] (%p66_p3), %v325_v0 }
  0x15   : > { %v329_v2 = vld [vmem:[%s2028_s25 + $0x40] sm:$0xff]  ;;  %328 = vst [vmem:[%s2033_s26 + $0x8] sm:$0xff] %v327_v1 }
  0x16   : > { %v331_v3 = vld [vmem:[%s2028_s25 + $0x60] sm:$0xff]  ;;  %330 = vst [vmem:[%s2033_s26 + $0x10] sm:$0xff] %v329_v2 }
  0x17   : > { %v333_v4 = vld [vmem:[%s2028_s25 + $0x80] sm:$0xff]  ;;  %332 = vst [vmem:[%s2033_s26 + $0x18] sm:$0xff] %v331_v3 }
  0x18   : > { %v335_v5 = vld [vmem:[%s2028_s25 + $0xa0] sm:$0xff]  ;;  %334 = vst [vmem:[%s2033_s26 + $0x20] sm:$0xff] %v333_v4 }
  0x19   : > { %v337_v6 = vld [vmem:[%s2028_s25 + $0xc0] sm:$0xff]  ;;  %336 = vst [vmem:[%s2033_s26 + $0x28] sm:$0xff] %v335_v5 }
  0x1a   : > { %v339_v7 = vld [vmem:[%s2028_s25 + $0xe0] sm:$0xff]  ;;  %338 = vst [vmem:[%s2033_s26 + $0x30] sm:$0xff] %v337_v6 }
  0x1b   : > { %v341_v8 = vld [vmem:[%s2028_s25 + $0x100] sm:$0xff]  ;;  %340 = vst [vmem:[%s2033_s26 + $0x38] sm:$0xff] %v339_v7 }
  0x1c   : > { %v343_v9 = vld [vmem:[%s2028_s25 + $0x120] sm:$0xff]  ;;  %342 = vst [vmem:[%s2033_s26 + $0x40] sm:$0xff] %v341_v8 }
  0x1d   : > { %v345_v10 = vld [vmem:[%s2028_s25 + $0x140] sm:$0xff]  ;;  %344 = vst [vmem:[%s2033_s26 + $0x48] sm:$0xff] %v343_v9 }
  0x1e   : > { %v347_v11 = vld [vmem:[%s2028_s25 + $0x160] sm:$0xff]  ;;  %346 = vst [vmem:[%s2033_s26 + $0x50] sm:$0xff] %v345_v10 }
  0x1f   : > { %v349_v12 = vld [vmem:[%s2028_s25 + $0x180] sm:$0xff]  ;;  %348 = vst [vmem:[%s2033_s26 + $0x58] sm:$0xff] %v347_v11 }
  0x20   : > { %v351_v13 = vld [vmem:[%s2028_s25 + $0x1a0] sm:$0xff]  ;;  %350 = vst [vmem:[%s2033_s26 + $0x60] sm:$0xff] %v349_v12 }
  0x21   : > { %v353_v14 = vld [vmem:[%s2028_s25 + $0x1c0] sm:$0xff]  ;;  %352 = vst [vmem:[%s2033_s26 + $0x68] sm:$0xff] %v351_v13 }
  0x22   : > { %v355_v15 = vld [vmem:[%s2028_s25 + $0x1e0] sm:$0xff]  ;;  %354 = vst [vmem:[%s2033_s26 + $0x70] sm:$0xff] %v353_v14 }
  0x23   : > { %v357_v16 = vld [vmem:[%s2028_s25 + $0x200] sm:$0xff]  ;;  %356 = vst [vmem:[%s2033_s26 + $0x78] sm:$0xff] %v355_v15 }
  0x24   : > { %v359_v17 = vld [vmem:[%s2028_s25 + $0x220] sm:$0xff]  ;;  %358 = vst [vmem:[%s2033_s26 + $0x80] sm:$0xff] %v357_v16 }
  0x25   : > { %v361_v18 = vld [vmem:[%s2028_s25 + $0x240] sm:$0xff]  ;;  %360 = vst [vmem:[%s2033_s26 + $0x88] sm:$0xff] %v359_v17 }
  0x26   : > { %v363_v19 = vld [vmem:[%s2028_s25 + $0x260] sm:$0xff]  ;;  %362 = vst [vmem:[%s2033_s26 + $0x90] sm:$0xff] %v361_v18 }
  0x27   : > { %v365_v20 = vld [vmem:[%s2028_s25 + $0x280] sm:$0xff]  ;;  %364 = vst [vmem:[%s2033_s26 + $0x98] sm:$0xff] %v363_v19 }
  0x28   : > { %v367_v21 = vld [vmem:[%s2028_s25 + $0x2a0] sm:$0xff]  ;;  %366 = vst [vmem:[%s2033_s26 + $0xa0] sm:$0xff] %v365_v20 }
  0x29   : > { %v369_v22 = vld [vmem:[%s2028_s25 + $0x2c0] sm:$0xff]  ;;  %368 = vst [vmem:[%s2033_s26 + $0xa8] sm:$0xff] %v367_v21 }
  0x2a   : > { %v371_v23 = vld [vmem:[%s2028_s25 + $0x2e0] sm:$0xff]  ;;  %370 = vst [vmem:[%s2033_s26 + $0xb0] sm:$0xff] %v369_v22 }
  0x2b   : > { %v373_v24 = vld [vmem:[%s2028_s25 + $0x300] sm:$0xff]  ;;  %372 = vst [vmem:[%s2033_s26 + $0xb8] sm:$0xff] %v371_v23 }
  0x2c   : > { %v375_v25 = vld [vmem:[%s2028_s25 + $0x320] sm:$0xff]  ;;  %374 = vst [vmem:[%s2033_s26 + $0xc0] sm:$0xff] %v373_v24 }
  0x2d   : > { %v377_v26 = vld [vmem:[%s2028_s25 + $0x340] sm:$0xff]  ;;  %376 = vst [vmem:[%s2033_s26 + $0xc8] sm:$0xff] %v375_v25 }
  0x2e   : > { %v379_v27 = vld [vmem:[%s2028_s25 + $0x360] sm:$0xff]  ;;  %378 = vst [vmem:[%s2033_s26 + $0xd0] sm:$0xff] %v377_v26 }
  0x2f   : > { %v381_v28 = vld [vmem:[%s2028_s25 + $0x380] sm:$0xff]  ;;  %380 = vst [vmem:[%s2033_s26 + $0xd8] sm:$0xff] %v379_v27 }
  0x30   : > { %v383_v29 = vld [vmem:[%s2028_s25 + $0x3a0] sm:$0xff]  ;;  %382 = vst [vmem:[%s2033_s26 + $0xe0] sm:$0xff] %v381_v28 }
  0x31   : > { %v385_v30 = vld [vmem:[%s2028_s25 + $0x3c0] sm:$0xff]  ;;  %384 = vst [vmem:[%s2033_s26 + $0xe8] sm:$0xff] %v383_v29 }
  0x32   : > { %v387_v31 = vld [vmem:[%s2028_s25 + $0x3e0] sm:$0xff]  ;;  %386 = vst [vmem:[%s2033_s26 + $0xf0] sm:$0xff] %v385_v30 }
  0x33   : > { %v389_v32 = vld [vmem:[%s2028_s25 + $0x400] sm:$0xff]  ;;  %388 = vst [vmem:[%s2033_s26 + $0xf8] sm:$0xff] %v387_v31 }
  0x34   : > { %v391_v33 = vld [vmem:[%s2028_s25 + $0x420] sm:$0xff]  ;;  %390 = vst [vmem:[%s2033_s26 + $0x100] sm:$0xff] %v389_v32 }
  0x35   : > { %v393_v34 = vld [vmem:[%s2028_s25 + $0x440] sm:$0xff]  ;;  %392 = vst [vmem:[%s2033_s26 + $0x108] sm:$0xff] %v391_v33 }
  0x36   : > { %v395_v35 = vld [vmem:[%s2028_s25 + $0x460] sm:$0xff]  ;;  %394 = vst [vmem:[%s2033_s26 + $0x110] sm:$0xff] %v393_v34 }
  0x37   : > { %v397_v36 = vld [vmem:[%s2028_s25 + $0x480] sm:$0xff]  ;;  %396 = vst [vmem:[%s2033_s26 + $0x118] sm:$0xff] %v395_v35 }
  0x38   : > { %v399_v37 = vld [vmem:[%s2028_s25 + $0x4a0] sm:$0xff]  ;;  %398 = vst [vmem:[%s2033_s26 + $0x120] sm:$0xff] %v397_v36 }
  0x39   : > { %v401_v38 = vld [vmem:[%s2028_s25 + $0x4c0] sm:$0xff]  ;;  %400 = vst [vmem:[%s2033_s26 + $0x128] sm:$0xff] %v399_v37 }
  0x3a   : > { %v403_v39 = vld [vmem:[%s2028_s25 + $0x4e0] sm:$0xff]  ;;  %402 = vst [vmem:[%s2033_s26 + $0x130] sm:$0xff] %v401_v38 }
  0x3b   : > { %v405_v40 = vld [vmem:[%s2028_s25 + $0x500] sm:$0xff]  ;;  %404 = vst [vmem:[%s2033_s26 + $0x138] sm:$0xff] %v403_v39 }
  0x3c   : > { %v407_v41 = vld [vmem:[%s2028_s25 + $0x520] sm:$0xff]  ;;  %406 = vst [vmem:[%s2033_s26 + $0x140] sm:$0xff] %v405_v40 }
  0x3d   : > { %v409_v42 = vld [vmem:[%s2028_s25 + $0x540] sm:$0xff]  ;;  %408 = vst [vmem:[%s2033_s26 + $0x148] sm:$0xff] %v407_v41 }
  0x3e   : > { %v411_v43 = vld [vmem:[%s2028_s25 + $0x560] sm:$0xff]  ;;  %410 = vst [vmem:[%s2033_s26 + $0x150] sm:$0xff] %v409_v42 }
  0x3f   : > { %v413_v44 = vld [vmem:[%s2028_s25 + $0x580] sm:$0xff]  ;;  %412 = vst [vmem:[%s2033_s26 + $0x158] sm:$0xff] %v411_v43 }
  0x40   : > { %v415_v45 = vld [vmem:[%s2028_s25 + $0x5a0] sm:$0xff]  ;;  %414 = vst [vmem:[%s2033_s26 + $0x160] sm:$0xff] %v413_v44 }
  0x41   : > { %v417_v46 = vld [vmem:[%s2028_s25 + $0x5c0] sm:$0xff]  ;;  %416 = vst [vmem:[%s2033_s26 + $0x168] sm:$0xff] %v415_v45 }
  0x42   : > { %v419_v47 = vld [vmem:[%s2028_s25 + $0x5e0] sm:$0xff]  ;;  %418 = vst [vmem:[%s2033_s26 + $0x170] sm:$0xff] %v417_v46 }
  0x43   : > { %v421_v48 = vld [vmem:[%s2028_s25 + $0x600] sm:$0xff]  ;;  %420 = vst [vmem:[%s2033_s26 + $0x178] sm:$0xff] %v419_v47 }
  0x44   : > { %v423_v49 = vld [vmem:[%s2028_s25 + $0x620] sm:$0xff]  ;;  %422 = vst [vmem:[%s2033_s26 + $0x180] sm:$0xff] %v421_v48 }
  0x45   : > { %v425_v50 = vld [vmem:[%s2028_s25 + $0x640] sm:$0xff]  ;;  %424 = vst [vmem:[%s2033_s26 + $0x188] sm:$0xff] %v423_v49 }
  0x46   : > { %v427_v51 = vld [vmem:[%s2028_s25 + $0x660] sm:$0xff]  ;;  %426 = vst [vmem:[%s2033_s26 + $0x190] sm:$0xff] %v425_v50 }
  0x47   : > { %v429_v52 = vld [vmem:[%s2028_s25 + $0x680] sm:$0xff]  ;;  %428 = vst [vmem:[%s2033_s26 + $0x198] sm:$0xff] %v427_v51 }
  0x48   : > { %v431_v53 = vld [vmem:[%s2028_s25 + $0x6a0] sm:$0xff]  ;;  %430 = vst [vmem:[%s2033_s26 + $0x1a0] sm:$0xff] %v429_v52 }
  0x49   : > { %v433_v54 = vld [vmem:[%s2028_s25 + $0x6c0] sm:$0xff]  ;;  %432 = vst [vmem:[%s2033_s26 + $0x1a8] sm:$0xff] %v431_v53 }
  0x4a   : > { %v435_v55 = vld [vmem:[%s2028_s25 + $0x6e0] sm:$0xff]  ;;  %434 = vst [vmem:[%s2033_s26 + $0x1b0] sm:$0xff] %v433_v54 }
  0x4b   : > { %v437_v56 = vld [vmem:[%s2028_s25 + $0x700] sm:$0xff]  ;;  %436 = vst [vmem:[%s2033_s26 + $0x1b8] sm:$0xff] %v435_v55 }
  0x4c   : > { %v439_v57 = vld [vmem:[%s2028_s25 + $0x720] sm:$0xff]  ;;  %438 = vst [vmem:[%s2033_s26 + $0x1c0] sm:$0xff] %v437_v56 }
  0x4d   : > { %v441_v58 = vld [vmem:[%s2028_s25 + $0x740] sm:$0xff]  ;;  %440 = vst [vmem:[%s2033_s26 + $0x1c8] sm:$0xff] %v439_v57 }
  0x4e   : > { %v443_v59 = vld [vmem:[%s2028_s25 + $0x760] sm:$0xff]  ;;  %442 = vst [vmem:[%s2033_s26 + $0x1d0] sm:$0xff] %v441_v58 }
  0x4f   : > { %v445_v60 = vld [vmem:[%s2028_s25 + $0x780] sm:$0xff]  ;;  %444 = vst [vmem:[%s2033_s26 + $0x1d8] sm:$0xff] %v443_v59 }
  0x50   : > { %v447_v61 = vld [vmem:[%s2028_s25 + $0x7a0] sm:$0xff]  ;;  %446 = vst [vmem:[%s2033_s26 + $0x1e0] sm:$0xff] %v445_v60 }
  0x51   : > { %v449_v62 = vld [vmem:[%s2028_s25 + $0x7c0] sm:$0xff]  ;;  %448 = vst [vmem:[%s2033_s26 + $0x1e8] sm:$0xff] %v447_v61 }
  0x52   : > { %v451_v63 = vld [vmem:[%s2028_s25 + $0x7e0] sm:$0xff]  ;;  %450 = vst [vmem:[%s2033_s26 + $0x1f0] sm:$0xff] %v449_v62 }
  0x53   : > { %v453_v0 = vld [vmem:[%s2028_s25 + $0x800] sm:$0xff]  ;;  %452 = vst [vmem:[%s2033_s26 + $0x1f8] sm:$0xff] %v451_v63 }
  0x54   : > { %v455_v1 = vld [vmem:[%s2028_s25 + $0x820] sm:$0xff]  ;;  %454 = vst [vmem:[%s2033_s26 + $0x200] sm:$0xff] %v453_v0 }
  0x55   : > { %v457_v2 = vld [vmem:[%s2028_s25 + $0x840] sm:$0xff]  ;;  %456 = vst [vmem:[%s2033_s26 + $0x208] sm:$0xff] %v455_v1 }
  0x56   : > { %v459_v3 = vld [vmem:[%s2028_s25 + $0x860] sm:$0xff]  ;;  %458 = vst [vmem:[%s2033_s26 + $0x210] sm:$0xff] %v457_v2 }
  0x57   : > { %v461_v4 = vld [vmem:[%s2028_s25 + $0x880] sm:$0xff]  ;;  %460 = vst [vmem:[%s2033_s26 + $0x218] sm:$0xff] %v459_v3 }
  0x58   : > { %v463_v5 = vld [vmem:[%s2028_s25 + $0x8a0] sm:$0xff]  ;;  %462 = vst [vmem:[%s2033_s26 + $0x220] sm:$0xff] %v461_v4 }
  0x59   : > { %v465_v6 = vld [vmem:[%s2028_s25 + $0x8c0] sm:$0xff]  ;;  %464 = vst [vmem:[%s2033_s26 + $0x228] sm:$0xff] %v463_v5 }
  0x5a   : > { %v467_v7 = vld [vmem:[%s2028_s25 + $0x8e0] sm:$0xff]  ;;  %466 = vst [vmem:[%s2033_s26 + $0x230] sm:$0xff] %v465_v6 }
  0x5b   : > { %v469_v8 = vld [vmem:[%s2028_s25 + $0x900] sm:$0xff]  ;;  %468 = vst [vmem:[%s2033_s26 + $0x238] sm:$0xff] %v467_v7 }
  0x5c   : > { %v471_v9 = vld [vmem:[%s2028_s25 + $0x920] sm:$0xff]  ;;  %470 = vst [vmem:[%s2033_s26 + $0x240] sm:$0xff] %v469_v8 }
  0x5d   : > { %v473_v10 = vld [vmem:[%s2028_s25 + $0x940] sm:$0xff]  ;;  %472 = vst [vmem:[%s2033_s26 + $0x248] sm:$0xff] %v471_v9 }
  0x5e   : > { %v475_v11 = vld [vmem:[%s2028_s25 + $0x960] sm:$0xff]  ;;  %474 = vst [vmem:[%s2033_s26 + $0x250] sm:$0xff] %v473_v10 }
  0x5f   : > { %v477_v12 = vld [vmem:[%s2028_s25 + $0x980] sm:$0xff]  ;;  %476 = vst [vmem:[%s2033_s26 + $0x258] sm:$0xff] %v475_v11 }
  0x60   : > { %v479_v13 = vld [vmem:[%s2028_s25 + $0x9a0] sm:$0xff]  ;;  %478 = vst [vmem:[%s2033_s26 + $0x260] sm:$0xff] %v477_v12 }
  0x61   : > { %v481_v14 = vld [vmem:[%s2028_s25 + $0x9c0] sm:$0xff]  ;;  %480 = vst [vmem:[%s2033_s26 + $0x268] sm:$0xff] %v479_v13 }
  0x62   : > { %v483_v15 = vld [vmem:[%s2028_s25 + $0x9e0] sm:$0xff]  ;;  %482 = vst [vmem:[%s2033_s26 + $0x270] sm:$0xff] %v481_v14 }
  0x63   : > { %484 = vst [vmem:[%s2033_s26 + $0x278] sm:$0xff] %v483_v15 }
  0x64 PF: > { %p1408_p8 = scmp.ge.s32.totalorder %s1963_s13, 1  ;;  %p489_p9 = scmp.lt.s32.totalorder %s1963_s13, 5 }
  0x66   : > { %p490_p10 = pnand %p1408_p8, %p489_p9 }
  0x67   : > { %s496_s27 = sand.u32 (!%p490_p10), 1, %s1947_s9  }
  0x68   : > { %493 = sbr.rel (%p490_p10) target bundleno = 362 (0x16a), region = 62 }
  0x69   : > { %s1884_s28 = smul.u32 (!%p490_p10), 640, %s496_s27 }
  0x6b   : > { %s2197_s29 = scalar_lea.vmem (!%p490_p10), [#allocation2], %s1884_s28 }
  0x6d   : > { %v1508_v16 = vld [vmem:[%s2197_s29 + $0x70] sm:$0xf]  ;;  %v1801_v17 = vld [vmem:[%s2197_s29 + $0x74] sm:$0xf0]  ;;  %v1500_v27 = vld [vmem:[%s2197_s29 + $0x60] sm:$0xf] }
  0x6e   : > { %v1572_v18 = vld [vmem:[%s2197_s29 + $0xf0] sm:$0xf]  ;;  %v1509_v19 = vor.u32 %v1801_v17, %v1508_v16  ;;  %v1817_v20 = vld [vmem:[%s2197_s29 + $0xf4] sm:$0xf0]  ;;  %v1799_v29 = vld [vmem:[%s2197_s29 + $0x64] sm:$0xf0] }
  0x6f   : > { %v1636_v21 = vld [vmem:[%s2197_s29 + $0x170] sm:$0xf]  ;;  %v1833_v22 = vld [vmem:[%s2197_s29 + $0x174] sm:$0xf0]  ;;  %v1573_v23 = vor.u32 %v1817_v20, %v1572_v18  ;;  %v1564_v30 = vld [vmem:[%s2197_s29 + $0xe0] sm:$0xf]  ;;  %v1501_v32 = vor.u32 %v1799_v29, %v1500_v27 }
  0x70   : > { %v1637_v24 = vor.u32 %v1833_v22, %v1636_v21  ;;  %v1700_v25 = vld [vmem:[%s2197_s29 + $0x1f0] sm:$0xf]  ;;  %v1849_v26 = vld [vmem:[%s2197_s29 + $0x1f4] sm:$0xf0]  ;;  %1076 = vmatpush.bf16.msra.mxu0 %v1509_v19  ;;  %v1815_v31 = vld [vmem:[%s2197_s29 + $0xe4] sm:$0xf0] }
  0x71   : > { %v1701_v28 = vor.u32 %v1849_v26, %v1700_v25  ;;  %1095 = vmatpush.bf16.msra.mxu1 %v1573_v23  ;;  %v1565_v33 = vor.u32 %v1815_v31, %v1564_v30  ;;  %v1628_v34 = vld [vmem:[%s2197_s29 + $0x160] sm:$0xf]  ;;  %v1831_v35 = vld [vmem:[%s2197_s29 + $0x164] sm:$0xf0]  ;;  %v1492_v39 = vld [vmem:[%s2197_s29 + $0x50] sm:$0xf] }
  0x72   : > { %1114 = vmatpush.bf16.msra.mxu2 %v1637_v24  ;;  %v1692_v36 = vld [vmem:[%s2197_s29 + $0x1e0] sm:$0xf]  ;;  %v1629_v37 = vor.u32 %v1831_v35, %v1628_v34  ;;  %v1847_v38 = vld [vmem:[%s2197_s29 + $0x1e4] sm:$0xf0]  ;;  %v1797_v40 = vld [vmem:[%s2197_s29 + $0x54] sm:$0xf0] }
  0x73   : > { %1133 = vmatpush.bf16.msra.mxu3 %v1701_v28  ;;  %v1693_v41 = vor.u32 %v1847_v38, %v1692_v36  ;;  %v1556_v42 = vld [vmem:[%s2197_s29 + $0xd0] sm:$0xf]  ;;  %v1813_v43 = vld [vmem:[%s2197_s29 + $0xd4] sm:$0xf0]  ;;  %v1493_v45 = vor.u32 %v1797_v40, %v1492_v39  ;;  %v1484_v51 = vld [vmem:[%s2197_s29 + $0x40] sm:$0xf] }
  0x74   : > { %v1620_v44 = vld [vmem:[%s2197_s29 + $0x150] sm:$0xf]  ;;  %1077 = vmatpush.bf16.msra.mxu0 %v1501_v32  ;;  %v1829_v46 = vld [vmem:[%s2197_s29 + $0x154] sm:$0xf0]  ;;  %v1557_v49 = vor.u32 %v1813_v43, %v1556_v42  ;;  %v1795_v52 = vld [vmem:[%s2197_s29 + $0x44] sm:$0xf0] }
  0x75   : > { %v1684_v47 = vld [vmem:[%s2197_s29 + $0x1d0] sm:$0xf]  ;;  %v1845_v48 = vld [vmem:[%s2197_s29 + $0x1d4] sm:$0xf0]  ;;  %1096 = vmatpush.bf16.msra.mxu1 %v1565_v33  ;;  %v1621_v50 = vor.u32 %v1829_v46, %v1620_v44  ;;  %v1548_v53 = vld [vmem:[%s2197_s29 + $0xc0] sm:$0xf]  ;;  %v1485_v60 = vor.u32 %v1795_v52, %v1484_v51 }
  0x76   : > { %1115 = vmatpush.bf16.msra.mxu2 %v1629_v37  ;;  %v1685_v54 = vor.u32 %v1845_v48, %v1684_v47  ;;  %v1811_v55 = vld [vmem:[%s2197_s29 + $0xc4] sm:$0xf0]  ;;  %v1612_v56 = vld [vmem:[%s2197_s29 + $0x140] sm:$0xf]  ;;  %v1476_v63 = vld [vmem:[%s2197_s29 + $0x30] sm:$0xf] }
  0x77   : > { %1134 = vmatpush.bf16.msra.mxu3 %v1693_v41  ;;  %v1827_v57 = vld [vmem:[%s2197_s29 + $0x144] sm:$0xf0]  ;;  %v1676_v58 = vld [vmem:[%s2197_s29 + $0x1c0] sm:$0xf]  ;;  %v1549_v61 = vor.u32 %v1811_v55, %v1548_v53  ;;  %v1793_v0 = vld [vmem:[%s2197_s29 + $0x34] sm:$0xf0] }
  0x78   : > { %v1843_v59 = vld [vmem:[%s2197_s29 + $0x1c4] sm:$0xf0]  ;;  %1078 = vmatpush.bf16.msra.mxu0 %v1493_v45  ;;  %v1613_v62 = vor.u32 %v1827_v57, %v1612_v56  ;;  %v1540_v1 = vld [vmem:[%s2197_s29 + $0xb0] sm:$0xf]  ;;  %v1809_v3 = vld [vmem:[%s2197_s29 + $0xb4] sm:$0xf0]  ;;  %v1477_v8 = vor.u32 %v1793_v0, %v1476_v63 }
  0x79   : > { %1097 = vmatpush.bf16.msra.mxu1 %v1557_v49  ;;  %v1677_v2 = vor.u32 %v1843_v59, %v1676_v58  ;;  %v1604_v4 = vld [vmem:[%s2197_s29 + $0x130] sm:$0xf]  ;;  %v1825_v5 = vld [vmem:[%s2197_s29 + $0x134] sm:$0xf0]  ;;  %v1541_v9 = vor.u32 %v1809_v3, %v1540_v1  ;;  %v1468_v11 = vld [vmem:[%s2197_s29 + $0x20] sm:$0xf] }
  0x7a   : > { %1116 = vmatpush.bf16.msra.mxu2 %v1621_v50  ;;  %v1668_v6 = vld [vmem:[%s2197_s29 + $0x1b0] sm:$0xf]  ;;  %v1841_v7 = vld [vmem:[%s2197_s29 + $0x1b4] sm:$0xf0]  ;;  %v1605_v10 = vor.u32 %v1825_v5, %v1604_v4  ;;  %v1791_v12 = vld [vmem:[%s2197_s29 + $0x24] sm:$0xf0] }
  0x7b   : > { %1135 = vmatpush.bf16.msra.mxu3 %v1685_v54  ;;  %v1532_v13 = vld [vmem:[%s2197_s29 + $0xa0] sm:$0xf]  ;;  %v1669_v14 = vor.u32 %v1841_v7, %v1668_v6  ;;  %v1807_v15 = vld [vmem:[%s2197_s29 + $0xa4] sm:$0xf0]  ;;  %v1469_v20 = vor.u32 %v1791_v12, %v1468_v11  ;;  %v1460_v23 = vld [vmem:[%s2197_s29 + $0x10] sm:$0xf] }
  0x7c   : > { %1079 = vmatpush.bf16.msra.mxu0 %v1485_v60  ;;  %v1596_v16 = vld [vmem:[%s2197_s29 + $0x120] sm:$0xf]  ;;  %v1823_v17 = vld [vmem:[%s2197_s29 + $0x124] sm:$0xf0]  ;;  %v1533_v21 = vor.u32 %v1807_v15, %v1532_v13  ;;  %v1789_v24 = vld [vmem:[%s2197_s29 + $0x14] sm:$0xf0] }
  0x7d   : > { %1098 = vmatpush.bf16.msra.mxu1 %v1549_v61  ;;  %v1660_v18 = vld [vmem:[%s2197_s29 + $0x1a0] sm:$0xf]  ;;  %v1839_v19 = vld [vmem:[%s2197_s29 + $0x1a4] sm:$0xf0]  ;;  %v1597_v22 = vor.u32 %v1823_v17, %v1596_v16  ;;  %v1524_v25 = vld [vmem:[%s2197_s29 + $0x90] sm:$0xf]  ;;  %v1461_v33 = vor.u32 %v1789_v24, %v1460_v23 }
  0x7e   : > { %1117 = vmatpush.bf16.msra.mxu2 %v1613_v62  ;;  %v1661_v26 = vor.u32 %v1839_v19, %v1660_v18  ;;  %v1805_v27 = vld [vmem:[%s2197_s29 + $0x94] sm:$0xf0]  ;;  %v1588_v28 = vld [vmem:[%s2197_s29 + $0x110] sm:$0xf]  ;;  %v1452_v32 = vld [vmem:[%s2197_s29] sm:$0xf] }
  0x7f   : > { %1136 = vmatpush.bf16.msra.mxu3 %v1677_v2  ;;  %v1821_v29 = vld [vmem:[%s2197_s29 + $0x114] sm:$0xf0]  ;;  %v1652_v30 = vld [vmem:[%s2197_s29 + $0x190] sm:$0xf]  ;;  %v1787_v34 = vld [vmem:[%s2197_s29 + $0x4] sm:$0xf0]  ;;  %v1525_v37 = vor.u32 %v1805_v27, %v1524_v25 }
  0x80   : > { %1080 = vmatpush.bf16.msra.mxu0 %v1477_v8  ;;  %v1837_v31 = vld [vmem:[%s2197_s29 + $0x194] sm:$0xf0]  ;;  %v1516_v35 = vld [vmem:[%s2197_s29 + $0x80] sm:$0xf]  ;;  %v1803_v36 = vld [vmem:[%s2197_s29 + $0x84] sm:$0xf0]  ;;  %v1589_v38 = vor.u32 %v1821_v29, %v1588_v28  ;;  %v1453_v50 = vor.u32 %v1787_v34, %v1452_v32 }
  0x81   : > { %1099 = vmatpush.bf16.msra.mxu1 %v1541_v9  ;;  %v1580_v39 = vld [vmem:[%s2197_s29 + $0x100] sm:$0xf]  ;;  %v1819_v40 = vld [vmem:[%s2197_s29 + $0x104] sm:$0xf0]  ;;  %v1653_v42 = vor.u32 %v1837_v31, %v1652_v30  ;;  %v1778_v45 = vld [vmem:[%s2496_s0 + $0x10] sm:$0xf0]  ;;  %v1517_v54 = vor.u32 %v1803_v36, %v1516_v35 }
  0x82   : > { %1118 = vmatpush.bf16.msra.mxu2 %v1605_v10  ;;  %v1644_v41 = vld [vmem:[%s2197_s29 + $0x180] sm:$0xf]  ;;  %v1835_v43 = vld [vmem:[%s2197_s29 + $0x184] sm:$0xf0]  ;;  %v1776_v46 = vld [vmem:[%s2496_s0 + $0x4] sm:$0xf]  ;;  %v1581_v55 = vor.u32 %v1819_v40, %v1580_v39 }
  0x83   : > { %1137 = vmatpush.bf16.msra.mxu3 %v1669_v14  ;;  %v1412_v44 = vld [vmem:[%s2496_s0] sm:$0xf]  ;;  %v1414_v47 = vld [vmem:[%s2496_s0 + $0x14] sm:$0xf0]  ;;  %v1816_v48 = vld [vmem:[%s2197_s29 + $0xf4] sm:$0xf]  ;;  %v1645_v59 = vor.u32 %v1835_v43, %v1644_v41 }
  0x84   : > { %1081 = vmatpush.bf16.msra.mxu0 %v1469_v20  ;;  %v1574_v49 = vld [vmem:[%s2197_s29 + $0xf8] sm:$0xf0]  ;;  %v1420_v51 = vld [vmem:[%s2496_s0 + $0x8] sm:$0xf]  ;;  %v1800_v52 = vld [vmem:[%s2197_s29 + $0x74] sm:$0xf]  ;;  %v2294_v0 = vor.u32 %v1778_v45, %v1412_v44  ;;  %v2299_v5 = vor.u32 %v1776_v46, %v1414_v47 }
  0x85   : > { %1100 = vmatpush.bf16.msra.mxu1 %v1533_v21  ;;  %v1510_v53 = vld [vmem:[%s2197_s29 + $0x78] sm:$0xf0]  ;;  %v1777_v57 = vld [vmem:[%s2496_s0 + $0xc] sm:$0xf]  ;;  %v1422_v58 = vld [vmem:[%s2496_s0 + $0x1c] sm:$0xf0]  ;;  %v1577_v60 = vor.u32 %v1816_v48, %v1574_v49 }
  0x86   : > { %1119 = vmatpush.bf16.msra.mxu2 %v1597_v22  ;;  %v1779_v56 = vld [vmem:[%s2496_s0 + $0x18] sm:$0xf0]  ;;  %v1764_v61 = vld [vmem:[%s2197_s29 + $0x270] sm:$0xf]  ;;  %v1865_v62 = vld [vmem:[%s2197_s29 + $0x274] sm:$0xf0]  ;;  %v1513_v1 = vor.u32 %v1800_v52, %v1510_v53  ;;  %v2305_v9 = vor.u32 %v1777_v57, %v1422_v58 }
  0x87   : > { %1138 = vmatpush.bf16.msra.mxu3 %v1661_v26  ;;  %v1832_v63 = vld [vmem:[%s2197_s29 + $0x174] sm:$0xf]  ;;  %v1638_v2 = vld [vmem:[%s2197_s29 + $0x178] sm:$0xf0]  ;;  %v1814_v3 = vld [vmem:[%s2197_s29 + $0xe4] sm:$0xf]  ;;  %v2301_v6 = vor.u32 %v1779_v56, %v1420_v51  ;;  %v1765_v10 = vor.u32 %v1865_v62, %v1764_v61 }
  0x88   : > { %1082 = vmatpush.bf16.msra.mxu0 %v1461_v33  ;;  %v1566_v4 = vld [vmem:[%s2197_s29 + $0xe8] sm:$0xf0]  ;;  %v1798_v7 = vld [vmem:[%s2197_s29 + $0x64] sm:$0xf]  ;;  %v1641_v11 = vor.u32 %v1832_v63, %v1638_v2  ;;  %v1756_v13 = vld [vmem:[%s2197_s29 + $0x260] sm:$0xf] }
  0x89   : > { %1101 = vmatpush.bf16.msra.mxu1 %v1525_v37  ;;  %v1502_v8 = vld [vmem:[%s2197_s29 + $0x68] sm:$0xf0]  ;;  %v1569_v12 = vor.u32 %v1814_v3, %v1566_v4  ;;  %v1863_v14 = vld [vmem:[%s2197_s29 + $0x264] sm:$0xf0]  ;;  %v1830_v15 = vld [vmem:[%s2197_s29 + $0x164] sm:$0xf] }
  0x8a   : > { %1120 = vmatpush.bf16.msra.mxu2 %v1589_v38  ;;  %v1505_v16 = vor.u32 %v1798_v7, %v1502_v8  ;;  %v1630_v17 = vld [vmem:[%s2197_s29 + $0x168] sm:$0xf0]  ;;  %v1812_v18 = vld [vmem:[%s2197_s29 + $0xd4] sm:$0xf]  ;;  %v1558_v19 = vld [vmem:[%s2197_s29 + $0xd8] sm:$0xf0]  ;;  %v1757_v22 = vor.u32 %v1863_v14, %v1756_v13 }
  0x8b   : > { %1139 = vmatpush.bf16.msra.mxu3 %v1653_v42  ;;  %v1796_v20 = vld [vmem:[%s2197_s29 + $0x54] sm:$0xf]  ;;  %v1494_v21 = vld [vmem:[%s2197_s29 + $0x58] sm:$0xf0]  ;;  %v1633_v23 = vor.u32 %v1830_v15, %v1630_v17  ;;  %v1561_v24 = vor.u32 %v1812_v18, %v1558_v19  ;;  %v1748_v25 = vld [vmem:[%s2197_s29 + $0x250] sm:$0xf] }
  0x8c   : > { %1083 = vmatpush.bf16.msra.mxu0 %v1453_v50  ;;  %v1861_v26 = vld [vmem:[%s2197_s29 + $0x254] sm:$0xf0]  ;;  %v1828_v27 = vld [vmem:[%s2197_s29 + $0x154] sm:$0xf]  ;;  %v1497_v28 = vor.u32 %v1796_v20, %v1494_v21  ;;  %v1622_v29 = vld [vmem:[%s2197_s29 + $0x158] sm:$0xf0] }
  0x8d   : > { %1102 = vmatpush.bf16.msra.mxu1 %v1517_v54  ;;  %v1810_v30 = vld [vmem:[%s2197_s29 + $0xc4] sm:$0xf]  ;;  %v1550_v31 = vld [vmem:[%s2197_s29 + $0xc8] sm:$0xf0]  ;;  %v1749_v34 = vor.u32 %v1861_v26, %v1748_v25  ;;  %v1740_v35 = vld [vmem:[%s2197_s29 + $0x240] sm:$0xf]  ;;  %v1625_v38 = vor.u32 %v1828_v27, %v1622_v29 }
  0x8e   : > { %1121 = vmatpush.bf16.msra.mxu2 %v1581_v55  ;;  %v1794_v32 = vld [vmem:[%s2197_s29 + $0x44] sm:$0xf]  ;;  %v1486_v33 = vld [vmem:[%s2197_s29 + $0x48] sm:$0xf0]  ;;  %v1859_v36 = vld [vmem:[%s2197_s29 + $0x244] sm:$0xf0]  ;;  %v1553_v39 = vor.u32 %v1810_v30, %v1550_v31 }
  0x8f   : > { %1140 = vmatpush.bf16.msra.mxu3 %v1645_v59  ;;  %1084 = vmatmul.bf16.vlgmr.msra.gmra.mxu0 %v2294_v0  ;;  %v1826_v37 = vld [vmem:[%s2197_s29 + $0x144] sm:$0xf]  ;;  %v1614_v40 = vld [vmem:[%s2197_s29 + $0x148] sm:$0xf0]  ;;  %v1432_v41 = vld [vmem:[%s2496_s0 + $0x28] sm:$0xf]  ;;  %v1489_v43 = vor.u32 %v1794_v32, %v1486_v33  ;;  %v1741_v51 = vor.u32 %v1859_v36, %v1740_v35 }
  0x90   : > { %1103 = vmatmul.bf16.vlgmr.msra.gmra.mxu1 %v2299_v5  ;;  %1152 = vmatpush.bf16.msrb.mxu0 %v1765_v10  ;;  %v1783_v42 = vld [vmem:[%s2496_s0 + $0x38] sm:$0xf0]  ;;  %v1781_v44 = vld [vmem:[%s2496_s0 + $0x2c] sm:$0xf]  ;;  %v1434_v45 = vld [vmem:[%s2496_s0 + $0x3c] sm:$0xf0]  ;;  %v1617_v55 = vor.u32 %v1826_v37, %v1614_v40 }
  0x91   : > { %1171 = vmatpush.bf16.msrb.mxu1 %v1513_v1  ;;  %1122 = vmatmul.bf16.vlgmr.msra.gmra.mxu2 %v2301_v6  ;;  %v1808_v46 = vld [vmem:[%s2197_s29 + $0xb4] sm:$0xf]  ;;  %v1542_v47 = vld [vmem:[%s2197_s29 + $0xb8] sm:$0xf0]  ;;  %v1440_v48 = vld [vmem:[%s2496_s0 + $0x30] sm:$0xf]  ;;  %v2367_v2 = vor.u32 %v1781_v44, %v1434_v45 }
  0x92   : > { %1190 = vmatpush.bf16.msrb.mxu2 %v1577_v60  ;;  %1141 = vmatmul.bf16.vlgmr.msra.gmra.mxu3 %v2305_v9  ;;  %v1792_v49 = vld [vmem:[%s2197_s29 + $0x34] sm:$0xf]  ;;  %v1478_v50 = vld [vmem:[%s2197_s29 + $0x38] sm:$0xf0]  ;;  %v1784_v52 = vld [vmem:[%s2496_s0 + $0x40] sm:$0xf0]  ;;  %v1545_v56 = vor.u32 %v1808_v46, %v1542_v47  ;;  %v2362_v60 = vor.u32 %v1783_v42, %v1432_v41 }
  0x93   : > { %1209 = vmatpush.bf16.msrb.mxu3 %v1641_v11  ;;  %v1782_v53 = vld [vmem:[%s2496_s0 + $0x34] sm:$0xf]  ;;  %v1442_v54 = vld [vmem:[%s2496_s0 + $0x44] sm:$0xf0]  ;;  %v1732_v57 = vld [vmem:[%s2197_s29 + $0x230] sm:$0xf]  ;;  %v1481_v61 = vor.u32 %v1792_v49, %v1478_v50  ;;  %v2369_v3 = vor.u32 %v1784_v52, %v1440_v48 }
  0x94   : > { %1153 = vmatpush.bf16.msrb.mxu0 %v1757_v22  ;;  %v1857_v58 = vld [vmem:[%s2197_s29 + $0x234] sm:$0xf0]  ;;  %v1824_v59 = vld [vmem:[%s2197_s29 + $0x134] sm:$0xf]  ;;  %v1606_v62 = vld [vmem:[%s2197_s29 + $0x138] sm:$0xf0]  ;;  %v2373_v8 = vor.u32 %v1782_v53, %v1442_v54 }
  0x95   : > { %1172 = vmatpush.bf16.msrb.mxu1 %v1505_v16  ;;  %v1806_v63 = vld [vmem:[%s2197_s29 + $0xa4] sm:$0xf]  ;;  %v1534_v1 = vld [vmem:[%s2197_s29 + $0xa8] sm:$0xf0]  ;;  %v1733_v10 = vor.u32 %v1857_v58, %v1732_v57  ;;  %v1609_v11 = vor.u32 %v1824_v59, %v1606_v62  ;;  %v1724_v13 = vld [vmem:[%s2197_s29 + $0x220] sm:$0xf] }
  0x96   : > { %1191 = vmatpush.bf16.msrb.mxu2 %v1569_v12  ;;  %v1790_v4 = vld [vmem:[%s2197_s29 + $0x24] sm:$0xf]  ;;  %v1470_v7 = vld [vmem:[%s2197_s29 + $0x28] sm:$0xf0]  ;;  %v1537_v12 = vor.u32 %v1806_v63, %v1534_v1  ;;  %v1855_v14 = vld [vmem:[%s2197_s29 + $0x224] sm:$0xf0] }
  0x97   : > { %1210 = vmatpush.bf16.msrb.mxu3 %v1633_v23  ;;  %v1822_v15 = vld [vmem:[%s2197_s29 + $0x124] sm:$0xf]  ;;  %v1473_v16 = vor.u32 %v1790_v4, %v1470_v7  ;;  %v1598_v17 = vld [vmem:[%s2197_s29 + $0x128] sm:$0xf0]  ;;  %v1804_v18 = vld [vmem:[%s2197_s29 + $0x94] sm:$0xf]  ;;  %v1725_v22 = vor.u32 %v1855_v14, %v1724_v13 }
  0x98   : > { %1154 = vmatpush.bf16.msrb.mxu0 %v1749_v34  ;;  %v1526_v19 = vld [vmem:[%s2197_s29 + $0x98] sm:$0xf0]  ;;  %v1788_v20 = vld [vmem:[%s2197_s29 + $0x14] sm:$0xf]  ;;  %v1716_v23 = vld [vmem:[%s2197_s29 + $0x210] sm:$0xf] }
  0x99   : > { %1173 = vmatpush.bf16.msrb.mxu1 %v1497_v28  ;;  %v1462_v21 = vld [vmem:[%s2197_s29 + $0x18] sm:$0xf0]  ;;  %v1529_v25 = vor.u32 %v1804_v18, %v1526_v19  ;;  %v1853_v26 = vld [vmem:[%s2197_s29 + $0x214] sm:$0xf0]  ;;  %v1820_v27 = vld [vmem:[%s2197_s29 + $0x114] sm:$0xf] }
  0x9a   : > { %1192 = vmatpush.bf16.msrb.mxu2 %v1561_v24  ;;  %v1601_v24 = vor.u32 %v1822_v15, %v1598_v17  ;;  %v1590_v28 = vld [vmem:[%s2197_s29 + $0x118] sm:$0xf0]  ;;  %v1465_v29 = vor.u32 %v1788_v20, %v1462_v21  ;;  %v1802_v30 = vld [vmem:[%s2197_s29 + $0x84] sm:$0xf]  ;;  %v1518_v31 = vld [vmem:[%s2197_s29 + $0x88] sm:$0xf0]  ;;  %v1717_v36 = vor.u32 %v1853_v26, %v1716_v23 }
  0x9b   : > { %1211 = vmatpush.bf16.msrb.mxu3 %v1625_v38  ;;  %v1786_v32 = vld [vmem:[%s2197_s29 + $0x4] sm:$0xf]  ;;  %v1454_v33 = vld [vmem:[%s2197_s29 + $0x8] sm:$0xf0]  ;;  %v1848_v34 = vld [vmem:[%s2197_s29 + $0x1f4] sm:$0xf]  ;;  %v1521_v40 = vor.u32 %v1802_v30, %v1518_v31 }
  0x9c   : > { %1155 = vmatpush.bf16.msrb.mxu0 %v1741_v51  ;;  %v1702_v35 = vld [vmem:[%s2197_s29 + $0x1f8] sm:$0xf0]  ;;  %v1864_v37 = vld [vmem:[%s2197_s29 + $0x274] sm:$0xf]  ;;  %v1708_v41 = vld [vmem:[%s2197_s29 + $0x200] sm:$0xf] }
  0x9d   : > { %1174 = vmatpush.bf16.msrb.mxu1 %v1489_v43  ;;  %v1766_v38 = vld [vmem:[%s2197_s29 + $0x278] sm:$0xf0]  ;;  %v1851_v42 = vld [vmem:[%s2197_s29 + $0x204] sm:$0xf0]  ;;  %v1457_v43 = vor.u32 %v1786_v32, %v1454_v33  ;;  %v1818_v44 = vld [vmem:[%s2197_s29 + $0x104] sm:$0xf]  ;;  %v1705_v46 = vor.u32 %v1848_v34, %v1702_v35 }
  0x9e   : > { %1193 = vmatpush.bf16.msrb.mxu2 %v1553_v39  ;;  %v1593_v39 = vor.u32 %v1820_v27, %v1590_v28  ;;  %v1582_v45 = vld [vmem:[%s2197_s29 + $0x108] sm:$0xf0]  ;;  %v1769_v47 = vor.u32 %v1864_v37, %v1766_v38  ;;  %v1846_v48 = vld [vmem:[%s2197_s29 + $0x1e4] sm:$0xf]  ;;  %v1709_v50 = vor.u32 %v1851_v42, %v1708_v41  ;;  %v1428_v51 = vld [vmem:[%s2496_s0 + $0x10] sm:$0xf] }
  0x9f   : > { %1212 = vmatpush.bf16.msrb.mxu3 %v1617_v55  ;;  %1089 = vmatmul.bf16.gmra.mxu0 %v2362_v60  ;;  %v1694_v49 = vld [vmem:[%s2197_s29 + $0x1e8] sm:$0xf0]  ;;  %v1780_v52 = vld [vmem:[%s2496_s0 + $0x20] sm:$0xf0]  ;;  %v1585_v53 = vor.u32 %v1818_v44, %v1582_v45  ;;  %v1844_v58 = vld [vmem:[%s2197_s29 + $0x1d4] sm:$0xf] }
  0xa0   : > { %1108 = vmatmul.bf16.gmra.mxu1 %v2367_v2  ;;  %1156 = vmatpush.bf16.msrb.mxu0 %v1733_v10  ;;  %v1697_v54 = vor.u32 %v1846_v48, %v1694_v49  ;;  %v1862_v55 = vld [vmem:[%s2197_s29 + $0x264] sm:$0xf]  ;;  %v2413_v57 = vor.u32 %v1780_v52, %v1428_v51  ;;  %v1686_v59 = vld [vmem:[%s2197_s29 + $0x1d8] sm:$0xf0]  ;;  %v1860_v63 = vld [vmem:[%s2197_s29 + $0x254] sm:$0xf] }
  0xa1   : > { %1175 = vmatpush.bf16.msrb.mxu1 %v1481_v61  ;;  %1127 = vmatmul.bf16.gmra.mxu2 %v2369_v3  ;;  %v1689_v62 = vor.u32 %v1844_v58, %v1686_v59  ;;  %v1750_v1 = vld [vmem:[%s2197_s29 + $0x258] sm:$0xf0]  ;;  %v1842_v4 = vld [vmem:[%s2197_s29 + $0x1c4] sm:$0xf]  ;;  %v1678_v7 = vld [vmem:[%s2197_s29 + $0x1c8] sm:$0xf0] }
  0xa2   : > { %1194 = vmatpush.bf16.msrb.mxu2 %v1545_v56  ;;  %1146 = vmatmul.bf16.gmra.mxu3 %v2373_v8  ;;  %v1758_v56 = vld [vmem:[%s2197_s29 + $0x268] sm:$0xf0]  ;;  %v1753_v10 = vor.u32 %v1860_v63, %v1750_v1  ;;  %v1840_v14 = vld [vmem:[%s2197_s29 + $0x1b4] sm:$0xf]  ;;  %v1838_v17 = vld [vmem:[%s2197_s29 + $0x1a4] sm:$0xf] }
  0xa3   : > { %1213 = vmatpush.bf16.msrb.mxu3 %v1609_v11  ;;  %v1761_v61 = vor.u32 %v1862_v55, %v1758_v56  ;;  %v1681_v11 = vor.u32 %v1842_v4, %v1678_v7  ;;  %v1742_v13 = vld [vmem:[%s2197_s29 + $0x248] sm:$0xf0]  ;;  %v1448_v19 = vld [vmem:[%s2496_s0 + $0x38] sm:$0xf]  ;;  %v1854_v23 = vld [vmem:[%s2197_s29 + $0x224] sm:$0xf] }
  0xa4   : > { %1157 = vmatpush.bf16.msrb.mxu0 %v1725_v22  ;;  %v1662_v18 = vld [vmem:[%s2197_s29 + $0x1a8] sm:$0xf0]  ;;  %v1836_v26 = vld [vmem:[%s2197_s29 + $0x194] sm:$0xf]  ;;  %v1654_v27 = vld [vmem:[%s2197_s29 + $0x198] sm:$0xf0] }
  0xa5   : > { %1176 = vmatpush.bf16.msrb.mxu1 %v1473_v16  ;;  %v1734_v16 = vld [vmem:[%s2197_s29 + $0x238] sm:$0xf0]  ;;  %v1785_v20 = vld [vmem:[%s2496_s0 + $0x48] sm:$0xf0]  ;;  %v1665_v22 = vor.u32 %v1838_v17, %v1662_v18  ;;  %v1852_v30 = vld [vmem:[%s2197_s29 + $0x214] sm:$0xf] }
  0xa6   : > { %1195 = vmatpush.bf16.msrb.mxu2 %v1537_v12  ;;  %v1858_v12 = vld [vmem:[%s2197_s29 + $0x244] sm:$0xf]  ;;  %v1718_v31 = vld [vmem:[%s2197_s29 + $0x218] sm:$0xf0]  ;;  %v1646_v33 = vld [vmem:[%s2197_s29 + $0x188] sm:$0xf0] }
  0xa7   : > { %1214 = vmatpush.bf16.msrb.mxu3 %v1601_v24  ;;  %v1745_v15 = vor.u32 %v1858_v12, %v1742_v13  ;;  %v1726_v24 = vld [vmem:[%s2197_s29 + $0x228] sm:$0xf0]  ;;  %v1834_v32 = vld [vmem:[%s2197_s29 + $0x184] sm:$0xf]  ;;  %v1721_v34 = vor.u32 %v1852_v30, %v1718_v31  ;;  %s1866_s9 = sshll.u32 (%p2015_p6), %s1955_s11, 4 }
  0xa8   : > { %1158 = vmatpush.bf16.msrb.mxu0 %v1717_v36  ;;  %v1729_v28 = vor.u32 %v1854_v23, %v1726_v24  ;;  %v1649_v35 = vor.u32 %v1834_v32, %v1646_v33  ;;  %v1850_v36 = vld [vmem:[%s2197_s29 + $0x204] sm:$0xf]  ;;  %v1710_v37 = vld [vmem:[%s2197_s29 + $0x208] sm:$0xf0]  ;;  %s1286_s8 = scalar_lea.vmem (%p2015_p6), %s2498_s2, %s1866_s9 }
  0xa9   : > { %1177 = vmatpush.bf16.msrb.mxu1 %v1465_v29  ;;  %v1657_v29 = vor.u32 %v1836_v26, %v1654_v27  ;;  %v1713_v38 = vor.u32 %v1850_v36, %v1710_v37 }
  0xaa   : > { %1196 = vmatpush.bf16.msrb.mxu2 %v1529_v25  ;;  %v1449_v25 = vor.u32 %v1785_v20, %v1448_v19 }
  0xab   : > { %1215 = vmatpush.bf16.msrb.mxu3 %v1593_v39 }
  0xac   : > { %1159 = vmatpush.bf16.msrb.mxu0 %v1709_v50 }
  0xad   : > { %1178 = vmatpush.bf16.msrb.mxu1 %v1457_v43 }
  0xae   : > { %1197 = vmatpush.bf16.msrb.mxu2 %v1521_v40 }
  0xaf   : > { %1216 = vmatpush.bf16.msrb.mxu3 %v1585_v53  ;;  %1160 = vmatmul.bf16.vlgmr.msrb.gmra.mxu0 %v2413_v57 }
  0xb0   : > { %1228 = vmatpush.bf16.msra.mxu0 %v1705_v46  ;;  %1179 = vmatmul.bf16.vlgmr.msrb.gmra.mxu1 %v2294_v0  ;;  %v1670_v0 = vld [vmem:[%s2197_s29 + $0x1b8] sm:$0xf0] }
  0xb1   : > { %1247 = vmatpush.bf16.msra.mxu1 %v1769_v47  ;;  %1198 = vmatmul.bf16.vlgmr.msrb.gmra.mxu2 %v2299_v5  ;;  %v1673_v5 = vor.u32 %v1840_v14, %v1670_v0 }
  0xb2   : > { %1867 = vmatpush.bf16.msra.mxu2 %v1705_v46  ;;  %1217 = vmatmul.bf16.vlgmr.msrb.gmra.mxu3 %v2301_v6  ;;  %v1856_v6 = vld [vmem:[%s2197_s29 + $0x234] sm:$0xf]  ;;  %s1409_s29 = sshll.u32 %s496_s27, 6 }
  0xb3   : > { %1875 = vmatpush.bf16.msra.mxu3 %v1769_v47  ;;  %v1737_v21 = vor.u32 %v1856_v6, %v1734_v16  ;;  %s2457_s6 = scalar_lea.vmem [#allocation3], %s1409_s29 }
  0xb4   : > { %1229 = vmatpush.bf16.msra.mxu0 %v1697_v54 }
  0xb5   : > { %1248 = vmatpush.bf16.msra.mxu1 %v1761_v61 }
  0xb6   : > { %1868 = vmatpush.bf16.msra.mxu2 %v1697_v54 }
  0xb7   : > { %1876 = vmatpush.bf16.msra.mxu3 %v1761_v61 }
  0xb8   : > { %1230 = vmatpush.bf16.msra.mxu0 %v1689_v62 }
  0xb9   : > { %1249 = vmatpush.bf16.msra.mxu1 %v1753_v10 }
  0xba   : > { %1869 = vmatpush.bf16.msra.mxu2 %v1689_v62 }
  0xbb   : > { %1877 = vmatpush.bf16.msra.mxu3 %v1753_v10 }
  0xbc   : > { %1231 = vmatpush.bf16.msra.mxu0 %v1681_v11 }
  0xbd   : > { %1250 = vmatpush.bf16.msra.mxu1 %v1745_v15 }
  0xbe   : > { %1870 = vmatpush.bf16.msra.mxu2 %v1681_v11 }
  0xbf   : > { %1878 = vmatpush.bf16.msra.mxu3 %v1745_v15  ;;  %1165 = vmatmul.bf16.gmra.mxu0 %v1449_v25 }
  0xc0   : > { %1232 = vmatpush.bf16.msra.mxu0 %v1673_v5  ;;  %1184 = vmatmul.bf16.gmra.mxu1 %v2362_v60 }
  0xc1   : > { %1251 = vmatpush.bf16.msra.mxu1 %v1737_v21  ;;  %1203 = vmatmul.bf16.gmra.mxu2 %v2367_v2 }
  0xc2   : > { %1871 = vmatpush.bf16.msra.mxu2 %v1673_v5  ;;  %1222 = vmatmul.bf16.gmra.mxu3 %v2369_v3 }
  0xc3   : > { %1879 = vmatpush.bf16.msra.mxu3 %v1737_v21 }
  0xc4   : > { %1233 = vmatpush.bf16.msra.mxu0 %v1665_v22 }
  0xc5   : > { %1252 = vmatpush.bf16.msra.mxu1 %v1729_v28 }
  0xc6   : > { %1872 = vmatpush.bf16.msra.mxu2 %v1665_v22 }
  0xc7   : > { %1880 = vmatpush.bf16.msra.mxu3 %v1729_v28 }
  0xc8   : > { %1234 = vmatpush.bf16.msra.mxu0 %v1657_v29 }
  0xc9   : > { %1253 = vmatpush.bf16.msra.mxu1 %v1721_v34 }
  0xca   : > { %1873 = vmatpush.bf16.msra.mxu2 %v1657_v29 }
  0xcb   : > { %1881 = vmatpush.bf16.msra.mxu3 %v1721_v34 }
  0xcc   : > { %1235 = vmatpush.bf16.msra.mxu0 %v1649_v35 }
  0xcd   : > { %1254 = vmatpush.bf16.msra.mxu1 %v1713_v38 }
  0xce   : > { %1874 = vmatpush.bf16.msra.mxu2 %v1649_v35 }
  0xcf   : > { %1882 = vmatpush.bf16.msra.mxu3 %v1713_v38  ;;  %1236 = vmatmul.bf16.vlgmr.msra.gmra.mxu0 %v2305_v9 }
  0xd0   : > { %1255 = vmatmul.bf16.vlgmr.msra.gmra.mxu1 %v2413_v57 }
  0xd1   : > { %1241 = vmatmul.bf16.vlgmr.msra.gmra.mxu2 %v2373_v8 }
  0xd2   : > { %1260 = vmatmul.bf16.vlgmr.msra.gmra.mxu3 %v1449_v25 }
 0x10c   : > { %v1085_v60 = vpop.f32.mrf.mxu0 }
 0x10d   : > { %v1104_v2 = vpop.f32.mrf.mxu1 }
 0x10e   : > { %v1105_v47 = vadd.f32 %v1104_v2, %v1085_v60 }
 0x114   : > { %v1123_v3 = vpop.f32.mrf.mxu2  ;;  %v1087_v40 = vpop.f32.mrf.mxu0 }
 0x115   : > { %v1142_v39 = vpop.f32.mrf.mxu3  ;;  %v1106_v41 = vpop.f32.mrf.mxu1  ;;  %v1124_v50 = vadd.f32 %v1123_v3, %v1105_v47 }
 0x116   : > { %v1107_v55 = vadd.f32 %v1106_v41, %v1087_v40 }
 0x117   : > { %v1143_v51 = vadd.f32 %v1142_v39, %v1124_v50 }
 0x11c   : > { %v1125_v42 = vpop.f32.mrf.mxu2  ;;  %v1090_v44 = vpop.f32.mrf.mxu0 }
 0x11d   : > { %v1144_v43 = vpop.f32.mrf.mxu3  ;;  %v1109_v45 = vpop.f32.mrf.mxu1  ;;  %v1126_v57 = vadd.f32 %v1125_v42, %v1107_v55 }
 0x11e   : > { %v1110_v59 = vadd.f32 %v1109_v45, %v1090_v44 }
 0x11f   : > { %v1145_v58 = vadd.f32 %v1144_v43, %v1126_v57 }
 0x124   : > { %v1128_v46 = vpop.f32.mrf.mxu2  ;;  %v1092_v9 = vpop.f32.mrf.mxu0 }
 0x125   : > { %v1147_v48 = vpop.f32.mrf.mxu3  ;;  %v1111_v49 = vpop.f32.mrf.mxu1  ;;  %v1129_v7 = vadd.f32 %v1128_v46, %v1110_v59 }
 0x126   : > { %v1112_v0 = vadd.f32 %v1111_v49, %v1092_v9 }
 0x127   : > { %v1148_v10 = vadd.f32 %v1147_v48, %v1129_v7 }
 0x12c   : > { %v1130_v8 = vpop.f32.mrf.mxu2  ;;  %v1161_v53 = vpop.f32.mrf.mxu0 }
 0x12d   : > { %v1149_v52 = vpop.f32.mrf.mxu3  ;;  %v1180_v54 = vpop.f32.mrf.mxu1  ;;  %v1162_v56 = vadd.f32 %v1161_v53, %v1143_v51  ;;  %v1131_v5 = vadd.f32 %v1130_v8, %v1112_v0 }
 0x12f   : > { %1266 = vst [vmem:[%s2457_s6] sm:$0xff] %v1162_v56  ;;  %v1150_v6 = vadd.f32 %v1149_v52, %v1131_v5 }
 0x134   : > { %v1199_v61 = vpop.f32.mrf.mxu2  ;;  %v1163_v63 = vpop.f32.mrf.mxu0 }
 0x135   : > { %v1218_v62 = vpop.f32.mrf.mxu3  ;;  %v1182_v1 = vpop.f32.mrf.mxu1  ;;  %v1164_v4 = vadd.f32 %v1163_v63, %v1145_v58  ;;  %v1200_v21 = vadd.f32 %v1199_v61, %v1180_v54 }
 0x136   : > { %v1299_v44 = vld [vmem:[%s2457_s6] sm:$0xff] (%p2015_p6) }
 0x137   : > { %1268 = vst [vmem:[%s2457_s6 + $0x10] sm:$0xff] %v1164_v4  ;;  %v1219_v22 = vadd.f32 %v1218_v62, %v1200_v21 }
 0x138   : > { %1300 = vst [vmem:[%s1286_s8] sm:$0xff] (%p2015_p6), %v1299_v44 }
 0x13c   : > { %v1201_v11 = vpop.f32.mrf.mxu2  ;;  %v1166_v13 = vpop.f32.mrf.mxu0 }
 0x13d   : > { %v1220_v12 = vpop.f32.mrf.mxu3  ;;  %v1185_v14 = vpop.f32.mrf.mxu1  ;;  %v1167_v15 = vadd.f32 %v1166_v13, %v1148_v10  ;;  %v1202_v29 = vadd.f32 %v1201_v11, %v1182_v1 }
 0x13e   : > { %v1303_v46 = vld [vmem:[%s2457_s6 + $0x10] sm:$0xff] (%p2015_p6) }
 0x13f   : > { %1270 = vst [vmem:[%s2457_s6 + $0x20] sm:$0xff] %v1167_v15  ;;  %v1221_v32 = vadd.f32 %v1220_v12, %v1202_v29 }
 0x140   : > { %1304 = vst [vmem:[%s1286_s8 + $0x40] sm:$0xff] (%p2015_p6), %v1303_v46 }
 0x144   : > { %v1204_v16 = vpop.f32.mrf.mxu2  ;;  %v1168_v18 = vpop.f32.mrf.mxu0 }
 0x145   : > { %v1223_v17 = vpop.f32.mrf.mxu3  ;;  %v1187_v19 = vpop.f32.mrf.mxu1  ;;  %v1169_v20 = vadd.f32 %v1168_v18, %v1150_v6  ;;  %v1205_v28 = vadd.f32 %v1204_v16, %v1185_v14 }
 0x146   : > { %v1307_v48 = vld [vmem:[%s2457_s6 + $0x20] sm:$0xff] (%p2015_p6) }
 0x147   : > { %1272 = vst [vmem:[%s2457_s6 + $0x30] sm:$0xff] %v1169_v20  ;;  %v1224_v31 = vadd.f32 %v1223_v17, %v1205_v28 }
 0x148   : > { %1308 = vst [vmem:[%s1286_s8 + $0x80] sm:$0xff] (%p2015_p6), %v1307_v48 }
 0x14c   : > { %v1206_v23 = vpop.f32.mrf.mxu2  ;;  %v1237_v25 = vpop.f32.mrf.mxu0 }
 0x14d   : > { %v1225_v24 = vpop.f32.mrf.mxu3  ;;  %v1256_v26 = vpop.f32.mrf.mxu1  ;;  %v1238_v27 = vadd.f32 %v1237_v25, %v1219_v22  ;;  %v1207_v38 = vadd.f32 %v1206_v23, %v1187_v19 }
 0x14e   : > { %v1311_v49 = vld [vmem:[%s2457_s6 + $0x30] sm:$0xff] (%p2015_p6) }
 0x14f   : > { %v1257_v30 = vadd.f32 %v1256_v26, %v1238_v27  ;;  %v1226_v39 = vadd.f32 %v1225_v24, %v1207_v38  ;;  %1312 = vst [vmem:[%s1286_s8 + $0xc0] sm:$0xff] (%p2015_p6), %v1311_v49 }
 0x151   : > { %1267 = vst [vmem:[%s2457_s6 + $0x8] sm:$0xff] %v1257_v30 }
 0x154   : > { %v1242_v33 = vpop.f32.mrf.mxu2  ;;  %v1239_v36 = vpop.f32.mrf.mxu0 }
 0x155   : > { %v1261_v34 = vpop.f32.mrf.mxu3  ;;  %v1243_v35 = vadd.f32 %v1242_v33, %v1224_v31  ;;  %v1240_v37 = vadd.f32 %v1239_v36, %v1221_v32  ;;  %v1258_v2 = vpop.f32.mrf.mxu1 }
 0x157   : > { %v1262_v60 = vadd.f32 %v1261_v34, %v1243_v35  ;;  %v1259_v3 = vadd.f32 %v1258_v2, %v1240_v37 }
 0x158   : > { %v1301_v45 = vld [vmem:[%s2457_s6 + $0x8] sm:$0xff] (%p2015_p6) }
 0x159   : > { %1271 = vst [vmem:[%s2457_s6 + $0x28] sm:$0xff] %v1262_v60 }
 0x15a   : > { %1269 = vst [vmem:[%s2457_s6 + $0x18] sm:$0xff] %v1259_v3 }
 0x15b   : > { %1302 = vst [vmem:[%s1286_s8 + $0x8] sm:$0xff] (%p2015_p6), %v1301_v45 }
 0x15c   : > { %v1244_v40 = vpop.f32.mrf.mxu2 }
 0x15d   : > { %v1245_v41 = vadd.f32 %v1244_v40, %v1226_v39  ;;  %v1263_v42 = vpop.f32.mrf.mxu3  ;;  %1280 = sbr.rel (!%p2015_p6) target bundleno = 362 (0x16a), region = 70 }
 0x15f   : > { %v1264_v43 = vadd.f32 %v1263_v42, %v1245_v41 }
 0x160   : > { %v1309_v9 = vld [vmem:[%s2457_s6 + $0x28] sm:$0xff] (%p2015_p6) }
 0x161   : > { %1273 = vst [vmem:[%s2457_s6 + $0x38] sm:$0xff] %v1264_v43  ;;  %v1305_v47 = vld [vmem:[%s2457_s6 + $0x18] sm:$0xff] (%p2015_p6) }
 0x162   : > { %1306 = vst [vmem:[%s1286_s8 + $0x48] sm:$0xff] %v1305_v47 }
 0x163   : > { %1310 = vst [vmem:[%s1286_s8 + $0x88] sm:$0xff] %v1309_v9 }
 0x168   : > { %v1313_v50 = vld [vmem:[%s2457_s6 + $0x38] sm:$0xff] }
 0x169   : > { %1314 = vst [vmem:[%s1286_s8 + $0xc8] sm:$0xff] %v1313_v50 }
 0x16a PF: > { %s12_s13 = sadd.s32 1, %s1963_s13   ;;  %s2500_s9 = smov %s1951_s10 }
 0x16b   : > { %p9_p11 = scmp.ge.s32.totalorder %s12_s13, 6   ;;  %s2501_s10 = smov %s2020_s19 }
 0x16c   : > { %s2502_s11 = smov %s1959_s12  ;;  %s2503_s12 = smov %s2505_s14 }
 0x16d   :  { %11 = sbr.rel (!%p9_p11) target bundleno = 3 (0x3), region = 127 }

// kernel: _lambda_.48
= control target key start
LH: loop header
LB: loop body
LE: loop exit
PB: predicated region body
PF: predicated region fallthrough
CT: control target
= control target key end

     0   :  { %s1486_s9 = smov 0   ;;  %s1488_s10 = smov 0   ;;  %s1753_s0 = inlined_call_operand.vmem [shape: bf16[32,3072], index: 0, kind: input, shape index: {}]   ;;  %s1754_s1 = inlined_call_operand.vmem [shape: bf16[3072,256], index: 1, kind: input, shape index: {}]   ;;  %s1755_s2 = inlined_call_operand.vmem [shape: f32[32,256], index: 2, kind: output, shape index: {}]  }
   0x1   :  { %s1490_s11 = smov 0   ;;  %s1492_s12 = smov 0  }
   0x2   :  { %s1494_s13 = smov 0  }
   0x3 LB: > { %s24_s14 = sadd.s32 1, %s1464_s12  ;;  %p47_p1 = scmp.ne.s32.totalorder %s1456_s10, %s1452_s9  ;;  %s1468_s13 = sphi %s1494_s13, %s12_s13   ;;  %s1464_s12 = sphi %s1492_s12, %s1759_s12   ;;  %s1460_s11 = sphi %s1490_s11, %s1758_s11   ;;  %s1456_s10 = sphi %s1488_s10, %s1757_s10   ;;  %s1452_s9 = sphi %s1486_s9, %s1756_s9  }
   0x4   : > { %p25_p0 = scmp.ge.s32.totalorder %s24_s14, 6  ;;  %p48_p2 = scmp.eq.s32.totalorder %s1468_s13, 0 }
   0x5   : > { %s40_s16 = sadd.s32 1, %s1456_s10  ;;  %p1012_p5 = scmp.ge.s32.totalorder %s1468_s13, 6 }
   0x6   : > { %s1761_s14 = smov (%p25_p0, %s24_s14), 0  ;;  %p49_p3 = por %p48_p2, %p47_p1 }
   0x7   : > { %s36_s15 = ssub.s32 %s1464_s12, %s1761_s14  ;;  %129 = sbr.rel (%p1012_p5) target bundleno = 24 (0x18), region = 16 }
   0x8   : > { %p38_p4 = scmp.eq.s32.totalorder %s36_s15, 0 }
   0xa   : > { %s1521_s17 = scalar_select %p38_p4, %s1456_s10, %s40_s16  }
   0xc   : > { %132 = sbr.rel (!%p49_p3) target bundleno = 24 (0x18), region = 20  ;;  %s134_s18 = sand.u32 (%p49_p3), 1, %s1456_s10  }
   0xd   : > { %s1315_s19 = sshll.u32 (%p49_p3), %s1464_s12, 4  ;;  %s1013_s20 = sshll.u32 (%p49_p3), %s134_s18, 6 }
   0xe   : > { %s142_s23 = scalar_lea.vmem (%p49_p3), %s1753_s0, %s1315_s19  ;;  %s136_s24 = scalar_lea.vmem (%p49_p3), [#allocation3], %s1013_s20 }
   0xf   : > { %v155_v0 = vld [vmem:[%s142_s23] sm:$0xff] (%p49_p3)  ;;  %v157_v1 = vld [vmem:[%s142_s23 + $0x8] sm:$0xff] (%p49_p3) }
  0x10   : > { %v159_v2 = vld [vmem:[%s142_s23 + $0x60] sm:$0xff] (%p49_p3)  ;;  %156 = vst [vmem:[%s136_s24] sm:$0xff] (%p49_p3), %v155_v0  ;;  %v161_v3 = vld [vmem:[%s142_s23 + $0x68] sm:$0xff] (%p49_p3) }
  0x11   : > { %158 = vst [vmem:[%s136_s24 + $0x8] sm:$0xff] %v157_v1  ;;  %v163_v4 = vld [vmem:[%s142_s23 + $0xc0] sm:$0xff]  ;;  %v165_v5 = vld [vmem:[%s142_s23 + $0xc8] sm:$0xff] }
  0x12   : > { %160 = vst [vmem:[%s136_s24 + $0x10] sm:$0xff] %v159_v2  ;;  %v167_v6 = vld [vmem:[%s142_s23 + $0x120] sm:$0xff]  ;;  %v169_v7 = vld [vmem:[%s142_s23 + $0x128] sm:$0xff] }
  0x13   : > { %162 = vst [vmem:[%s136_s24 + $0x18] sm:$0xff] %v161_v3 }
  0x14   : > { %164 = vst [vmem:[%s136_s24 + $0x20] sm:$0xff] %v163_v4 }
  0x15   : > { %166 = vst [vmem:[%s136_s24 + $0x28] sm:$0xff] %v165_v5 }
  0x16   : > { %168 = vst [vmem:[%s136_s24 + $0x30] sm:$0xff] %v167_v6 }
  0x17   : > { %170 = vst [vmem:[%s136_s24 + $0x38] sm:$0xff] %v169_v7 }
  0x18 PF: > { %p1016_p6 = scmp.ge.s32.totalorder %s1468_s13, 1  ;;  %p190_p7 = scmp.lt.s32.totalorder %s1468_s13, 7 }
  0x1a   : > { %p191_p8 = pnand %p1016_p6, %p190_p7 }
  0x1b   : > { %s197_s25 = sand.u32 (!%p191_p8), 1, %s1452_s9   ;;  %s1018_s26 = sshll.u32 (!%p191_p8), %s1460_s11, 6 }
  0x1c   : > { %194 = sbr.rel (%p191_p8) target bundleno = 287 (0x11f), region = 47  ;;  %s1017_s27 = sshll.u32 (!%p191_p8), %s197_s25, 6 }
  0x1d   : > { %p237_p9 = scmp.lt.s32.totalorder (!%p191_p8), %s1018_s26, 383  ;;  %s1538_s4 = scalar_lea.vmem (!%p191_p8), [#allocation3], %s1017_s27 }
  0x1e   : > { %p1021_p10 = scmp.ne.s32.totalorder (!%p191_p8), %s1460_s11, 0 }
  0x21   : > { %s1763_s26 = smov (!%p237_p9, %s1018_s26), 383  ;;  %262 = sbr.rel (%p1021_p10) target bundleno = 47 (0x2f), region = 55 }
  0x22   : > { %s1316_s28 = sshll.u32 %s1763_s26, 3 }
  0x23   : > { %s1536_s3 = scalar_lea.vmem %s1754_s1, %s1316_s28 }
  0x26   : > { %v1470_v8 = vmov 0.0  }
  0x27   : > { %263 = vst [vmem:[#allocation2 + $0x30] sm:$0xff] %v1470_v8 }
  0x28   : > { %264 = vst [vmem:[#allocation2] sm:$0xff] %v1470_v8 }
  0x29   : > { %265 = vst [vmem:[#allocation2 + $0x18] sm:$0xff] %v1470_v8 }
  0x2a   : > { %266 = vst [vmem:[#allocation2 + $0x10] sm:$0xff] %v1470_v8 }
  0x2b   : > { %267 = vst [vmem:[#allocation2 + $0x8] sm:$0xff] %v1470_v8 }
  0x2c   : > { %268 = vst [vmem:[#allocation2 + $0x20] sm:$0xff] %v1470_v8 }
  0x2d   : > { %269 = vst [vmem:[#allocation2 + $0x28] sm:$0xff] %v1470_v8 }
  0x2e   : > { %270 = vst [vmem:[#allocation2 + $0x38] sm:$0xff] %v1470_v8 }
  0x2f PF: > { %v1112_v9 = vld [vmem:[%s1536_s3 + $0x70] sm:$0xf]  ;;  %v1340_v10 = vld [vmem:[%s1536_s3 + $0x74] sm:$0xf0]  ;;  %v1104_v20 = vld [vmem:[%s1536_s3 + $0x60] sm:$0xf] }
  0x30   : > { %v1176_v11 = vld [vmem:[%s1536_s3 + $0xf0] sm:$0xf]  ;;  %v1113_v12 = vor.u32 %v1340_v10, %v1112_v9  ;;  %v1356_v13 = vld [vmem:[%s1536_s3 + $0xf4] sm:$0xf0]  ;;  %v1338_v22 = vld [vmem:[%s1536_s3 + $0x64] sm:$0xf0] }
  0x31   : > { %v1240_v14 = vld [vmem:[%s1536_s3 + $0x170] sm:$0xf]  ;;  %v1372_v15 = vld [vmem:[%s1536_s3 + $0x174] sm:$0xf0]  ;;  %v1177_v16 = vor.u32 %v1356_v13, %v1176_v11  ;;  %v1168_v23 = vld [vmem:[%s1536_s3 + $0xe0] sm:$0xf]  ;;  %v1105_v25 = vor.u32 %v1338_v22, %v1104_v20 }
  0x32   : > { %v1241_v17 = vor.u32 %v1372_v15, %v1240_v14  ;;  %v1304_v18 = vld [vmem:[%s1536_s3 + $0x1f0] sm:$0xf]  ;;  %v1388_v19 = vld [vmem:[%s1536_s3 + $0x1f4] sm:$0xf0]  ;;  %711 = vmatpush.bf16.msra.mxu0 %v1113_v12  ;;  %v1354_v24 = vld [vmem:[%s1536_s3 + $0xe4] sm:$0xf0] }
  0x33   : > { %v1305_v21 = vor.u32 %v1388_v19, %v1304_v18  ;;  %730 = vmatpush.bf16.msra.mxu1 %v1177_v16  ;;  %v1169_v26 = vor.u32 %v1354_v24, %v1168_v23  ;;  %v1232_v27 = vld [vmem:[%s1536_s3 + $0x160] sm:$0xf]  ;;  %v1370_v28 = vld [vmem:[%s1536_s3 + $0x164] sm:$0xf0]  ;;  %v1096_v32 = vld [vmem:[%s1536_s3 + $0x50] sm:$0xf] }
  0x34   : > { %749 = vmatpush.bf16.msra.mxu2 %v1241_v17  ;;  %v1296_v29 = vld [vmem:[%s1536_s3 + $0x1e0] sm:$0xf]  ;;  %v1233_v30 = vor.u32 %v1370_v28, %v1232_v27  ;;  %v1386_v31 = vld [vmem:[%s1536_s3 + $0x1e4] sm:$0xf0]  ;;  %v1336_v33 = vld [vmem:[%s1536_s3 + $0x54] sm:$0xf0] }
  0x35   : > { %768 = vmatpush.bf16.msra.mxu3 %v1305_v21  ;;  %v1297_v34 = vor.u32 %v1386_v31, %v1296_v29  ;;  %v1160_v35 = vld [vmem:[%s1536_s3 + $0xd0] sm:$0xf]  ;;  %v1352_v36 = vld [vmem:[%s1536_s3 + $0xd4] sm:$0xf0]  ;;  %v1097_v38 = vor.u32 %v1336_v33, %v1096_v32  ;;  %v1088_v44 = vld [vmem:[%s1536_s3 + $0x40] sm:$0xf] }
  0x36   : > { %v1224_v37 = vld [vmem:[%s1536_s3 + $0x150] sm:$0xf]  ;;  %712 = vmatpush.bf16.msra.mxu0 %v1105_v25  ;;  %v1368_v39 = vld [vmem:[%s1536_s3 + $0x154] sm:$0xf0]  ;;  %v1161_v42 = vor.u32 %v1352_v36, %v1160_v35  ;;  %v1334_v45 = vld [vmem:[%s1536_s3 + $0x44] sm:$0xf0] }
  0x37   : > { %v1288_v40 = vld [vmem:[%s1536_s3 + $0x1d0] sm:$0xf]  ;;  %v1384_v41 = vld [vmem:[%s1536_s3 + $0x1d4] sm:$0xf0]  ;;  %731 = vmatpush.bf16.msra.mxu1 %v1169_v26  ;;  %v1225_v43 = vor.u32 %v1368_v39, %v1224_v37  ;;  %v1152_v46 = vld [vmem:[%s1536_s3 + $0xc0] sm:$0xf]  ;;  %v1089_v53 = vor.u32 %v1334_v45, %v1088_v44 }
  0x38   : > { %750 = vmatpush.bf16.msra.mxu2 %v1233_v30  ;;  %v1289_v47 = vor.u32 %v1384_v41, %v1288_v40  ;;  %v1350_v48 = vld [vmem:[%s1536_s3 + $0xc4] sm:$0xf0]  ;;  %v1216_v49 = vld [vmem:[%s1536_s3 + $0x140] sm:$0xf]  ;;  %v1080_v56 = vld [vmem:[%s1536_s3 + $0x30] sm:$0xf] }
  0x39   : > { %769 = vmatpush.bf16.msra.mxu3 %v1297_v34  ;;  %v1366_v50 = vld [vmem:[%s1536_s3 + $0x144] sm:$0xf0]  ;;  %v1280_v51 = vld [vmem:[%s1536_s3 + $0x1c0] sm:$0xf]  ;;  %v1153_v54 = vor.u32 %v1350_v48, %v1152_v46  ;;  %v1332_v57 = vld [vmem:[%s1536_s3 + $0x34] sm:$0xf0] }
  0x3a   : > { %v1382_v52 = vld [vmem:[%s1536_s3 + $0x1c4] sm:$0xf0]  ;;  %713 = vmatpush.bf16.msra.mxu0 %v1097_v38  ;;  %v1217_v55 = vor.u32 %v1366_v50, %v1216_v49  ;;  %v1144_v58 = vld [vmem:[%s1536_s3 + $0xb0] sm:$0xf]  ;;  %v1348_v60 = vld [vmem:[%s1536_s3 + $0xb4] sm:$0xf0]  ;;  %v1081_v1 = vor.u32 %v1332_v57, %v1080_v56 }
  0x3b   : > { %732 = vmatpush.bf16.msra.mxu1 %v1161_v42  ;;  %v1281_v59 = vor.u32 %v1382_v52, %v1280_v51  ;;  %v1208_v61 = vld [vmem:[%s1536_s3 + $0x130] sm:$0xf]  ;;  %v1364_v62 = vld [vmem:[%s1536_s3 + $0x134] sm:$0xf0]  ;;  %v1145_v2 = vor.u32 %v1348_v60, %v1144_v58  ;;  %v1072_v4 = vld [vmem:[%s1536_s3 + $0x20] sm:$0xf] }
  0x3c   : > { %751 = vmatpush.bf16.msra.mxu2 %v1225_v43  ;;  %v1272_v63 = vld [vmem:[%s1536_s3 + $0x1b0] sm:$0xf]  ;;  %v1380_v0 = vld [vmem:[%s1536_s3 + $0x1b4] sm:$0xf0]  ;;  %v1209_v3 = vor.u32 %v1364_v62, %v1208_v61  ;;  %v1330_v5 = vld [vmem:[%s1536_s3 + $0x24] sm:$0xf0] }
  0x3d   : > { %770 = vmatpush.bf16.msra.mxu3 %v1289_v47  ;;  %v1136_v6 = vld [vmem:[%s1536_s3 + $0xa0] sm:$0xf]  ;;  %v1273_v7 = vor.u32 %v1380_v0, %v1272_v63  ;;  %v1346_v8 = vld [vmem:[%s1536_s3 + $0xa4] sm:$0xf0]  ;;  %v1073_v13 = vor.u32 %v1330_v5, %v1072_v4  ;;  %v1064_v16 = vld [vmem:[%s1536_s3 + $0x10] sm:$0xf] }
  0x3e   : > { %714 = vmatpush.bf16.msra.mxu0 %v1089_v53  ;;  %v1200_v9 = vld [vmem:[%s1536_s3 + $0x120] sm:$0xf]  ;;  %v1362_v10 = vld [vmem:[%s1536_s3 + $0x124] sm:$0xf0]  ;;  %v1137_v14 = vor.u32 %v1346_v8, %v1136_v6  ;;  %v1328_v17 = vld [vmem:[%s1536_s3 + $0x14] sm:$0xf0] }
  0x3f   : > { %733 = vmatpush.bf16.msra.mxu1 %v1153_v54  ;;  %v1264_v11 = vld [vmem:[%s1536_s3 + $0x1a0] sm:$0xf]  ;;  %v1378_v12 = vld [vmem:[%s1536_s3 + $0x1a4] sm:$0xf0]  ;;  %v1201_v15 = vor.u32 %v1362_v10, %v1200_v9  ;;  %v1128_v18 = vld [vmem:[%s1536_s3 + $0x90] sm:$0xf]  ;;  %v1065_v26 = vor.u32 %v1328_v17, %v1064_v16 }
  0x40   : > { %752 = vmatpush.bf16.msra.mxu2 %v1217_v55  ;;  %v1265_v19 = vor.u32 %v1378_v12, %v1264_v11  ;;  %v1344_v20 = vld [vmem:[%s1536_s3 + $0x94] sm:$0xf0]  ;;  %v1192_v21 = vld [vmem:[%s1536_s3 + $0x110] sm:$0xf]  ;;  %v1056_v25 = vld [vmem:[%s1536_s3] sm:$0xf] }
  0x41   : > { %771 = vmatpush.bf16.msra.mxu3 %v1281_v59  ;;  %v1360_v22 = vld [vmem:[%s1536_s3 + $0x114] sm:$0xf0]  ;;  %v1256_v23 = vld [vmem:[%s1536_s3 + $0x190] sm:$0xf]  ;;  %v1326_v27 = vld [vmem:[%s1536_s3 + $0x4] sm:$0xf0]  ;;  %v1129_v30 = vor.u32 %v1344_v20, %v1128_v18 }
  0x42   : > { %715 = vmatpush.bf16.msra.mxu0 %v1081_v1  ;;  %v1376_v24 = vld [vmem:[%s1536_s3 + $0x194] sm:$0xf0]  ;;  %v1120_v28 = vld [vmem:[%s1536_s3 + $0x80] sm:$0xf]  ;;  %v1342_v29 = vld [vmem:[%s1536_s3 + $0x84] sm:$0xf0]  ;;  %v1193_v31 = vor.u32 %v1360_v22, %v1192_v21  ;;  %v1057_v43 = vor.u32 %v1326_v27, %v1056_v25 }
  0x43   : > { %734 = vmatpush.bf16.msra.mxu1 %v1145_v2  ;;  %v1184_v32 = vld [vmem:[%s1536_s3 + $0x100] sm:$0xf]  ;;  %v1358_v33 = vld [vmem:[%s1536_s3 + $0x104] sm:$0xf0]  ;;  %v1257_v35 = vor.u32 %v1376_v24, %v1256_v23  ;;  %v1319_v38 = vld [vmem:[%s1538_s4 + $0xc] sm:$0xf0]  ;;  %v1121_v47 = vor.u32 %v1342_v29, %v1120_v28 }
  0x44   : > { %753 = vmatpush.bf16.msra.mxu2 %v1209_v3  ;;  %v1248_v34 = vld [vmem:[%s1536_s3 + $0x180] sm:$0xf]  ;;  %v1374_v36 = vld [vmem:[%s1536_s3 + $0x184] sm:$0xf0]  ;;  %v1317_v39 = vld [vmem:[%s1538_s4 + $0x4] sm:$0xf]  ;;  %v1185_v48 = vor.u32 %v1358_v33, %v1184_v32 }
  0x45   : > { %772 = vmatpush.bf16.msra.mxu3 %v1273_v7  ;;  %v1024_v37 = vld [vmem:[%s1538_s4] sm:$0xf]  ;;  %v1026_v40 = vld [vmem:[%s1538_s4 + $0x10] sm:$0xf0]  ;;  %v1242_v42 = vld [vmem:[%s1536_s3 + $0x178] sm:$0xf0]  ;;  %v1249_v52 = vor.u32 %v1374_v36, %v1248_v34 }
  0x46   : > { %716 = vmatpush.bf16.msra.mxu0 %v1073_v13  ;;  %v1371_v41 = vld [vmem:[%s1536_s3 + $0x174] sm:$0xf]  ;;  %v1032_v44 = vld [vmem:[%s1538_s4 + $0x8] sm:$0xf]  ;;  %v1178_v46 = vld [vmem:[%s1536_s3 + $0xf8] sm:$0xf0]  ;;  %v1620_v57 = vor.u32 %v1319_v38, %v1024_v37  ;;  %v1625_v62 = vor.u32 %v1317_v39, %v1026_v40 }
  0x47   : > { %735 = vmatpush.bf16.msra.mxu1 %v1137_v14  ;;  %v1355_v45 = vld [vmem:[%s1536_s3 + $0xf4] sm:$0xf]  ;;  %v1320_v49 = vld [vmem:[%s1538_s4 + $0x14] sm:$0xf0]  ;;  %v1318_v50 = vld [vmem:[%s1538_s4 + $0xc] sm:$0xf]  ;;  %v1245_v53 = vor.u32 %v1371_v41, %v1242_v42 }
  0x48   : > { %754 = vmatpush.bf16.msra.mxu2 %v1201_v15  ;;  %v1034_v51 = vld [vmem:[%s1538_s4 + $0x18] sm:$0xf0]  ;;  %v1339_v54 = vld [vmem:[%s1536_s3 + $0x74] sm:$0xf]  ;;  %v1181_v58 = vor.u32 %v1355_v45, %v1178_v46  ;;  %v1369_v60 = vld [vmem:[%s1536_s3 + $0x164] sm:$0xf]  ;;  %v1627_v63 = vor.u32 %v1320_v49, %v1032_v44 }
  0x49   : > { %773 = vmatpush.bf16.msra.mxu3 %v1265_v19  ;;  %v1114_v55 = vld [vmem:[%s1536_s3 + $0x78] sm:$0xf0]  ;;  %v1387_v56 = vld [vmem:[%s1536_s3 + $0x1f4] sm:$0xf]  ;;  %v1234_v61 = vld [vmem:[%s1536_s3 + $0x168] sm:$0xf0]  ;;  %v1631_v2 = vor.u32 %v1318_v50, %v1034_v51 }
  0x4a   : > { %717 = vmatpush.bf16.msra.mxu0 %v1065_v26  ;;  %v1306_v59 = vld [vmem:[%s1536_s3 + $0x1f8] sm:$0xf0]  ;;  %v1353_v0 = vld [vmem:[%s1536_s3 + $0xe4] sm:$0xf]  ;;  %v1170_v1 = vld [vmem:[%s1536_s3 + $0xe8] sm:$0xf0]  ;;  %v1117_v3 = vor.u32 %v1339_v54, %v1114_v55  ;;  %v1237_v5 = vor.u32 %v1369_v60, %v1234_v61 }
  0x4b   : > { %736 = vmatpush.bf16.msra.mxu1 %v1129_v30  ;;  %v1309_v4 = vor.u32 %v1387_v56, %v1306_v59  ;;  %v1337_v6 = vld [vmem:[%s1536_s3 + $0x64] sm:$0xf]  ;;  %v1106_v7 = vld [vmem:[%s1536_s3 + $0x68] sm:$0xf0]  ;;  %v1173_v9 = vor.u32 %v1353_v0, %v1170_v1  ;;  %v1367_v11 = vld [vmem:[%s1536_s3 + $0x154] sm:$0xf] }
  0x4c   : > { %755 = vmatpush.bf16.msra.mxu2 %v1193_v31  ;;  %v1385_v8 = vld [vmem:[%s1536_s3 + $0x1e4] sm:$0xf]  ;;  %v1298_v10 = vld [vmem:[%s1536_s3 + $0x1e8] sm:$0xf0]  ;;  %v1226_v12 = vld [vmem:[%s1536_s3 + $0x158] sm:$0xf0]  ;;  %v1109_v15 = vor.u32 %v1337_v6, %v1106_v7 }
  0x4d   : > { %774 = vmatpush.bf16.msra.mxu3 %v1257_v35  ;;  %v1351_v13 = vld [vmem:[%s1536_s3 + $0xd4] sm:$0xf]  ;;  %v1162_v14 = vld [vmem:[%s1536_s3 + $0xd8] sm:$0xf0]  ;;  %v1301_v16 = vor.u32 %v1385_v8, %v1298_v10  ;;  %v1229_v17 = vor.u32 %v1367_v11, %v1226_v12  ;;  %v1365_v23 = vld [vmem:[%s1536_s3 + $0x144] sm:$0xf] }
  0x4e   : > { %718 = vmatpush.bf16.msra.mxu0 %v1057_v43  ;;  %v1335_v18 = vld [vmem:[%s1536_s3 + $0x54] sm:$0xf]  ;;  %v1098_v19 = vld [vmem:[%s1536_s3 + $0x58] sm:$0xf0]  ;;  %v1165_v21 = vor.u32 %v1351_v13, %v1162_v14  ;;  %v1218_v24 = vld [vmem:[%s1536_s3 + $0x148] sm:$0xf0] }
  0x4f   : > { %737 = vmatpush.bf16.msra.mxu1 %v1121_v47  ;;  %v1383_v20 = vld [vmem:[%s1536_s3 + $0x1d4] sm:$0xf]  ;;  %v1290_v22 = vld [vmem:[%s1536_s3 + $0x1d8] sm:$0xf0]  ;;  %v1349_v25 = vld [vmem:[%s1536_s3 + $0xc4] sm:$0xf]  ;;  %v1101_v27 = vor.u32 %v1335_v18, %v1098_v19  ;;  %v1221_v32 = vor.u32 %v1365_v23, %v1218_v24 }
  0x50   : > { %756 = vmatpush.bf16.msra.mxu2 %v1185_v48  ;;  %v1154_v26 = vld [vmem:[%s1536_s3 + $0xc8] sm:$0xf0]  ;;  %v1333_v28 = vld [vmem:[%s1536_s3 + $0x44] sm:$0xf]  ;;  %v1293_v31 = vor.u32 %v1383_v20, %v1290_v22  ;;  %v1040_v34 = vld [vmem:[%s1538_s4 + $0x20] sm:$0xf] }
  0x51   : > { %775 = vmatpush.bf16.msra.mxu3 %v1249_v52  ;;  %719 = vmatmul.bf16.vlgmr.msra.gmra.mxu0 %v1620_v57  ;;  %v1090_v29 = vld [vmem:[%s1536_s3 + $0x48] sm:$0xf0]  ;;  %v1381_v30 = vld [vmem:[%s1536_s3 + $0x1c4] sm:$0xf]  ;;  %v1323_v35 = vld [vmem:[%s1538_s4 + $0x2c] sm:$0xf0]  ;;  %v1157_v36 = vor.u32 %v1349_v25, %v1154_v26 }
  0x52   : > { %738 = vmatmul.bf16.vlgmr.msra.gmra.mxu1 %v1625_v62  ;;  %787 = vmatpush.bf16.msrb.mxu0 %v1117_v3  ;;  %v1282_v33 = vld [vmem:[%s1536_s3 + $0x1c8] sm:$0xf0]  ;;  %v1321_v37 = vld [vmem:[%s1538_s4 + $0x24] sm:$0xf]  ;;  %v1042_v38 = vld [vmem:[%s1538_s4 + $0x30] sm:$0xf0]  ;;  %v1093_v44 = vor.u32 %v1333_v28, %v1090_v29 }
  0x53   : > { %806 = vmatpush.bf16.msrb.mxu1 %v1181_v58  ;;  %757 = vmatmul.bf16.vlgmr.msra.gmra.mxu2 %v1627_v63  ;;  %v1363_v39 = vld [vmem:[%s1536_s3 + $0x134] sm:$0xf]  ;;  %v1210_v40 = vld [vmem:[%s1536_s3 + $0x138] sm:$0xf0]  ;;  %v1048_v41 = vld [vmem:[%s1538_s4 + $0x28] sm:$0xf]  ;;  %v1285_v48 = vor.u32 %v1381_v30, %v1282_v33  ;;  %v1677_v59 = vor.u32 %v1321_v37, %v1042_v38 }
  0x54   : > { %825 = vmatpush.bf16.msrb.mxu2 %v1245_v53  ;;  %776 = vmatmul.bf16.vlgmr.msra.gmra.mxu3 %v1631_v2  ;;  %v1347_v42 = vld [vmem:[%s1536_s3 + $0xb4] sm:$0xf]  ;;  %v1146_v43 = vld [vmem:[%s1536_s3 + $0xb8] sm:$0xf0]  ;;  %v1324_v45 = vld [vmem:[%s1538_s4 + $0x34] sm:$0xf0]  ;;  %v1213_v49 = vor.u32 %v1363_v39, %v1210_v40  ;;  %v1672_v53 = vor.u32 %v1323_v35, %v1040_v34 }
  0x55   : > { %844 = vmatpush.bf16.msrb.mxu3 %v1309_v4  ;;  %v1322_v46 = vld [vmem:[%s1538_s4 + $0x2c] sm:$0xf]  ;;  %v1050_v47 = vld [vmem:[%s1538_s4 + $0x38] sm:$0xf0]  ;;  %v1331_v50 = vld [vmem:[%s1536_s3 + $0x34] sm:$0xf]  ;;  %v1149_v54 = vor.u32 %v1347_v42, %v1146_v43  ;;  %v1679_v60 = vor.u32 %v1324_v45, %v1048_v41 }
  0x56   : > { %788 = vmatpush.bf16.msrb.mxu0 %v1109_v15  ;;  %v1082_v51 = vld [vmem:[%s1536_s3 + $0x38] sm:$0xf0]  ;;  %v1379_v52 = vld [vmem:[%s1536_s3 + $0x1b4] sm:$0xf]  ;;  %v1361_v56 = vld [vmem:[%s1536_s3 + $0x124] sm:$0xf]  ;;  %v1053_v1 = vor.u32 %v1322_v46, %v1050_v47 }
  0x57   : > { %807 = vmatpush.bf16.msrb.mxu1 %v1173_v9  ;;  %v1274_v55 = vld [vmem:[%s1536_s3 + $0x1b8] sm:$0xf0]  ;;  %v1202_v58 = vld [vmem:[%s1536_s3 + $0x128] sm:$0xf0]  ;;  %v1345_v61 = vld [vmem:[%s1536_s3 + $0xa4] sm:$0xf]  ;;  %v1085_v3 = vor.u32 %v1331_v50, %v1082_v51 }
  0x58   : > { %826 = vmatpush.bf16.msrb.mxu2 %v1237_v5  ;;  %v1138_v0 = vld [vmem:[%s1536_s3 + $0xa8] sm:$0xf0]  ;;  %v1277_v4 = vor.u32 %v1379_v52, %v1274_v55  ;;  %v1205_v5 = vor.u32 %v1361_v56, %v1202_v58  ;;  %v1329_v6 = vld [vmem:[%s1536_s3 + $0x24] sm:$0xf]  ;;  %v1359_v11 = vld [vmem:[%s1536_s3 + $0x114] sm:$0xf] }
  0x59   : > { %845 = vmatpush.bf16.msrb.mxu3 %v1301_v16  ;;  %v1074_v7 = vld [vmem:[%s1536_s3 + $0x28] sm:$0xf0]  ;;  %v1377_v8 = vld [vmem:[%s1536_s3 + $0x1a4] sm:$0xf]  ;;  %v1141_v9 = vor.u32 %v1345_v61, %v1138_v0  ;;  %v1194_v12 = vld [vmem:[%s1536_s3 + $0x118] sm:$0xf0] }
  0x5a   : > { %789 = vmatpush.bf16.msrb.mxu0 %v1101_v27  ;;  %v1266_v10 = vld [vmem:[%s1536_s3 + $0x1a8] sm:$0xf0]  ;;  %v1343_v13 = vld [vmem:[%s1536_s3 + $0x94] sm:$0xf]  ;;  %v1130_v14 = vld [vmem:[%s1536_s3 + $0x98] sm:$0xf0]  ;;  %v1077_v15 = vor.u32 %v1329_v6, %v1074_v7 }
  0x5b   : > { %808 = vmatpush.bf16.msrb.mxu1 %v1165_v21  ;;  %v1269_v16 = vor.u32 %v1377_v8, %v1266_v10  ;;  %v1327_v18 = vld [vmem:[%s1536_s3 + $0x14] sm:$0xf]  ;;  %v1066_v19 = vld [vmem:[%s1536_s3 + $0x18] sm:$0xf0]  ;;  %v1133_v21 = vor.u32 %v1343_v13, %v1130_v14  ;;  %v1357_v23 = vld [vmem:[%s1536_s3 + $0x104] sm:$0xf] }
  0x5c   : > { %827 = vmatpush.bf16.msrb.mxu2 %v1229_v17  ;;  %v1197_v17 = vor.u32 %v1359_v11, %v1194_v12  ;;  %v1375_v20 = vld [vmem:[%s1536_s3 + $0x194] sm:$0xf]  ;;  %v1258_v22 = vld [vmem:[%s1536_s3 + $0x198] sm:$0xf0]  ;;  %v1186_v24 = vld [vmem:[%s1536_s3 + $0x108] sm:$0xf0]  ;;  %v1069_v27 = vor.u32 %v1327_v18, %v1066_v19 }
  0x5d   : > { %846 = vmatpush.bf16.msrb.mxu3 %v1293_v31  ;;  %v1341_v25 = vld [vmem:[%s1536_s3 + $0x84] sm:$0xf]  ;;  %v1122_v26 = vld [vmem:[%s1536_s3 + $0x88] sm:$0xf0]  ;;  %v1261_v28 = vor.u32 %v1375_v20, %v1258_v22  ;;  %v1189_v29 = vor.u32 %v1357_v23, %v1186_v24  ;;  %v271_v43 = vld [vmem:[#allocation2 + $0x30] sm:$0xff]  ;;  %p1310_p11 = scmp.ne.s32.totalorder %s1460_s11, 5 }
  0x5e   : > { %790 = vmatpush.bf16.msrb.mxu0 %v1093_v44  ;;  %v1325_v30 = vld [vmem:[%s1536_s3 + $0x4] sm:$0xf]  ;;  %v1058_v31 = vld [vmem:[%s1536_s3 + $0x8] sm:$0xf0]  ;;  %v274_v24 = vld [vmem:[#allocation2 + $0x10] sm:$0xff] }
  0x5f   : > { %809 = vmatpush.bf16.msrb.mxu1 %v1157_v36  ;;  %v1373_v33 = vld [vmem:[%s1536_s3 + $0x184] sm:$0xf]  ;;  %v1250_v34 = vld [vmem:[%s1536_s3 + $0x188] sm:$0xf0]  ;;  %v1061_v35 = vor.u32 %v1325_v30, %v1058_v31 }
  0x60   : > { %828 = vmatpush.bf16.msrb.mxu2 %v1221_v32  ;;  %v1125_v32 = vor.u32 %v1341_v25, %v1122_v26  ;;  %v1253_v36 = vor.u32 %v1373_v33, %v1250_v34  ;;  %v277_v6 = vld [vmem:[#allocation2 + $0x28] sm:$0xff]  ;;  %v276_v33 = vld [vmem:[#allocation2 + $0x20] sm:$0xff] }
  0x61   : > { %847 = vmatpush.bf16.msrb.mxu3 %v1285_v48  ;;  %724 = vmatmul.bf16.gmra.mxu0 %v1672_v53 }
  0x62   : > { %743 = vmatmul.bf16.gmra.mxu1 %v1677_v59  ;;  %791 = vmatpush.bf16.msrb.mxu0 %v1085_v3 }
  0x63   : > { %810 = vmatpush.bf16.msrb.mxu1 %v1149_v54  ;;  %762 = vmatmul.bf16.gmra.mxu2 %v1679_v60 }
  0x64   : > { %829 = vmatpush.bf16.msrb.mxu2 %v1213_v49  ;;  %781 = vmatmul.bf16.gmra.mxu3 %v1053_v1  ;;  %v273_v49 = vld [vmem:[#allocation2 + $0x18] sm:$0xff] }
  0x65   : > { %848 = vmatpush.bf16.msrb.mxu3 %v1277_v4 }
  0x66   : > { %792 = vmatpush.bf16.msrb.mxu0 %v1077_v15 }
  0x67   : > { %811 = vmatpush.bf16.msrb.mxu1 %v1141_v9 }
  0x68   : > { %830 = vmatpush.bf16.msrb.mxu2 %v1205_v5 }
  0x69   : > { %849 = vmatpush.bf16.msrb.mxu3 %v1269_v16 }
  0x6a   : > { %793 = vmatpush.bf16.msrb.mxu0 %v1069_v27 }
  0x6b   : > { %812 = vmatpush.bf16.msrb.mxu1 %v1133_v21 }
  0x6c   : > { %831 = vmatpush.bf16.msrb.mxu2 %v1197_v17  ;;  %v272_v17 = vld [vmem:[#allocation2] sm:$0xff] }
  0x6d   : > { %850 = vmatpush.bf16.msrb.mxu3 %v1261_v28 }
  0x6e   : > { %794 = vmatpush.bf16.msrb.mxu0 %v1061_v35 }
  0x6f   : > { %813 = vmatpush.bf16.msrb.mxu1 %v1125_v32 }
  0x70   : > { %832 = vmatpush.bf16.msrb.mxu2 %v1189_v29 }
  0x71   : > { %851 = vmatpush.bf16.msrb.mxu3 %v1253_v36  ;;  %795 = vmatmul.bf16.vlgmr.msrb.gmra.mxu0 %v1620_v57 }
  0x72   : > { %814 = vmatmul.bf16.vlgmr.msrb.gmra.mxu1 %v1625_v62 }
  0x73   : > { %833 = vmatmul.bf16.vlgmr.msrb.gmra.mxu2 %v1627_v63 }
  0x74   : > { %852 = vmatmul.bf16.vlgmr.msrb.gmra.mxu3 %v1631_v2 }
  0x81   : > { %800 = vmatmul.bf16.gmra.mxu0 %v1672_v53 }
  0x82   : > { %819 = vmatmul.bf16.gmra.mxu1 %v1677_v59  ;;  %v275_v59 = vld [vmem:[#allocation2 + $0x8] sm:$0xff] }
  0x83   : > { %838 = vmatmul.bf16.gmra.mxu2 %v1679_v60 }
  0x84   : > { %857 = vmatmul.bf16.gmra.mxu3 %v1053_v1 }
  0xce   : > { %v720_v37 = vpop.f32.mrf.mxu0 }
  0xcf   : > { %v739_v38 = vpop.f32.mrf.mxu1 }
  0xd0   : > { %v740_v39 = vadd.f32 %v739_v38, %v720_v37 }
  0xd6   : > { %v758_v40 = vpop.f32.mrf.mxu2  ;;  %v722_v57 = vpop.f32.mrf.mxu0 }
  0xd7   : > { %v759_v41 = vadd.f32 %v758_v40, %v740_v39  ;;  %v777_v42 = vpop.f32.mrf.mxu3  ;;  %v741_v62 = vpop.f32.mrf.mxu1 }
  0xd8   : > { %v742_v2 = vadd.f32 %v741_v62, %v722_v57 }
  0xd9   : > { %v778_v44 = vadd.f32 %v777_v42, %v759_v41  ;;  %v278_v41 = vld [vmem:[#allocation2 + $0x38] sm:$0xff] }
  0xdb   : > { %v863_v63 = vadd.f32 %v778_v44, %v271_v43 }
  0xdd   : > { %871 = vst [vmem:[#allocation2 + $0x30] sm:$0xff] %v863_v63 }
  0xde   : > { %v760_v45 = vpop.f32.mrf.mxu2  ;;  %v725_v48 = vpop.f32.mrf.mxu0 }
  0xdf   : > { %v761_v46 = vadd.f32 %v760_v45, %v742_v2  ;;  %v779_v47 = vpop.f32.mrf.mxu3  ;;  %v744_v50 = vpop.f32.mrf.mxu1 }
  0xe0   : > { %v745_v53 = vadd.f32 %v744_v50, %v725_v48 }
  0xe1   : > { %v780_v51 = vadd.f32 %v779_v47, %v761_v46 }
  0xe3   : > { %v865_v52 = vadd.f32 %v780_v51, %v273_v49 }
  0xe5   : > { %873 = vst [vmem:[#allocation2 + $0x18] sm:$0xff] %v865_v52 }
  0xe6   : > { %v763_v54 = vpop.f32.mrf.mxu2  ;;  %v727_v58 = vpop.f32.mrf.mxu0 }
  0xe7   : > { %v764_v55 = vadd.f32 %v763_v54, %v745_v53  ;;  %v782_v56 = vpop.f32.mrf.mxu3  ;;  %v746_v60 = vpop.f32.mrf.mxu1 }
  0xe8   : > { %v747_v1 = vadd.f32 %v746_v60, %v727_v58 }
  0xe9   : > { %v783_v61 = vadd.f32 %v782_v56, %v764_v55 }
  0xeb   : > { %v867_v0 = vadd.f32 %v783_v61, %v275_v59 }
  0xed   : > { %875 = vst [vmem:[#allocation2 + $0x8] sm:$0xff] %v867_v0 }
  0xee   : > { %v765_v3 = vpop.f32.mrf.mxu2  ;;  %v796_v7 = vpop.f32.mrf.mxu0 }
  0xef   : > { %v766_v4 = vadd.f32 %v765_v3, %v747_v1  ;;  %v784_v5 = vpop.f32.mrf.mxu3  ;;  %v815_v8 = vpop.f32.mrf.mxu1 }
  0xf0   : > { %v816_v11 = vadd.f32 %v815_v8, %v796_v7 }
  0xf1   : > { %v785_v9 = vadd.f32 %v784_v5, %v766_v4 }
  0xf3   : > { %v869_v10 = vadd.f32 %v785_v9, %v277_v6 }
  0xf5   : > { %877 = vst [vmem:[#allocation2 + $0x28] sm:$0xff] %v869_v10 }
  0xf6   : > { %v834_v12 = vpop.f32.mrf.mxu2  ;;  %v798_v15 = vpop.f32.mrf.mxu0 }
  0xf7   : > { %v853_v13 = vpop.f32.mrf.mxu3  ;;  %v835_v14 = vadd.f32 %v834_v12, %v816_v11  ;;  %v817_v16 = vpop.f32.mrf.mxu1 }
  0xf8   : > { %v818_v20 = vadd.f32 %v817_v16, %v798_v15 }
  0xf9   : > { %v854_v18 = vadd.f32 %v853_v13, %v835_v14 }
  0xfb   : > { %v864_v19 = vadd.f32 %v854_v18, %v272_v17 }
  0xfd   : > { %872 = vst [vmem:[#allocation2] sm:$0xff] %v864_v19 }
  0xfe   : > { %v836_v21 = vpop.f32.mrf.mxu2  ;;  %v801_v25 = vpop.f32.mrf.mxu0 }
  0xff   : > { %v855_v22 = vpop.f32.mrf.mxu3  ;;  %v837_v23 = vadd.f32 %v836_v21, %v818_v20  ;;  %v820_v26 = vpop.f32.mrf.mxu1 }
 0x100   : > { %v821_v29 = vadd.f32 %v820_v26, %v801_v25 }
 0x101   : > { %v856_v27 = vadd.f32 %v855_v22, %v837_v23 }
 0x103   : > { %v866_v28 = vadd.f32 %v856_v27, %v274_v24 }
 0x105   : > { %874 = vst [vmem:[#allocation2 + $0x10] sm:$0xff] %v866_v28 }
 0x106   : > { %v839_v30 = vpop.f32.mrf.mxu2  ;;  %v803_v35 = vpop.f32.mrf.mxu0 }
 0x107   : > { %v858_v31 = vpop.f32.mrf.mxu3  ;;  %v840_v32 = vadd.f32 %v839_v30, %v821_v29  ;;  %v822_v36 = vpop.f32.mrf.mxu1 }
 0x108   : > { %v823_v38 = vadd.f32 %v822_v36, %v803_v35 }
 0x109   : > { %v859_v34 = vadd.f32 %v858_v31, %v840_v32 }
 0x10b   : > { %v868_v37 = vadd.f32 %v859_v34, %v276_v33 }
 0x10d   : > { %876 = vst [vmem:[#allocation2 + $0x20] sm:$0xff] %v868_v37 }
 0x10e   : > { %v841_v39 = vpop.f32.mrf.mxu2 }
 0x10f   : > { %v842_v40 = vadd.f32 %v841_v39, %v823_v38  ;;  %v860_v42 = vpop.f32.mrf.mxu3 }
 0x111   : > { %v861_v57 = vadd.f32 %v860_v42, %v842_v40  ;;  %882 = sbr.rel (%p1310_p11) target bundleno = 287 (0x11f), region = 59 }
 0x113   : > { %v870_v43 = vadd.f32 %v861_v57, %v278_v41 }
 0x115   : > { %878 = vst [vmem:[#allocation2 + $0x38] sm:$0xff] %v870_v43 }
 0x116   : > { %v883_v62 = vld [vmem:[#allocation2 + $0x30] sm:$0xff]  ;;  %v884_v44 = vld [vmem:[#allocation2] sm:$0xff]  ;;  %v885_v63 = vld [vmem:[#allocation2 + $0x18] sm:$0xff] }
 0x117   : > { %891 = vst [vmem:[%s1755_s2] sm:$0xff] %v883_v62  ;;  %v886_v2 = vld [vmem:[#allocation2 + $0x10] sm:$0xff]  ;;  %v887_v45 = vld [vmem:[#allocation2 + $0x8] sm:$0xff]  ;;  %v888_v46 = vld [vmem:[#allocation2 + $0x20] sm:$0xff] }
 0x118   : > { %892 = vst [vmem:[%s1755_s2 + $0x8] sm:$0xff] %v884_v44  ;;  %v889_v47 = vld [vmem:[#allocation2 + $0x28] sm:$0xff] }
 0x119   : > { %893 = vst [vmem:[%s1755_s2 + $0x10] sm:$0xff] %v885_v63 }
 0x11a   : > { %894 = vst [vmem:[%s1755_s2 + $0x18] sm:$0xff] %v886_v2 }
 0x11b   : > { %895 = vst [vmem:[%s1755_s2 + $0x20] sm:$0xff] %v887_v45 }
 0x11c   : > { %v890_v48 = vld [vmem:[#allocation2 + $0x38] sm:$0xff]  ;;  %896 = vst [vmem:[%s1755_s2 + $0x28] sm:$0xff] %v888_v46 }
 0x11d   : > { %897 = vst [vmem:[%s1755_s2 + $0x30] sm:$0xff] %v889_v47 }
 0x11e   : > { %898 = vst [vmem:[%s1755_s2 + $0x38] sm:$0xff] %v890_v48 }
 0x11f PF: > { %s12_s13 = sadd.s32 1, %s1468_s13   ;;  %s1756_s9 = smov %s1456_s10 }
 0x120   : > { %p9_p12 = scmp.ge.s32.totalorder %s12_s13, 8   ;;  %s1757_s10 = smov %s1521_s17 }
 0x121   : > { %s1758_s11 = smov %s1464_s12  ;;  %s1759_s12 = smov %s1761_s14 }
 0x122   :  { %11 = sbr.rel (!%p9_p12) target bundleno = 3 (0x3), region = 97 }

// kernel: _lambda_.49
= control target key start
LH: loop header
LB: loop body
LE: loop exit
PB: predicated region body
PF: predicated region fallthrough
CT: control target
= control target key end

     0   :  { %s1148_s1 = inlined_call_operand.vmem [shape: bf16[768,128], index: 1, kind: input, shape index: {}]   ;;  %s1149_s0 = inlined_call_operand.vmem [shape: bf16[32,768], index: 0, kind: input, shape index: {}]   ;;  %s1150_s2 = inlined_call_operand.vmem [shape: f32[32,128], index: 2, kind: output, shape index: {}]  }
   0x1   :  { %v848_v0 = vld [vmem:[%s1148_s1 + $0x38] sm:$0xff]  ;;  %v847_v4 = vld [vmem:[%s1148_s1 + $0x30] sm:$0xff]  ;;  %v846_v8 = vld [vmem:[%s1148_s1 + $0x28] sm:$0xff] }
   0x2   :  { %v856_v1 = vld [vmem:[%s1148_s1 + $0x78] sm:$0xff]  ;;  %467 = vmatpush.bf16.msra.mxu0 %v848_v0  ;;  %v855_v5 = vld [vmem:[%s1148_s1 + $0x70] sm:$0xff]  ;;  %v854_v9 = vld [vmem:[%s1148_s1 + $0x68] sm:$0xff] }
   0x3   :  { %v864_v2 = vld [vmem:[%s1148_s1 + $0xb8] sm:$0xff]  ;;  %486 = vmatpush.bf16.msra.mxu1 %v856_v1  ;;  %v863_v6 = vld [vmem:[%s1148_s1 + $0xb0] sm:$0xff]  ;;  %v862_v10 = vld [vmem:[%s1148_s1 + $0xa8] sm:$0xff] }
   0x4   :  { %v872_v3 = vld [vmem:[%s1148_s1 + $0xf8] sm:$0xff]  ;;  %505 = vmatpush.bf16.msra.mxu2 %v864_v2  ;;  %v871_v7 = vld [vmem:[%s1148_s1 + $0xf0] sm:$0xff]  ;;  %v870_v11 = vld [vmem:[%s1148_s1 + $0xe8] sm:$0xff] }
   0x5   :  { %524 = vmatpush.bf16.msra.mxu3 %v872_v3  ;;  %v845_v12 = vld [vmem:[%s1148_s1 + $0x20] sm:$0xff]  ;;  %v844_v16 = vld [vmem:[%s1148_s1 + $0x18] sm:$0xff]  ;;  %v843_v20 = vld [vmem:[%s1148_s1 + $0x10] sm:$0xff] }
   0x6   :  { %468 = vmatpush.bf16.msra.mxu0 %v847_v4  ;;  %v853_v13 = vld [vmem:[%s1148_s1 + $0x60] sm:$0xff]  ;;  %v852_v17 = vld [vmem:[%s1148_s1 + $0x58] sm:$0xff]  ;;  %v851_v21 = vld [vmem:[%s1148_s1 + $0x50] sm:$0xff] }
   0x7   :  { %487 = vmatpush.bf16.msra.mxu1 %v855_v5  ;;  %v861_v14 = vld [vmem:[%s1148_s1 + $0xa0] sm:$0xff]  ;;  %v860_v18 = vld [vmem:[%s1148_s1 + $0x98] sm:$0xff]  ;;  %v859_v22 = vld [vmem:[%s1148_s1 + $0x90] sm:$0xff] }
   0x8   :  { %506 = vmatpush.bf16.msra.mxu2 %v863_v6  ;;  %v869_v15 = vld [vmem:[%s1148_s1 + $0xe0] sm:$0xff]  ;;  %v868_v19 = vld [vmem:[%s1148_s1 + $0xd8] sm:$0xff]  ;;  %v867_v23 = vld [vmem:[%s1148_s1 + $0xd0] sm:$0xff] }
   0x9   :  { %525 = vmatpush.bf16.msra.mxu3 %v871_v7  ;;  %v842_v24 = vld [vmem:[%s1148_s1 + $0x8] sm:$0xff]  ;;  %v841_v28 = vld [vmem:[%s1148_s1] sm:$0xff]  ;;  %v832_v33 = vld [vmem:[%s1149_s0 + $0x14] sm:$0xf0] }
   0xa   :  { %469 = vmatpush.bf16.msra.mxu0 %v846_v8  ;;  %v850_v25 = vld [vmem:[%s1148_s1 + $0x48] sm:$0xff]  ;;  %v849_v29 = vld [vmem:[%s1148_s1 + $0x40] sm:$0xff]  ;;  %v593_v35 = vld [vmem:[%s1149_s0 + $0x18] sm:$0xf0] }
   0xb   :  { %488 = vmatpush.bf16.msra.mxu1 %v854_v9  ;;  %v858_v26 = vld [vmem:[%s1148_s1 + $0x88] sm:$0xff]  ;;  %v857_v30 = vld [vmem:[%s1148_s1 + $0x80] sm:$0xff]  ;;  %v880_v40 = vld [vmem:[%s1148_s1 + $0x138] sm:$0xff] }
   0xc   :  { %507 = vmatpush.bf16.msra.mxu2 %v862_v10  ;;  %v866_v27 = vld [vmem:[%s1148_s1 + $0xc8] sm:$0xff]  ;;  %v865_v31 = vld [vmem:[%s1148_s1 + $0xc0] sm:$0xff]  ;;  %v888_v45 = vld [vmem:[%s1148_s1 + $0x178] sm:$0xff] }
   0xd   :  { %526 = vmatpush.bf16.msra.mxu3 %v870_v11  ;;  %v591_v32 = vld [vmem:[%s1149_s0] sm:$0xf]  ;;  %v829_v34 = vld [vmem:[%s1149_s0 + $0x4] sm:$0xf]  ;;  %v599_v36 = vld [vmem:[%s1149_s0 + $0x8] sm:$0xf] }
   0xe   :  { %470 = vmatpush.bf16.msra.mxu0 %v845_v12  ;;  %v833_v37 = vld [vmem:[%s1149_s0 + $0x1c] sm:$0xf0]  ;;  %v830_v38 = vld [vmem:[%s1149_s0 + $0xc] sm:$0xf]  ;;  %v601_v39 = vld [vmem:[%s1149_s0 + $0x20] sm:$0xf0]  ;;  %v592_v41 = vor.u32 %v832_v33, %v591_v32  ;;  %v596_v42 = vor.u32 %v829_v34, %v593_v35 }
   0xf   :  { %489 = vmatpush.bf16.msra.mxu1 %v853_v13  ;;  %v600_v43 = vor.u32 %v833_v37, %v599_v36  ;;  %v604_v44 = vor.u32 %v830_v38, %v601_v39  ;;  %v879_v46 = vld [vmem:[%s1148_s1 + $0x130] sm:$0xff]  ;;  %v878_v48 = vld [vmem:[%s1148_s1 + $0x128] sm:$0xff]  ;;  %v877_v50 = vld [vmem:[%s1148_s1 + $0x120] sm:$0xff] }
  0x10   :  { %508 = vmatpush.bf16.msra.mxu2 %v861_v14  ;;  %v887_v47 = vld [vmem:[%s1148_s1 + $0x170] sm:$0xff]  ;;  %v886_v49 = vld [vmem:[%s1148_s1 + $0x168] sm:$0xff]  ;;  %v885_v51 = vld [vmem:[%s1148_s1 + $0x160] sm:$0xff] }
  0x11   :  { %527 = vmatpush.bf16.msra.mxu3 %v869_v15  ;;  %v615_v52 = vld [vmem:[%s1149_s0 + $0x30] sm:$0xf]  ;;  %v838_v53 = vld [vmem:[%s1149_s0 + $0x44] sm:$0xf0]  ;;  %v835_v54 = vld [vmem:[%s1149_s0 + $0x34] sm:$0xf] }
  0x12   :  { %471 = vmatpush.bf16.msra.mxu0 %v844_v16  ;;  %v617_v55 = vld [vmem:[%s1149_s0 + $0x48] sm:$0xf0]  ;;  %v623_v56 = vld [vmem:[%s1149_s0 + $0x38] sm:$0xf]  ;;  %v839_v57 = vld [vmem:[%s1149_s0 + $0x4c] sm:$0xf0]  ;;  %v616_v61 = vor.u32 %v838_v53, %v615_v52 }
  0x13   :  { %490 = vmatpush.bf16.msra.mxu1 %v852_v17  ;;  %v836_v58 = vld [vmem:[%s1149_s0 + $0x3c] sm:$0xf]  ;;  %v625_v59 = vld [vmem:[%s1149_s0 + $0x50] sm:$0xf0]  ;;  %v620_v62 = vor.u32 %v835_v54, %v617_v55  ;;  %v624_v63 = vor.u32 %v839_v57, %v623_v56  ;;  %v874_v4 = vld [vmem:[%s1148_s1 + $0x108] sm:$0xff] }
  0x14   :  { %509 = vmatpush.bf16.msra.mxu2 %v860_v18  ;;  %v876_v60 = vld [vmem:[%s1148_s1 + $0x118] sm:$0xff]  ;;  %v628_v0 = vor.u32 %v836_v58, %v625_v59  ;;  %v875_v2 = vld [vmem:[%s1148_s1 + $0x110] sm:$0xff]  ;;  %v882_v5 = vld [vmem:[%s1148_s1 + $0x148] sm:$0xff] }
  0x15   :  { %528 = vmatpush.bf16.msra.mxu3 %v868_v19  ;;  %v884_v1 = vld [vmem:[%s1148_s1 + $0x158] sm:$0xff]  ;;  %v883_v3 = vld [vmem:[%s1148_s1 + $0x150] sm:$0xff]  ;;  %v873_v6 = vld [vmem:[%s1148_s1 + $0x100] sm:$0xff] }
  0x16   :  { %472 = vmatpush.bf16.msra.mxu0 %v843_v20  ;;  %v881_v7 = vld [vmem:[%s1148_s1 + $0x140] sm:$0xff]  ;;  %v607_v8 = vld [vmem:[%s1149_s0 + $0x10] sm:$0xf]  ;;  %v834_v9 = vld [vmem:[%s1149_s0 + $0x24] sm:$0xf0] }
  0x17   :  { %491 = vmatpush.bf16.msra.mxu1 %v851_v21  ;;  %v631_v10 = vld [vmem:[%s1149_s0 + $0x40] sm:$0xf]  ;;  %v840_v11 = vld [vmem:[%s1149_s0 + $0x54] sm:$0xf0]  ;;  %v831_v12 = vld [vmem:[%s1149_s0 + $0x14] sm:$0xf]  ;;  %v608_v16 = vor.u32 %v834_v9, %v607_v8 }
  0x18   :  { %510 = vmatpush.bf16.msra.mxu2 %v859_v22  ;;  %v609_v13 = vld [vmem:[%s1149_s0 + $0x28] sm:$0xf0]  ;;  %v837_v14 = vld [vmem:[%s1149_s0 + $0x44] sm:$0xf]  ;;  %v633_v15 = vld [vmem:[%s1149_s0 + $0x58] sm:$0xf0]  ;;  %v632_v17 = vor.u32 %v840_v11, %v631_v10 }
  0x19   :  { %529 = vmatpush.bf16.msra.mxu3 %v867_v23  ;;  %v612_v18 = vor.u32 %v831_v12, %v609_v13  ;;  %v636_v19 = vor.u32 %v837_v14, %v633_v15 }
  0x1a   :  { %473 = vmatpush.bf16.msra.mxu0 %v842_v24 }
  0x1b   :  { %492 = vmatpush.bf16.msra.mxu1 %v850_v25 }
  0x1c   :  { %511 = vmatpush.bf16.msra.mxu2 %v858_v26 }
  0x1d   :  { %530 = vmatpush.bf16.msra.mxu3 %v866_v27 }
  0x1e   :  { %474 = vmatpush.bf16.msra.mxu0 %v841_v28 }
  0x1f   :  { %493 = vmatpush.bf16.msra.mxu1 %v849_v29 }
  0x20   :  { %512 = vmatpush.bf16.msra.mxu2 %v857_v30 }
  0x21   :  { %531 = vmatpush.bf16.msra.mxu3 %v865_v31  ;;  %475 = vmatmul.bf16.vlgmr.msra.gmra.mxu0 %v592_v41 }
  0x22   :  { %543 = vmatpush.bf16.msrb.mxu0 %v880_v40  ;;  %494 = vmatmul.bf16.vlgmr.msra.gmra.mxu1 %v596_v42 }
  0x23   :  { %513 = vmatmul.bf16.vlgmr.msra.gmra.mxu2 %v600_v43  ;;  %562 = vmatpush.bf16.msrb.mxu1 %v888_v45 }
  0x24   :  { %889 = vmatpush.bf16.msrb.mxu2 %v880_v40  ;;  %532 = vmatmul.bf16.vlgmr.msra.gmra.mxu3 %v604_v44 }
  0x25   :  { %897 = vmatpush.bf16.msrb.mxu3 %v888_v45 }
  0x26   :  { %544 = vmatpush.bf16.msrb.mxu0 %v879_v46 }
  0x27   :  { %563 = vmatpush.bf16.msrb.mxu1 %v887_v47 }
  0x28   :  { %890 = vmatpush.bf16.msrb.mxu2 %v879_v46 }
  0x29   :  { %898 = vmatpush.bf16.msrb.mxu3 %v887_v47 }
  0x2a   :  { %545 = vmatpush.bf16.msrb.mxu0 %v878_v48 }
  0x2b   :  { %564 = vmatpush.bf16.msrb.mxu1 %v886_v49 }
  0x2c   :  { %891 = vmatpush.bf16.msrb.mxu2 %v878_v48 }
  0x2d   :  { %899 = vmatpush.bf16.msrb.mxu3 %v886_v49 }
  0x2e   :  { %546 = vmatpush.bf16.msrb.mxu0 %v877_v50 }
  0x2f   :  { %565 = vmatpush.bf16.msrb.mxu1 %v885_v51 }
  0x30   :  { %892 = vmatpush.bf16.msrb.mxu2 %v877_v50 }
  0x31   :  { %900 = vmatpush.bf16.msrb.mxu3 %v885_v51  ;;  %480 = vmatmul.bf16.gmra.mxu0 %v616_v61 }
  0x32   :  { %547 = vmatpush.bf16.msrb.mxu0 %v876_v60  ;;  %499 = vmatmul.bf16.gmra.mxu1 %v620_v62 }
  0x33   :  { %518 = vmatmul.bf16.gmra.mxu2 %v624_v63  ;;  %566 = vmatpush.bf16.msrb.mxu1 %v884_v1 }
  0x34   :  { %893 = vmatpush.bf16.msrb.mxu2 %v876_v60  ;;  %537 = vmatmul.bf16.gmra.mxu3 %v628_v0 }
  0x35   :  { %901 = vmatpush.bf16.msrb.mxu3 %v884_v1 }
  0x36   :  { %548 = vmatpush.bf16.msrb.mxu0 %v875_v2 }
  0x37   :  { %567 = vmatpush.bf16.msrb.mxu1 %v883_v3 }
  0x38   :  { %894 = vmatpush.bf16.msrb.mxu2 %v875_v2 }
  0x39   :  { %902 = vmatpush.bf16.msrb.mxu3 %v883_v3 }
  0x3a   :  { %549 = vmatpush.bf16.msrb.mxu0 %v874_v4 }
  0x3b   :  { %568 = vmatpush.bf16.msrb.mxu1 %v882_v5 }
  0x3c   :  { %895 = vmatpush.bf16.msrb.mxu2 %v874_v4 }
  0x3d   :  { %903 = vmatpush.bf16.msrb.mxu3 %v882_v5 }
  0x3e   :  { %550 = vmatpush.bf16.msrb.mxu0 %v873_v6 }
  0x3f   :  { %569 = vmatpush.bf16.msrb.mxu1 %v881_v7 }
  0x40   :  { %896 = vmatpush.bf16.msrb.mxu2 %v873_v6 }
  0x41   :  { %904 = vmatpush.bf16.msrb.mxu3 %v881_v7  ;;  %551 = vmatmul.bf16.vlgmr.msrb.gmra.mxu0 %v608_v16 }
  0x42   :  { %570 = vmatmul.bf16.vlgmr.msrb.gmra.mxu1 %v612_v18 }
  0x43   :  { %556 = vmatmul.bf16.vlgmr.msrb.gmra.mxu2 %v632_v17 }
  0x44   :  { %575 = vmatmul.bf16.vlgmr.msrb.gmra.mxu3 %v636_v19 }
  0x9e   :  { %v476_v20 = vpop.f32.mrf.mxu0 }
  0x9f   :  { %v495_v21 = vpop.f32.mrf.mxu1 }
  0xa0   :  { %v496_v30 = vadd.f32 %v495_v21, %v476_v20 }
  0xa6   :  { %v514_v22 = vpop.f32.mrf.mxu2  ;;  %v478_v24 = vpop.f32.mrf.mxu0 }
  0xa7   :  { %v533_v23 = vpop.f32.mrf.mxu3  ;;  %v497_v25 = vpop.f32.mrf.mxu1  ;;  %v515_v35 = vadd.f32 %v514_v22, %v496_v30 }
  0xa8   :  { %v498_v41 = vadd.f32 %v497_v25, %v478_v24 }
  0xa9   :  { %v534_v37 = vadd.f32 %v533_v23, %v515_v35 }
  0xae   :  { %v516_v26 = vpop.f32.mrf.mxu2  ;;  %v481_v28 = vpop.f32.mrf.mxu0 }
  0xaf   :  { %v535_v27 = vpop.f32.mrf.mxu3  ;;  %v500_v29 = vpop.f32.mrf.mxu1  ;;  %v517_v45 = vadd.f32 %v516_v26, %v498_v41 }
  0xb0   :  { %v501_v36 = vadd.f32 %v500_v29, %v481_v28 }
  0xb1   :  { %v536_v48 = vadd.f32 %v535_v27, %v517_v45 }
  0xb6   :  { %v519_v31 = vpop.f32.mrf.mxu2  ;;  %v483_v33 = vpop.f32.mrf.mxu0 }
  0xb7   :  { %v538_v32 = vpop.f32.mrf.mxu3  ;;  %v502_v34 = vpop.f32.mrf.mxu1  ;;  %v520_v44 = vadd.f32 %v519_v31, %v501_v36 }
  0xb8   :  { %v503_v50 = vadd.f32 %v502_v34, %v483_v33 }
  0xb9   :  { %v539_v47 = vadd.f32 %v538_v32, %v520_v44 }
  0xbe   :  { %v521_v38 = vpop.f32.mrf.mxu2  ;;  %v552_v40 = vpop.f32.mrf.mxu0 }
  0xbf   :  { %v540_v39 = vpop.f32.mrf.mxu3  ;;  %v553_v42 = vadd.f32 %v552_v40, %v534_v37  ;;  %v571_v43 = vpop.f32.mrf.mxu1  ;;  %v522_v55 = vadd.f32 %v521_v38, %v503_v50 }
  0xc1   :  { %v572_v46 = vadd.f32 %v571_v43, %v553_v42  ;;  %v541_v59 = vadd.f32 %v540_v39, %v522_v55 }
  0xc3   :  { %581 = vst [vmem:[%s1150_s2] sm:$0xff] %v572_v46 }
  0xc6   :  { %v557_v49 = vpop.f32.mrf.mxu2  ;;  %v554_v53 = vpop.f32.mrf.mxu0 }
  0xc7   :  { %v558_v51 = vadd.f32 %v557_v49, %v539_v47  ;;  %v576_v52 = vpop.f32.mrf.mxu3  ;;  %v555_v54 = vadd.f32 %v554_v53, %v536_v48  ;;  %v573_v57 = vpop.f32.mrf.mxu1 }
  0xc9   :  { %v577_v56 = vadd.f32 %v576_v52, %v558_v51  ;;  %v574_v58 = vadd.f32 %v573_v57, %v555_v54 }
  0xcb   :  { %583 = vst [vmem:[%s1150_s2 + $0x10] sm:$0xff] %v577_v56 }
  0xcc   :  { %582 = vst [vmem:[%s1150_s2 + $0x8] sm:$0xff] %v574_v58 }
  0xce   :  { %v559_v60 = vpop.f32.mrf.mxu2 }
  0xcf   :  { %v560_v61 = vadd.f32 %v559_v60, %v541_v59  ;;  %v578_v62 = vpop.f32.mrf.mxu3 }
  0xd1   :  { %v579_v63 = vadd.f32 %v578_v62, %v560_v61 }
  0xd3   :  { %584 = vst [vmem:[%s1150_s2 + $0x18] sm:$0xff] %v579_v63 }

// kernel: _lambda_.50
= control target key start
LH: loop header
LB: loop body
LE: loop exit
PB: predicated region body
PF: predicated region fallthrough
CT: control target
= control target key end

     0   :  { %s233_s1 = inlined_call_operand.vmem [shape: bf16[128,128], index: 1, kind: input, shape index: {}]   ;;  %s234_s0 = inlined_call_operand.vmem [shape: bf16[32,128], index: 0, kind: input, shape index: {}]   ;;  %s235_s2 = inlined_call_operand.vmem [shape: f32[32,128], index: 2, kind: output, shape index: {}]  }
   0x1   :  { %v167_v0 = vld [vmem:[%s233_s1 + $0x38] sm:$0xff]  ;;  %v166_v1 = vld [vmem:[%s233_s1 + $0x30] sm:$0xff]  ;;  %v165_v2 = vld [vmem:[%s233_s1 + $0x28] sm:$0xff] }
   0x2   :  { %91 = vmatpush.bf16.msra.mxu0 %v167_v0  ;;  %168 = vmatpush.bf16.msra.mxu1 %v167_v0  ;;  %v164_v3 = vld [vmem:[%s233_s1 + $0x20] sm:$0xff]  ;;  %v163_v4 = vld [vmem:[%s233_s1 + $0x18] sm:$0xff]  ;;  %v162_v5 = vld [vmem:[%s233_s1 + $0x10] sm:$0xff] }
   0x3   :  { %v161_v6 = vld [vmem:[%s233_s1 + $0x8] sm:$0xff]  ;;  %v160_v7 = vld [vmem:[%s233_s1] sm:$0xff] }
   0x4   :  { %v158_v8 = vld [vmem:[%s234_s0] sm:$0xff]  ;;  %v159_v9 = vld [vmem:[%s234_s0 + $0x8] sm:$0xff] }
   0x6   :  { %92 = vmatpush.bf16.msra.mxu0 %v166_v1  ;;  %169 = vmatpush.bf16.msra.mxu1 %v166_v1 }
   0xa   :  { %93 = vmatpush.bf16.msra.mxu0 %v165_v2  ;;  %170 = vmatpush.bf16.msra.mxu1 %v165_v2 }
   0xe   :  { %94 = vmatpush.bf16.msra.mxu0 %v164_v3  ;;  %171 = vmatpush.bf16.msra.mxu1 %v164_v3 }
  0x12   :  { %95 = vmatpush.bf16.msra.mxu0 %v163_v4  ;;  %172 = vmatpush.bf16.msra.mxu1 %v163_v4 }
  0x16   :  { %96 = vmatpush.bf16.msra.mxu0 %v162_v5  ;;  %173 = vmatpush.bf16.msra.mxu1 %v162_v5 }
  0x1a   :  { %97 = vmatpush.bf16.msra.mxu0 %v161_v6  ;;  %174 = vmatpush.bf16.msra.mxu1 %v161_v6 }
  0x1e   :  { %98 = vmatpush.bf16.msra.mxu0 %v160_v7  ;;  %175 = vmatpush.bf16.msra.mxu1 %v160_v7 }
  0x21   :  { %99 = vmatmul.bf16.vlgmr.msra.gmra.mxu0 %v158_v8  ;;  %104 = vmatmul.bf16.vlgmr.msra.gmra.mxu1 %v159_v9 }
  0x9e   :  { %v100_v10 = vpop.f32.mrf.mxu0  ;;  %v105_v11 = vpop.f32.mrf.mxu1 }
  0x9f   :  { %110 = vst [vmem:[%s235_s2] sm:$0xff] %v100_v10 }
  0xa0   :  { %112 = vst [vmem:[%s235_s2 + $0x10] sm:$0xff] %v105_v11 }
  0xa6   :  { %v102_v12 = vpop.f32.mrf.mxu0  ;;  %v107_v13 = vpop.f32.mrf.mxu1 }
  0xa7   :  { %111 = vst [vmem:[%s235_s2 + $0x8] sm:$0xff] %v102_v12 }
  0xa8   :  { %113 = vst [vmem:[%s235_s2 + $0x18] sm:$0xff] %v107_v13 }

// kernel: _lambda_.60
= control target key start
LH: loop header
LB: loop body
LE: loop exit
PB: predicated region body
PF: predicated region fallthrough
CT: control target
= control target key end

     0   :  { %s687_s9 = smov 0   ;;  %s689_s10 = smov 0   ;;  %s787_s0 = inlined_call_operand.vmem [shape: bf16[32,128], index: 0, kind: input, shape index: {}]   ;;  %s788_s1 = inlined_call_operand.vmem [shape: bf16[128,384], index: 1, kind: input, shape index: {}]   ;;  %s789_s2 = inlined_call_operand.vmem [shape: f32[32,384], index: 2, kind: output, shape index: {}]  }
   0x1   :  { %s691_s11 = smov 0   ;;  %s693_s12 = smov 0  }
   0x2   :  { %s695_s13 = smov 0  }
   0x3 LB: > { %s21_s14 = sadd.s32 1, %s666_s12  ;;  %s520_s15 = sadd.s32 4294967295, %s670_s13   ;;  %s670_s13 = sphi %s695_s13, %s12_s13   ;;  %s666_s12 = sphi %s693_s12, %s794_s12   ;;  %s662_s11 = sphi %s691_s11, %s793_s11   ;;  %s658_s10 = sphi %s689_s10, %s792_s10   ;;  %s654_s9 = sphi %s687_s9, %s791_s9  }
   0x4   : > { %p22_p0 = scmp.ge.s32.totalorder %s21_s14, 3  ;;  %p64_p1 = scmp.ne.s32.totalorder %s658_s10, %s654_s9 }
   0x5   : > { %p65_p2 = scmp.eq.s32.totalorder %s670_s13, 0  ;;  %p96_p4 = scmp.eq.s32.totalorder %s520_s15, 2 }
   0x6   : > { %s796_s14 = smov (%p22_p0, %s21_s14), 0  ;;  %s57_s17 = sadd.s32 1, %s658_s10 }
   0x7   : > { %p66_p3 = por %p65_p2, %p64_p1  ;;  %s54_s16 = ssub.s32 %s666_s12, %s796_s14 }
   0x8   : > { %p55_p5 = scmp.eq.s32.totalorder %s54_s16, 0  ;;  %p722_p6 = por %p96_p4, %p64_p1 }
   0x9   : > { %p524_p7 = scmp.ge.s32.totalorder %s670_s13, 3 }
   0xa   : > { %s727_s19 = scalar_select %p55_p5, %s658_s10, %s57_s17  }
   0xb   : > { %127 = sbr.rel (%p524_p7) target bundleno = 36 (0x24), region = 20 }
  0x10   : > { %130 = sbr.rel (!%p66_p3) target bundleno = 36 (0x24), region = 24  ;;  %s132_s20 = sand.u32 (%p66_p3), 1, %s658_s10  }
  0x11   : > { %s526_s21 = sshll.u32 (%p66_p3), %s666_s12, 2  ;;  %s525_s22 = sshll.u32 (%p66_p3), %s132_s20, 6 }
  0x12   : > { %s735_s25 = scalar_lea.vmem (%p66_p3), %s788_s1, %s526_s21  ;;  %s134_s26 = scalar_lea.vmem (%p66_p3), [#allocation2], %s525_s22 }
  0x13   : > { %v153_v0 = vld [vmem:[%s735_s25] sm:$0xf] (%p66_p3)  ;;  %v155_v1 = vld [vmem:[%s735_s25 + $0xc] sm:$0xf] (%p66_p3)  ;;  %v157_v2 = vld [vmem:[%s735_s25 + $0x18] sm:$0xf] (%p66_p3) }
  0x14   : > { %154 = vst [vmem:[%s134_s26] sm:$0xf] (%p66_p3), %v153_v0  ;;  %v159_v3 = vld [vmem:[%s735_s25 + $0x24] sm:$0xf] (%p66_p3)  ;;  %v161_v4 = vld [vmem:[%s735_s25 + $0x30] sm:$0xf] (%p66_p3) }
  0x15   : > { %156 = vst [vmem:[%s134_s26 + $0x4] sm:$0xf] %v155_v1  ;;  %v163_v5 = vld [vmem:[%s735_s25 + $0x3c] sm:$0xf]  ;;  %v165_v6 = vld [vmem:[%s735_s25 + $0x48] sm:$0xf] }
  0x16   : > { %158 = vst [vmem:[%s134_s26 + $0x8] sm:$0xf] %v157_v2  ;;  %v167_v7 = vld [vmem:[%s735_s25 + $0x54] sm:$0xf]  ;;  %v169_v8 = vld [vmem:[%s735_s25 + $0x60] sm:$0xf] }
  0x17   : > { %160 = vst [vmem:[%s134_s26 + $0xc] sm:$0xf] %v159_v3  ;;  %v171_v9 = vld [vmem:[%s735_s25 + $0x6c] sm:$0xf]  ;;  %v173_v10 = vld [vmem:[%s735_s25 + $0x78] sm:$0xf] }
  0x18   : > { %162 = vst [vmem:[%s134_s26 + $0x10] sm:$0xf] %v161_v4  ;;  %v175_v11 = vld [vmem:[%s735_s25 + $0x84] sm:$0xf]  ;;  %v177_v12 = vld [vmem:[%s735_s25 + $0x90] sm:$0xf] }
  0x19   : > { %164 = vst [vmem:[%s134_s26 + $0x14] sm:$0xf] %v163_v5  ;;  %v179_v13 = vld [vmem:[%s735_s25 + $0x9c] sm:$0xf]  ;;  %v181_v14 = vld [vmem:[%s735_s25 + $0xa8] sm:$0xf] }
  0x1a   : > { %166 = vst [vmem:[%s134_s26 + $0x18] sm:$0xf] %v165_v6  ;;  %v183_v15 = vld [vmem:[%s735_s25 + $0xb4] sm:$0xf] }
  0x1b   : > { %168 = vst [vmem:[%s134_s26 + $0x1c] sm:$0xf] %v167_v7 }
  0x1c   : > { %170 = vst [vmem:[%s134_s26 + $0x20] sm:$0xf] %v169_v8 }
  0x1d   : > { %172 = vst [vmem:[%s134_s26 + $0x24] sm:$0xf] %v171_v9 }
  0x1e   : > { %174 = vst [vmem:[%s134_s26 + $0x28] sm:$0xf] %v173_v10 }
  0x1f   : > { %176 = vst [vmem:[%s134_s26 + $0x2c] sm:$0xf] %v175_v11 }
  0x20   : > { %178 = vst [vmem:[%s134_s26 + $0x30] sm:$0xf] %v177_v12 }
  0x21   : > { %180 = vst [vmem:[%s134_s26 + $0x34] sm:$0xf] %v179_v13 }
  0x22   : > { %182 = vst [vmem:[%s134_s26 + $0x38] sm:$0xf] %v181_v14 }
  0x23   : > { %184 = vst [vmem:[%s134_s26 + $0x3c] sm:$0xf] %v183_v15 }
  0x24 PF: > { %p527_p8 = scmp.ge.s32.totalorder %s670_s13, 1  ;;  %p239_p9 = scmp.lt.s32.totalorder %s670_s13, 4 }
  0x26   : > { %p240_p10 = pnand %p527_p8, %p239_p9 }
  0x27   : > { %s246_s27 = sand.u32 (!%p240_p10), 1, %s654_s9  }
  0x28   : > { %243 = sbr.rel (%p240_p10) target bundleno = 221 (0xdd), region = 65  ;;  %s528_s28 = sshll.u32 (!%p240_p10), %s246_s27, 6 }
  0x29   : > { %s248_s29 = scalar_lea.vmem (!%p240_p10), [#allocation2], %s528_s28  ;;  %s529_s6 = sshll.u32 (!%p240_p10), %s246_s27, 5 }
  0x2a   : > { %s270_s7 = scalar_lea.vmem (!%p240_p10), [#allocation3], %s529_s6 }
  0x2d   : > { %v583_v16 = vld [vmem:[%s248_s29 + $0x38] sm:$0xff]  ;;  %v582_v17 = vld [vmem:[%s248_s29 + $0x30] sm:$0xff]  ;;  %v581_v18 = vld [vmem:[%s248_s29 + $0x28] sm:$0xff]  ;;  %s571_s8 = sshll.u32 (%p722_p6), %s662_s11, 3 }
  0x2e   : > { %358 = vmatpush.bf16.msra.mxu0 %v583_v16  ;;  %584 = vmatpush.bf16.msra.mxu1 %v583_v16  ;;  %v580_v19 = vld [vmem:[%s248_s29 + $0x20] sm:$0xff]  ;;  %v579_v20 = vld [vmem:[%s248_s29 + $0x18] sm:$0xff]  ;;  %v578_v21 = vld [vmem:[%s248_s29 + $0x10] sm:$0xff]  ;;  %s392_s9 = scalar_lea.vmem (%p722_p6), %s789_s2, %s571_s8 }
  0x2f   : > { %v577_v22 = vld [vmem:[%s248_s29 + $0x8] sm:$0xff]  ;;  %v576_v23 = vld [vmem:[%s248_s29] sm:$0xff] }
  0x30   : > { %v574_v24 = vld [vmem:[%s787_s0] sm:$0xff]  ;;  %v575_v25 = vld [vmem:[%s787_s0 + $0x8] sm:$0xff] }
  0x32   : > { %359 = vmatpush.bf16.msra.mxu0 %v582_v17  ;;  %585 = vmatpush.bf16.msra.mxu1 %v582_v17 }
  0x36   : > { %360 = vmatpush.bf16.msra.mxu0 %v581_v18  ;;  %586 = vmatpush.bf16.msra.mxu1 %v581_v18 }
  0x3a   : > { %361 = vmatpush.bf16.msra.mxu0 %v580_v19  ;;  %587 = vmatpush.bf16.msra.mxu1 %v580_v19 }
  0x3e   : > { %362 = vmatpush.bf16.msra.mxu0 %v579_v20  ;;  %588 = vmatpush.bf16.msra.mxu1 %v579_v20 }
  0x42   : > { %363 = vmatpush.bf16.msra.mxu0 %v578_v21  ;;  %589 = vmatpush.bf16.msra.mxu1 %v578_v21 }
  0x46   : > { %364 = vmatpush.bf16.msra.mxu0 %v577_v22  ;;  %590 = vmatpush.bf16.msra.mxu1 %v577_v22 }
  0x4a   : > { %365 = vmatpush.bf16.msra.mxu0 %v576_v23  ;;  %591 = vmatpush.bf16.msra.mxu1 %v576_v23 }
  0x4d   : > { %366 = vmatmul.bf16.vlgmr.msra.gmra.mxu0 %v574_v24  ;;  %371 = vmatmul.bf16.vlgmr.msra.gmra.mxu1 %v575_v25 }
  0xca   : > { %v367_v26 = vpop.f32.mrf.mxu0  ;;  %v372_v27 = vpop.f32.mrf.mxu1 }
  0xcb   : > { %377 = vst [vmem:[%s270_s7] sm:$0xff] %v367_v26 }
  0xcc   : > { %379 = vst [vmem:[%s270_s7 + $0x10] sm:$0xff] %v372_v27 }
  0xd0   : > { %387 = sbr.rel (!%p722_p6) target bundleno = 221 (0xdd), region = 73 }
  0xd2   : > { %v369_v28 = vpop.f32.mrf.mxu0  ;;  %v374_v29 = vpop.f32.mrf.mxu1  ;;  %v427_v30 = vld [vmem:[%s270_s7] sm:$0xff] (%p722_p6) }
  0xd3   : > { %378 = vst [vmem:[%s270_s7 + $0x8] sm:$0xff] %v369_v28  ;;  %v431_v32 = vld [vmem:[%s270_s7 + $0x10] sm:$0xff] (%p722_p6) }
  0xd4   : > { %380 = vst [vmem:[%s270_s7 + $0x18] sm:$0xff] %v374_v29 }
  0xd5   : > { %428 = vst [vmem:[%s392_s9] sm:$0xff] %v427_v30 }
  0xd6   : > { %432 = vst [vmem:[%s392_s9 + $0x30] sm:$0xff] %v431_v32 }
  0xda   : > { %v429_v31 = vld [vmem:[%s270_s7 + $0x8] sm:$0xff] }
  0xdb   : > { %v433_v33 = vld [vmem:[%s270_s7 + $0x18] sm:$0xff]  ;;  %430 = vst [vmem:[%s392_s9 + $0x18] sm:$0xff] %v429_v31 }
  0xdc   : > { %434 = vst [vmem:[%s392_s9 + $0x48] sm:$0xff] %v433_v33 }
  0xdd PF: > { %s12_s13 = sadd.s32 1, %s670_s13   ;;  %s791_s9 = smov %s658_s10 }
  0xde   : > { %p9_p11 = scmp.ge.s32.totalorder %s12_s13, 5   ;;  %s792_s10 = smov %s727_s19 }
  0xdf   : > { %s793_s11 = smov %s666_s12  ;;  %s794_s12 = smov %s796_s14 }
  0xe0   :  { %11 = sbr.rel (!%p9_p11) target bundleno = 3 (0x3), region = 145 }

// kernel: _lambda_.61
= control target key start
LH: loop header
LB: loop body
LE: loop exit
PB: predicated region body
PF: predicated region fallthrough
CT: control target
= control target key end

     0   :  { %s903_s9 = smov 0   ;;  %s905_s10 = smov 0   ;;  %s1089_s0 = inlined_call_operand.vmem [shape: bf16[32,256], index: 0, kind: input, shape index: {}]   ;;  %s1090_s1 = inlined_call_operand.vmem [shape: bf16[256,1152], index: 1, kind: input, shape index: {}]   ;;  %s1091_s2 = inlined_call_operand.vmem [shape: f32[32,1152], index: 2, kind: output, shape index: {}]  }
   0x1   :  { %s907_s11 = smov 0   ;;  %s909_s12 = smov 0  }
   0x2   :  { %s911_s13 = smov 0  }
   0x3 LB: > { %s21_s14 = sadd.s32 1, %s882_s12  ;;  %s678_s15 = sadd.s32 4294967295, %s886_s13   ;;  %s886_s13 = sphi %s911_s13, %s12_s13   ;;  %s882_s12 = sphi %s909_s12, %s1096_s12   ;;  %s878_s11 = sphi %s907_s11, %s1095_s11   ;;  %s874_s10 = sphi %s905_s10, %s1094_s10   ;;  %s870_s9 = sphi %s903_s9, %s1093_s9  }
   0x4   : > { %p22_p0 = scmp.ge.s32.totalorder %s21_s14, 9  ;;  %p64_p1 = scmp.ne.s32.totalorder %s874_s10, %s870_s9 }
   0x5   : > { %p65_p2 = scmp.eq.s32.totalorder %s886_s13, 0  ;;  %p96_p4 = scmp.eq.s32.totalorder %s678_s15, 8 }
   0x6   : > { %s1098_s14 = smov (%p22_p0, %s21_s14), 0  ;;  %s57_s17 = sadd.s32 1, %s874_s10 }
   0x7   : > { %p66_p3 = por %p65_p2, %p64_p1  ;;  %s54_s16 = ssub.s32 %s882_s12, %s1098_s14 }
   0x8   : > { %p55_p5 = scmp.eq.s32.totalorder %s54_s16, 0  ;;  %p938_p6 = por %p96_p4, %p64_p1 }
   0x9   : > { %p682_p7 = scmp.ge.s32.totalorder %s886_s13, 9 }
   0xa   : > { %s943_s19 = scalar_select %p55_p5, %s874_s10, %s57_s17  }
   0xb   : > { %128 = sbr.rel (%p682_p7) target bundleno = 52 (0x34), region = 20 }
  0x10   : > { %131 = sbr.rel (!%p66_p3) target bundleno = 52 (0x34), region = 24  ;;  %s133_s20 = sand.u32 (%p66_p3), 1, %s874_s10  }
  0x11   : > { %s684_s21 = sshll.u32 (%p66_p3), %s882_s12, 2  ;;  %s683_s22 = sshll.u32 (%p66_p3), %s133_s20, 7 }
  0x12   : > { %s951_s25 = scalar_lea.vmem (%p66_p3), %s1090_s1, %s684_s21  ;;  %s955_s26 = scalar_lea.vmem (%p66_p3), [#allocation2], %s683_s22 }
  0x13   : > { %v154_v0 = vld [vmem:[%s951_s25] sm:$0xf] (%p66_p3)  ;;  %v156_v1 = vld [vmem:[%s951_s25 + $0x24] sm:$0xf] (%p66_p3)  ;;  %v158_v2 = vld [vmem:[%s951_s25 + $0x48] sm:$0xf] (%p66_p3) }
  0x14   : > { %155 = vst [vmem:[%s955_s26] sm:$0xf] (%p66_p3), %v154_v0  ;;  %v160_v3 = vld [vmem:[%s951_s25 + $0x6c] sm:$0xf] (%p66_p3)  ;;  %v162_v4 = vld [vmem:[%s951_s25 + $0x90] sm:$0xf] (%p66_p3) }
  0x15   : > { %157 = vst [vmem:[%s955_s26 + $0x4] sm:$0xf] %v156_v1  ;;  %v164_v5 = vld [vmem:[%s951_s25 + $0xb4] sm:$0xf]  ;;  %v166_v6 = vld [vmem:[%s951_s25 + $0xd8] sm:$0xf] }
  0x16   : > { %159 = vst [vmem:[%s955_s26 + $0x8] sm:$0xf] %v158_v2  ;;  %v168_v7 = vld [vmem:[%s951_s25 + $0xfc] sm:$0xf]  ;;  %v170_v8 = vld [vmem:[%s951_s25 + $0x120] sm:$0xf] }
  0x17   : > { %161 = vst [vmem:[%s955_s26 + $0xc] sm:$0xf] %v160_v3  ;;  %v172_v9 = vld [vmem:[%s951_s25 + $0x144] sm:$0xf]  ;;  %v174_v10 = vld [vmem:[%s951_s25 + $0x168] sm:$0xf] }
  0x18   : > { %163 = vst [vmem:[%s955_s26 + $0x10] sm:$0xf] %v162_v4  ;;  %v176_v11 = vld [vmem:[%s951_s25 + $0x18c] sm:$0xf]  ;;  %v178_v12 = vld [vmem:[%s951_s25 + $0x1b0] sm:$0xf] }
  0x19   : > { %165 = vst [vmem:[%s955_s26 + $0x14] sm:$0xf] %v164_v5  ;;  %v180_v13 = vld [vmem:[%s951_s25 + $0x1d4] sm:$0xf]  ;;  %v182_v14 = vld [vmem:[%s951_s25 + $0x1f8] sm:$0xf] }
  0x1a   : > { %167 = vst [vmem:[%s955_s26 + $0x18] sm:$0xf] %v166_v6  ;;  %v184_v15 = vld [vmem:[%s951_s25 + $0x21c] sm:$0xf]  ;;  %v186_v16 = vld [vmem:[%s951_s25 + $0x240] sm:$0xf] }
  0x1b   : > { %169 = vst [vmem:[%s955_s26 + $0x1c] sm:$0xf] %v168_v7  ;;  %v188_v17 = vld [vmem:[%s951_s25 + $0x264] sm:$0xf]  ;;  %v190_v18 = vld [vmem:[%s951_s25 + $0x288] sm:$0xf] }
  0x1c   : > { %171 = vst [vmem:[%s955_s26 + $0x20] sm:$0xf] %v170_v8  ;;  %v192_v19 = vld [vmem:[%s951_s25 + $0x2ac] sm:$0xf]  ;;  %v194_v20 = vld [vmem:[%s951_s25 + $0x2d0] sm:$0xf] }
  0x1d   : > { %173 = vst [vmem:[%s955_s26 + $0x24] sm:$0xf] %v172_v9  ;;  %v196_v21 = vld [vmem:[%s951_s25 + $0x2f4] sm:$0xf]  ;;  %v198_v22 = vld [vmem:[%s951_s25 + $0x318] sm:$0xf] }
  0x1e   : > { %175 = vst [vmem:[%s955_s26 + $0x28] sm:$0xf] %v174_v10  ;;  %v200_v23 = vld [vmem:[%s951_s25 + $0x33c] sm:$0xf]  ;;  %v202_v24 = vld [vmem:[%s951_s25 + $0x360] sm:$0xf] }
  0x1f   : > { %177 = vst [vmem:[%s955_s26 + $0x2c] sm:$0xf] %v176_v11  ;;  %v204_v25 = vld [vmem:[%s951_s25 + $0x384] sm:$0xf]  ;;  %v206_v26 = vld [vmem:[%s951_s25 + $0x3a8] sm:$0xf] }
  0x20   : > { %179 = vst [vmem:[%s955_s26 + $0x30] sm:$0xf] %v178_v12  ;;  %v208_v27 = vld [vmem:[%s951_s25 + $0x3cc] sm:$0xf]  ;;  %v210_v28 = vld [vmem:[%s951_s25 + $0x3f0] sm:$0xf] }
  0x21   : > { %181 = vst [vmem:[%s955_s26 + $0x34] sm:$0xf] %v180_v13  ;;  %v212_v29 = vld [vmem:[%s951_s25 + $0x414] sm:$0xf]  ;;  %v214_v30 = vld [vmem:[%s951_s25 + $0x438] sm:$0xf] }
  0x22   : > { %183 = vst [vmem:[%s955_s26 + $0x38] sm:$0xf] %v182_v14  ;;  %v216_v31 = vld [vmem:[%s951_s25 + $0x45c] sm:$0xf] }
  0x23   : > { %185 = vst [vmem:[%s955_s26 + $0x3c] sm:$0xf] %v184_v15 }
  0x24   : > { %187 = vst [vmem:[%s955_s26 + $0x40] sm:$0xf] %v186_v16 }
  0x25   : > { %189 = vst [vmem:[%s955_s26 + $0x44] sm:$0xf] %v188_v17 }
  0x26   : > { %191 = vst [vmem:[%s955_s26 + $0x48] sm:$0xf] %v190_v18 }
  0x27   : > { %193 = vst [vmem:[%s955_s26 + $0x4c] sm:$0xf] %v192_v19 }
  0x28   : > { %195 = vst [vmem:[%s955_s26 + $0x50] sm:$0xf] %v194_v20 }
  0x29   : > { %197 = vst [vmem:[%s955_s26 + $0x54] sm:$0xf] %v196_v21 }
  0x2a   : > { %199 = vst [vmem:[%s955_s26 + $0x58] sm:$0xf] %v198_v22 }
  0x2b   : > { %201 = vst [vmem:[%s955_s26 + $0x5c] sm:$0xf] %v200_v23 }
  0x2c   : > { %203 = vst [vmem:[%s955_s26 + $0x60] sm:$0xf] %v202_v24 }
  0x2d   : > { %205 = vst [vmem:[%s955_s26 + $0x64] sm:$0xf] %v204_v25 }
  0x2e   : > { %207 = vst [vmem:[%s955_s26 + $0x68] sm:$0xf] %v206_v26 }
  0x2f   : > { %209 = vst [vmem:[%s955_s26 + $0x6c] sm:$0xf] %v208_v27 }
  0x30   : > { %211 = vst [vmem:[%s955_s26 + $0x70] sm:$0xf] %v210_v28 }
  0x31   : > { %213 = vst [vmem:[%s955_s26 + $0x74] sm:$0xf] %v212_v29 }
  0x32   : > { %215 = vst [vmem:[%s955_s26 + $0x78] sm:$0xf] %v214_v30 }
  0x33   : > { %217 = vst [vmem:[%s955_s26 + $0x7c] sm:$0xf] %v216_v31 }
  0x34 PF: > { %p685_p8 = scmp.ge.s32.totalorder %s886_s13, 1  ;;  %p304_p9 = scmp.lt.s32.totalorder %s886_s13, 10 }
  0x36   : > { %p305_p10 = pnand %p685_p8, %p304_p9 }
  0x37   : > { %s311_s27 = sand.u32 (!%p305_p10), 1, %s870_s9  }
  0x38   : > { %308 = sbr.rel (%p305_p10) target bundleno = 245 (0xf5), region = 65  ;;  %s686_s28 = sshll.u32 (!%p305_p10), %s311_s27, 7 }
  0x39   : > { %s1024_s29 = scalar_lea.vmem (!%p305_p10), [#allocation2], %s686_s28  ;;  %s687_s26 = sshll.u32 (!%p305_p10), %s311_s27, 5 }
  0x3a   : > { %s336_s28 = scalar_lea.vmem (!%p305_p10), [#allocation3], %s687_s26 }
  0x3d   : > { %v783_v32 = vld [vmem:[%s1024_s29 + $0x38] sm:$0xff]  ;;  %v782_v34 = vld [vmem:[%s1024_s29 + $0x30] sm:$0xff]  ;;  %v781_v36 = vld [vmem:[%s1024_s29 + $0x28] sm:$0xff]  ;;  %s769_s9 = sshll.u32 (%p938_p6), %s878_s11, 3 }
  0x3e   : > { %v791_v33 = vld [vmem:[%s1024_s29 + $0x78] sm:$0xff]  ;;  %497 = vmatpush.bf16.msra.mxu0 %v783_v32  ;;  %792 = vmatpush.bf16.msra.mxu2 %v783_v32  ;;  %v790_v35 = vld [vmem:[%s1024_s29 + $0x70] sm:$0xff]  ;;  %v789_v37 = vld [vmem:[%s1024_s29 + $0x68] sm:$0xff]  ;;  %s550_s30 = scalar_lea.vmem (%p938_p6), %s1091_s2, %s769_s9 }
  0x3f   : > { %516 = vmatpush.bf16.msra.mxu1 %v791_v33  ;;  %800 = vmatpush.bf16.msra.mxu3 %v791_v33  ;;  %v780_v38 = vld [vmem:[%s1024_s29 + $0x20] sm:$0xff]  ;;  %v779_v40 = vld [vmem:[%s1024_s29 + $0x18] sm:$0xff]  ;;  %v778_v42 = vld [vmem:[%s1024_s29 + $0x10] sm:$0xff] }
  0x40   : > { %v788_v39 = vld [vmem:[%s1024_s29 + $0x60] sm:$0xff]  ;;  %v787_v41 = vld [vmem:[%s1024_s29 + $0x58] sm:$0xff]  ;;  %v786_v43 = vld [vmem:[%s1024_s29 + $0x50] sm:$0xff] }
  0x41   : > { %v777_v44 = vld [vmem:[%s1024_s29 + $0x8] sm:$0xff]  ;;  %v690_v46 = vld [vmem:[%s1089_s0] sm:$0xf]  ;;  %v698_v50 = vld [vmem:[%s1089_s0 + $0x10] sm:$0xf] }
  0x42   : > { %498 = vmatpush.bf16.msra.mxu0 %v782_v34  ;;  %793 = vmatpush.bf16.msra.mxu2 %v782_v34  ;;  %v785_v45 = vld [vmem:[%s1024_s29 + $0x48] sm:$0xff]  ;;  %v776_v47 = vld [vmem:[%s1024_s29] sm:$0xff]  ;;  %v775_v51 = vld [vmem:[%s1089_s0 + $0x14] sm:$0xf0] }
  0x43   : > { %517 = vmatpush.bf16.msra.mxu1 %v790_v35  ;;  %801 = vmatpush.bf16.msra.mxu3 %v790_v35  ;;  %v784_v48 = vld [vmem:[%s1024_s29 + $0x40] sm:$0xff]  ;;  %v773_v49 = vld [vmem:[%s1089_s0 + $0x4] sm:$0xf0]  ;;  %v692_v53 = vld [vmem:[%s1089_s0 + $0x8] sm:$0xf0]  ;;  %v699_v57 = vor.u32 %v775_v51, %v698_v50 }
  0x44   : > { %v772_v52 = vld [vmem:[%s1089_s0 + $0x4] sm:$0xf]  ;;  %v774_v54 = vld [vmem:[%s1089_s0 + $0x14] sm:$0xf]  ;;  %v700_v55 = vld [vmem:[%s1089_s0 + $0x18] sm:$0xf0]  ;;  %v691_v56 = vor.u32 %v773_v49, %v690_v46 }
  0x45   : > { %v695_v58 = vor.u32 %v772_v52, %v692_v53  ;;  %v703_v59 = vor.u32 %v774_v54, %v700_v55 }
  0x46   : > { %499 = vmatpush.bf16.msra.mxu0 %v781_v36  ;;  %794 = vmatpush.bf16.msra.mxu2 %v781_v36 }
  0x47   : > { %518 = vmatpush.bf16.msra.mxu1 %v789_v37  ;;  %802 = vmatpush.bf16.msra.mxu3 %v789_v37 }
  0x4a   : > { %500 = vmatpush.bf16.msra.mxu0 %v780_v38  ;;  %795 = vmatpush.bf16.msra.mxu2 %v780_v38 }
  0x4b   : > { %519 = vmatpush.bf16.msra.mxu1 %v788_v39  ;;  %803 = vmatpush.bf16.msra.mxu3 %v788_v39 }
  0x4e   : > { %501 = vmatpush.bf16.msra.mxu0 %v779_v40  ;;  %796 = vmatpush.bf16.msra.mxu2 %v779_v40 }
  0x4f   : > { %520 = vmatpush.bf16.msra.mxu1 %v787_v41  ;;  %804 = vmatpush.bf16.msra.mxu3 %v787_v41 }
  0x52   : > { %502 = vmatpush.bf16.msra.mxu0 %v778_v42  ;;  %797 = vmatpush.bf16.msra.mxu2 %v778_v42 }
  0x53   : > { %521 = vmatpush.bf16.msra.mxu1 %v786_v43  ;;  %805 = vmatpush.bf16.msra.mxu3 %v786_v43 }
  0x56   : > { %503 = vmatpush.bf16.msra.mxu0 %v777_v44  ;;  %798 = vmatpush.bf16.msra.mxu2 %v777_v44 }
  0x57   : > { %522 = vmatpush.bf16.msra.mxu1 %v785_v45  ;;  %806 = vmatpush.bf16.msra.mxu3 %v785_v45 }
  0x5a   : > { %504 = vmatpush.bf16.msra.mxu0 %v776_v47  ;;  %799 = vmatpush.bf16.msra.mxu2 %v776_v47 }
  0x5b   : > { %523 = vmatpush.bf16.msra.mxu1 %v784_v48  ;;  %807 = vmatpush.bf16.msra.mxu3 %v784_v48 }
  0x5d   : > { %505 = vmatmul.bf16.vlgmr.msra.gmra.mxu0 %v691_v56  ;;  %510 = vmatmul.bf16.vlgmr.msra.gmra.mxu2 %v699_v57 }
  0x5e   : > { %524 = vmatmul.bf16.vlgmr.msra.gmra.mxu1 %v695_v58  ;;  %529 = vmatmul.bf16.vlgmr.msra.gmra.mxu3 %v703_v59 }
  0xda   : > { %v506_v60 = vpop.f32.mrf.mxu0 }
  0xdb   : > { %v525_v61 = vpop.f32.mrf.mxu1 }
  0xdc   : > { %v526_v62 = vadd.f32 %v525_v61, %v506_v60 }
  0xde   : > { %535 = vst [vmem:[%s336_s28] sm:$0xff] %v526_v62 }
  0xe0   : > { %v511_v63 = vpop.f32.mrf.mxu2 }
  0xe1   : > { %v530_v0 = vpop.f32.mrf.mxu3 }
  0xe2   : > { %v531_v1 = vadd.f32 %v530_v0, %v511_v63  ;;  %v508_v2 = vpop.f32.mrf.mxu0 }
  0xe3   : > { %v527_v3 = vpop.f32.mrf.mxu1 }
  0xe4   : > { %537 = vst [vmem:[%s336_s28 + $0x10] sm:$0xff] %v531_v1  ;;  %v528_v4 = vadd.f32 %v527_v3, %v508_v2 }
  0xe5   : > { %v585_v8 = vld [vmem:[%s336_s28] sm:$0xff] (%p938_p6) }
  0xe6   : > { %536 = vst [vmem:[%s336_s28 + $0x8] sm:$0xff] %v528_v4 }
  0xe7   : > { %586 = vst [vmem:[%s550_s30] sm:$0xff] (%p938_p6), %v585_v8 }
  0xe8   : > { %v513_v5 = vpop.f32.mrf.mxu2  ;;  %545 = sbr.rel (!%p938_p6) target bundleno = 245 (0xf5), region = 73 }
  0xe9   : > { %v532_v6 = vpop.f32.mrf.mxu3 }
  0xea   : > { %v533_v7 = vadd.f32 %v532_v6, %v513_v5 }
  0xeb   : > { %v589_v10 = vld [vmem:[%s336_s28 + $0x10] sm:$0xff] (%p938_p6) }
  0xec   : > { %538 = vst [vmem:[%s336_s28 + $0x18] sm:$0xff] %v533_v7 }
  0xed   : > { %v587_v9 = vld [vmem:[%s336_s28 + $0x8] sm:$0xff]  ;;  %590 = vst [vmem:[%s550_s30 + $0x90] sm:$0xff] %v589_v10 }
  0xee   : > { %588 = vst [vmem:[%s550_s30 + $0x48] sm:$0xff] %v587_v9 }
  0xf3   : > { %v591_v11 = vld [vmem:[%s336_s28 + $0x18] sm:$0xff] }
  0xf4   : > { %592 = vst [vmem:[%s550_s30 + $0xd8] sm:$0xff] %v591_v11 }
  0xf5 PF: > { %s12_s13 = sadd.s32 1, %s886_s13   ;;  %s1093_s9 = smov %s874_s10 }
  0xf6   : > { %p9_p11 = scmp.ge.s32.totalorder %s12_s13, 11   ;;  %s1094_s10 = smov %s943_s19 }
  0xf7   : > { %s1095_s11 = smov %s882_s12  ;;  %s1096_s12 = smov %s1098_s14 }
  0xf8   :  { %11 = sbr.rel (!%p9_p11) target bundleno = 3 (0x3), region = 145 }

</bundles_post_ra>
